<compile_context>
chip_gen: v7x
topology: tpu7x:2x2x1
jax: 0.10.0
libtpu: 0.0.40
codegen_flags: <defaults>
</compile_context>

<pallas_src>
import jax
import jax.numpy as jnp
import numpy as np
from jax import lax
from jax.experimental import pallas as pl
from jax.experimental.pallas import tpu as pltpu


def _make_bigru_kernel(T, Bp, Hp):
    """Fused BiGRU + Linear + Sigmoid kernel for static (T, Bp, Hp)."""

    def kernel(x_ref,        # (T*Bp, D)   time-major, batch padded to Bp
               wih_ref,      # (D, 6*Hp)   [f_r|f_z|f_n|b_r|b_z|b_n], lane-padded gates
               bi_ref,       # (1, 6*Hp)   b_ih (+ b_hh for r/z), lane-padded
               whf_ref,      # (Hp, 3*Hp)  fused forward  W_hh (tile-aligned gates)
               whb_ref,      # (Hp, 3*Hp)  fused backward W_hh
               bfn_ref,      # (1, Hp)     b_hh of the forward  n gate
               bbn_ref,      # (1, Hp)     b_hh of the backward n gate
               wdf_ref,      # (1, Hp)     dense weight, forward half
               wdb_ref,      # (1, Hp)     dense weight, backward half
               bd_ref,       # (1, 1)      dense bias
               out_ref):     # (Bp, T)     sigmoid(logits)
        # ---- one-shot input projection for both directions & all gates -------
        gi = (jnp.dot(x_ref[...], wih_ref[...],
                      preferred_element_type=jnp.float32)
              + bi_ref[...])                                     # (T*Bp, 6*Hp)

        whf = whf_ref[...]
        whb = whb_ref[...]

        # ---- hoisted broadcasts (JAX does not CSE broadcast_in_dim) ----------
        bfn = jnp.broadcast_to(bfn_ref[...], (Bp, Hp))
        bbn = jnp.broadcast_to(bbn_ref[...], (Bp, Hp))
        wdf = jnp.broadcast_to(wdf_ref[...], (Bp, Hp))
        wdb = jnp.broadcast_to(wdb_ref[...], (Bp, Hp))

        def sig(v):
            # sigmoid(x) = 0.5*tanh(0.5*x) + 0.5  -> one EUP op instead of two.
            return 0.5 * jnp.tanh(0.5 * v) + 0.5

        def cell(h, gi_r, gi_z, gi_n, whh, b_n):
            """One GRU step: a single fused h @ W_hh matmul on the serial chain."""
            gh = jnp.dot(h, whh, preferred_element_type=jnp.float32)  # (Bp, 3*Hp)
            r = sig(gi_r + gh[:, 0 * Hp:1 * Hp])
            z = sig(gi_z + gh[:, 1 * Hp:2 * Hp])
            n = jnp.tanh(gi_n + r * (gh[:, 2 * Hp:3 * Hp] + b_n))
            return (1.0 - z) * n + z * h       # padding lanes of h stay exactly 0

        col = lax.broadcasted_iota(jnp.int32, (Bp, T), 1)

        h_f = jnp.zeros((Bp, Hp), jnp.float32)
        h_b = jnp.zeros((Bp, Hp), jnp.float32)
        acc = jnp.zeros((Bp, T), jnp.float32)   # single bounded logit accumulator

        # ---- fused, fully-unrolled forward+backward recurrence ---------------
        for i in range(T):
            tf = i            # forward time index
            tb = T - 1 - i    # backward time index
            rf = slice(tf * Bp, (tf + 1) * Bp)   # sublane-tile-aligned (Bp = 8k)
            rb = slice(tb * Bp, (tb + 1) * Bp)

            h_f = cell(h_f,
                       gi[rf, 0 * Hp:1 * Hp], gi[rf, 1 * Hp:2 * Hp],
                       gi[rf, 2 * Hp:3 * Hp], whf, bfn)
            h_b = cell(h_b,
                       gi[rb, 3 * Hp:4 * Hp], gi[rb, 4 * Hp:5 * Hp],
                       gi[rb, 5 * Hp:6 * Hp], whb, bbn)

            # In-loop output projection: VPU multiply + lane reduce (XLU), off
            # the recurrence critical path; masked-select into one accumulator.
            lf = jnp.sum(h_f * wdf, axis=-1, keepdims=True)   # (Bp, 1)
            lb = jnp.sum(h_b * wdb, axis=-1, keepdims=True)   # (Bp, 1)
            acc = acc + jnp.where(col == tf, lf, 0.0) \
                      + jnp.where(col == tb, lb, 0.0)

        out_ref[...] = sig(acc + bd_ref[...])                  # (Bp, T)

    return kernel


def bigru_forward(x, p):
    """x: (B, T, D) batch_first.  p: kernel-layout params.  Returns (B, T, 1)."""
    B, T, D = x.shape
    Hp = p["whh_f"].shape[0]            # lane-padded hidden width (128)
    Bp = ((B + 7) // 8) * 8             # pad batch to the f32 sublane tile

    # time-major + flattened, batch zero-padded: row index = t*Bp + b, so every
    # per-step row slice in the kernel is sublane-tile aligned.
    x_p = jnp.pad(x.astype(jnp.float32), ((0, Bp - B), (0, 0), (0, 0)))
    x_tm = jnp.transpose(x_p, (1, 0, 2)).reshape(T * Bp, D)

    vmem = pl.BlockSpec(memory_space=pltpu.MemorySpace.VMEM)
    out = pl.pallas_call(
        _make_bigru_kernel(T, Bp, Hp),
        out_shape=jax.ShapeDtypeStruct((Bp, T), jnp.float32),
        in_specs=[vmem] * 10,
        out_specs=vmem,
    )(x_tm,
      p["wih_all"], p["bi_all"],
      p["whh_f"], p["whh_b"],
      p["bhn_f"], p["bhn_b"],
      p["wd_f"], p["wd_b"], p["bd"])
    return out[:B, :, None]                                      # (B, T, 1)


def prepare_params(W_ih_f, W_hh_f, b_ih_f, b_hh_f,
                   W_ih_b, W_hh_b, b_ih_b, b_hh_b,
                   W_d, b_d, H, Hp=128):
    """PyTorch-layout GRU/Linear params -> lane-padded kernel layout (r, z, n)."""
    def gates(a):
        return a[:H], a[H:2 * H], a[2 * H:]

    def pad_cols(m):                      # (rows, H) -> (rows, Hp)
        return jnp.pad(m, ((0, 0), (0, Hp - m.shape[1])))

    def pad_vec(v):                       # (H,) -> (Hp,)
        return jnp.pad(v, (0, Hp - v.shape[0]))

    # input->hidden for both directions, each gate lane-padded to a 128 tile.
    wi_blocks = []
    for W in (W_ih_f, W_ih_b):
        for g in gates(W):                           # (H, D)
            wi_blocks.append(pad_cols(g.T))          # (D, Hp)
    wih_all = jnp.concatenate(wi_blocks, axis=1)     # (D, 6*Hp)

    bif_r, bif_z, bif_n = gates(b_ih_f)
    bhf_r, bhf_z, bhf_n = gates(b_hh_f)
    bib_r, bib_z, bib_n = gates(b_ih_b)
    bhb_r, bhb_z, bhb_n = gates(b_hh_b)
    # fold b_ih (all gates) and b_hh (r, z gates only) into the GI bias;
    # b_hh_n must stay with the h @ W_hh_n term (it gets multiplied by r).
    bi_all = jnp.concatenate(
        [pad_vec(bif_r + bhf_r), pad_vec(bif_z + bhf_z), pad_vec(bif_n),
         pad_vec(bib_r + bhb_r), pad_vec(bib_z + bhb_z), pad_vec(bib_n)])[None, :]

    # hidden->hidden fused per direction: (Hp, 3*Hp), real block in the
    # top-left H rows / first H lanes of each 128-lane gate tile.
    def fuse_hh(W_hh):
        Ur, Uz, Un = gates(W_hh)                       # (H, H), PyTorch (out, in)
        fused = jnp.concatenate([pad_cols(U.T) for U in (Ur, Uz, Un)], axis=1)
        return jnp.pad(fused, ((0, Hp - H), (0, 0)))   # (Hp, 3*Hp)

    return dict(
        wih_all=wih_all, bi_all=bi_all,
        whh_f=fuse_hh(W_hh_f), whh_b=fuse_hh(W_hh_b),
        bhn_f=pad_vec(bhf_n)[None, :], bhn_b=pad_vec(bhb_n)[None, :],
        wd_f=pad_vec(W_d[0, :H])[None, :], wd_b=pad_vec(W_d[0, H:])[None, :],
        bd=b_d.reshape(1, 1),
    )


def bigru_reference(x, W_ih_f, W_hh_f, b_ih_f, b_hh_f,
                    W_ih_b, W_hh_b, b_ih_b, b_hh_b, W_d, b_d):
    """Pure-JAX reference on PyTorch-layout params (independent code path)."""
    H = W_hh_f.shape[1]
    B = x.shape[0]

    def cell(h, x_t, W_ih, W_hh, b_ih, b_hh):
        gi = x_t @ W_ih.T + b_ih
        gh = h @ W_hh.T + b_hh
        r = jax.nn.sigmoid(gi[:, :H] + gh[:, :H])
        z = jax.nn.sigmoid(gi[:, H:2 * H] + gh[:, H:2 * H])
        n = jnp.tanh(gi[:, 2 * H:] + r * gh[:, 2 * H:])
        return (1.0 - z) * n + z * h

    xs = jnp.transpose(x, (1, 0, 2))                              # (T, B, D)
    h0 = jnp.zeros((B, H), jnp.float32)
    _, hf = lax.scan(
        lambda h, xt: (cell(h, xt, W_ih_f, W_hh_f, b_ih_f, b_hh_f),) * 2, h0, xs)
    _, hb_rev = lax.scan(
        lambda h, xt: (cell(h, xt, W_ih_b, W_hh_b, b_ih_b, b_hh_b),) * 2, h0, xs[::-1])
    hb = hb_rev[::-1]
    gru_out = jnp.concatenate([hf, hb], axis=-1)                  # (T, B, 2H)
    pi = jax.nn.sigmoid(gru_out @ W_d.T + b_d)                    # (T, B, 1)
    return jnp.transpose(pi, (1, 0, 2))                           # (B, T, 1)


if __name__ == "__main__":
    B, T, D, H = 2, 8, 16, 32

    key = jax.random.PRNGKey(0)
    ks = jax.random.split(key, 12)

    def u(k, shape, scale):
        return jax.random.uniform(k, shape, jnp.float32, -scale, scale)

    # PyTorch-shaped parameters (deterministic synthetic init).
    s_gru = 1.0 / np.sqrt(H)
    W_ih_f = u(ks[0], (3 * H, D), s_gru); W_hh_f = u(ks[1], (3 * H, H), s_gru)
    b_ih_f = u(ks[2], (3 * H,), s_gru);   b_hh_f = u(ks[3], (3 * H,), s_gru)
    W_ih_b = u(ks[4], (3 * H, D), s_gru); W_hh_b = u(ks[5], (3 * H, H), s_gru)
    b_ih_b = u(ks[6], (3 * H,), s_gru);   b_hh_b = u(ks[7], (3 * H,), s_gru)
    s_lin = 1.0 / np.sqrt(2 * H)
    W_d = u(ks[8], (1, 2 * H), s_lin)     # nn.Linear(2H, 1).weight
    b_d = u(ks[9], (1,), s_lin)           # nn.Linear(2H, 1).bias

    x = jax.random.normal(ks[10], (B, T, D), jnp.float32)

    params = prepare_params(W_ih_f, W_hh_f, b_ih_f, b_hh_f,
                            W_ih_b, W_hh_b, b_ih_b, b_hh_b, W_d, b_d, H)

    pi = jax.block_until_ready(bigru_forward(x, params))
    assert pi.shape == (B, T, 1)

    pi_ref = bigru_reference(x, W_ih_f, W_hh_f, b_ih_f, b_hh_f,
                             W_ih_b, W_hh_b, b_ih_b, b_hh_b, W_d, b_d)
    np.testing.assert_allclose(np.asarray(pi), np.asarray(pi_ref),
                               atol=1e-3, rtol=1e-3)

    print("KERNEL_OK")
</pallas_src>

<mosaic_0001>
module attributes {stable_mosaic.version = 11 : i64} {
  func.func @kernel(%arg0: memref<64x16xf32, #tpu.memory_space<vmem>>, %arg1: memref<16x768xf32, #tpu.memory_space<vmem>>, %arg2: memref<1x768xf32, #tpu.memory_space<vmem>>, %arg3: memref<128x384xf32, #tpu.memory_space<vmem>>, %arg4: memref<128x384xf32, #tpu.memory_space<vmem>>, %arg5: memref<1x128xf32, #tpu.memory_space<vmem>>, %arg6: memref<1x128xf32, #tpu.memory_space<vmem>>, %arg7: memref<1x128xf32, #tpu.memory_space<vmem>>, %arg8: memref<1x128xf32, #tpu.memory_space<vmem>>, %arg9: memref<1x1xf32, #tpu.memory_space<vmem>>, %arg10: memref<8x8xf32, #tpu.memory_space<vmem>>) attributes {dimension_semantics = [], scalar_prefetch = 0 : i64, scratch_operands = 0 : i64, tpu.core_type = #tpu.core_type<tc>} {
    %c0 = arith.constant 0 : index
    %c0_0 = arith.constant 0 : index
    %0 = vector.load %arg0[%c0, %c0_0] : memref<64x16xf32, #tpu.memory_space<vmem>>, vector<64x16xf32>
    %c0_1 = arith.constant 0 : index
    %c0_2 = arith.constant 0 : index
    %1 = vector.load %arg1[%c0_1, %c0_2] : memref<16x768xf32, #tpu.memory_space<vmem>>, vector<16x768xf32>
    %cst = arith.constant dense<0.000000e+00> : vector<64x768xf32>
    %2 = tpu.matmul %0, %1, %cst {dimension_numbers = #tpu.dot_dimension_numbers<[1], [0], [0], [1], [0, 0, 1, 1], [], []>} : vector<64x16xf32>, vector<16x768xf32>, vector<64x768xf32> -> vector<64x768xf32>
    %c0_3 = arith.constant 0 : index
    %c0_4 = arith.constant 0 : index
    %3 = vector.load %arg2[%c0_3, %c0_4] : memref<1x768xf32, #tpu.memory_space<vmem>>, vector<1x768xf32>
    %4 = vector.broadcast %3 : vector<1x768xf32> to vector<64x768xf32>
    %5 = arith.addf %2, %4 : vector<64x768xf32>
    %c0_5 = arith.constant 0 : index
    %c0_6 = arith.constant 0 : index
    %6 = vector.load %arg3[%c0_5, %c0_6] : memref<128x384xf32, #tpu.memory_space<vmem>>, vector<128x384xf32>
    %c0_7 = arith.constant 0 : index
    %c0_8 = arith.constant 0 : index
    %7 = vector.load %arg4[%c0_7, %c0_8] : memref<128x384xf32, #tpu.memory_space<vmem>>, vector<128x384xf32>
    %c0_9 = arith.constant 0 : index
    %c0_10 = arith.constant 0 : index
    %8 = vector.load %arg5[%c0_9, %c0_10] : memref<1x128xf32, #tpu.memory_space<vmem>>, vector<1x128xf32>
    %9 = vector.shape_cast %8 : vector<1x128xf32> to vector<1x128xf32>
    %10 = vector.broadcast %9 : vector<1x128xf32> to vector<8x128xf32>
    %c0_11 = arith.constant 0 : index
    %c0_12 = arith.constant 0 : index
    %11 = vector.load %arg6[%c0_11, %c0_12] : memref<1x128xf32, #tpu.memory_space<vmem>>, vector<1x128xf32>
    %12 = vector.shape_cast %11 : vector<1x128xf32> to vector<1x128xf32>
    %13 = vector.broadcast %12 : vector<1x128xf32> to vector<8x128xf32>
    %c0_13 = arith.constant 0 : index
    %c0_14 = arith.constant 0 : index
    %14 = vector.load %arg7[%c0_13, %c0_14] : memref<1x128xf32, #tpu.memory_space<vmem>>, vector<1x128xf32>
    %15 = vector.shape_cast %14 : vector<1x128xf32> to vector<1x128xf32>
    %16 = vector.broadcast %15 : vector<1x128xf32> to vector<8x128xf32>
    %c0_15 = arith.constant 0 : index
    %c0_16 = arith.constant 0 : index
    %17 = vector.load %arg8[%c0_15, %c0_16] : memref<1x128xf32, #tpu.memory_space<vmem>>, vector<1x128xf32>
    %18 = vector.shape_cast %17 : vector<1x128xf32> to vector<1x128xf32>
    %19 = vector.broadcast %18 : vector<1x128xf32> to vector<8x128xf32>
    %20 = tpu.iota {dimensions = array<i32: 1>} : vector<8x8xi32>
    %cst_17 = arith.constant 0.000000e+00 : f32
    %21 = vector.broadcast %cst_17 : f32 to vector<8x128xf32>
    %cst_18 = arith.constant 0.000000e+00 : f32
    %22 = vector.broadcast %cst_18 : f32 to vector<8x128xf32>
    %cst_19 = arith.constant 0.000000e+00 : f32
    %23 = vector.broadcast %cst_19 : f32 to vector<8x8xf32>
    %24 = vector.extract_strided_slice %5 {offsets = [0, 0], sizes = [8, 128], strides = [1, 1]} : vector<64x768xf32> to vector<8x128xf32>
    %25 = vector.extract_strided_slice %5 {offsets = [0, 128], sizes = [8, 128], strides = [1, 1]} : vector<64x768xf32> to vector<8x128xf32>
    %26 = vector.extract_strided_slice %5 {offsets = [0, 256], sizes = [8, 128], strides = [1, 1]} : vector<64x768xf32> to vector<8x128xf32>
    %cst_20 = arith.constant dense<0.000000e+00> : vector<8x384xf32>
    %27 = tpu.matmul %21, %6, %cst_20 {dimension_numbers = #tpu.dot_dimension_numbers<[1], [0], [0], [1], [0, 0, 1, 1], [], []>} : vector<8x128xf32>, vector<128x384xf32>, vector<8x384xf32> -> vector<8x384xf32>
    %28 = vector.extract_strided_slice %27 {offsets = [0, 0], sizes = [8, 128], strides = [1, 1]} : vector<8x384xf32> to vector<8x128xf32>
    %29 = arith.addf %24, %28 : vector<8x128xf32>
    %cst_21 = arith.constant 5.000000e-01 : f32
    %30 = vector.broadcast %cst_21 : f32 to vector<8x128xf32>
    %31 = arith.mulf %30, %29 : vector<8x128xf32>
    %32 = math.tanh %31 : vector<8x128xf32>
    %cst_22 = arith.constant 5.000000e-01 : f32
    %33 = vector.broadcast %cst_22 : f32 to vector<8x128xf32>
    %34 = arith.mulf %33, %32 : vector<8x128xf32>
    %cst_23 = arith.constant 5.000000e-01 : f32
    %35 = vector.broadcast %cst_23 : f32 to vector<8x128xf32>
    %36 = arith.addf %34, %35 : vector<8x128xf32>
    %37 = vector.extract_strided_slice %27 {offsets = [0, 128], sizes = [8, 128], strides = [1, 1]} : vector<8x384xf32> to vector<8x128xf32>
    %38 = arith.addf %25, %37 : vector<8x128xf32>
    %cst_24 = arith.constant 5.000000e-01 : f32
    %39 = vector.broadcast %cst_24 : f32 to vector<8x128xf32>
    %40 = arith.mulf %39, %38 : vector<8x128xf32>
    %41 = math.tanh %40 : vector<8x128xf32>
    %cst_25 = arith.constant 5.000000e-01 : f32
    %42 = vector.broadcast %cst_25 : f32 to vector<8x128xf32>
    %43 = arith.mulf %42, %41 : vector<8x128xf32>
    %cst_26 = arith.constant 5.000000e-01 : f32
    %44 = vector.broadcast %cst_26 : f32 to vector<8x128xf32>
    %45 = arith.addf %43, %44 : vector<8x128xf32>
    %46 = vector.extract_strided_slice %27 {offsets = [0, 256], sizes = [8, 128], strides = [1, 1]} : vector<8x384xf32> to vector<8x128xf32>
    %47 = arith.addf %46, %10 : vector<8x128xf32>
    %48 = arith.mulf %36, %47 : vector<8x128xf32>
    %49 = arith.addf %26, %48 : vector<8x128xf32>
    %50 = math.tanh %49 : vector<8x128xf32>
    %cst_27 = arith.constant 1.000000e+00 : f32
    %51 = vector.broadcast %cst_27 : f32 to vector<8x128xf32>
    %52 = arith.subf %51, %45 : vector<8x128xf32>
    %53 = arith.mulf %52, %50 : vector<8x128xf32>
    %54 = arith.mulf %45, %21 : vector<8x128xf32>
    %55 = arith.addf %53, %54 : vector<8x128xf32>
    %56 = vector.extract_strided_slice %5 {offsets = [56, 384], sizes = [8, 128], strides = [1, 1]} : vector<64x768xf32> to vector<8x128xf32>
    %57 = vector.extract_strided_slice %5 {offsets = [56, 512], sizes = [8, 128], strides = [1, 1]} : vector<64x768xf32> to vector<8x128xf32>
    %58 = vector.extract_strided_slice %5 {offsets = [56, 640], sizes = [8, 128], strides = [1, 1]} : vector<64x768xf32> to vector<8x128xf32>
    %cst_28 = arith.constant dense<0.000000e+00> : vector<8x384xf32>
    %59 = tpu.matmul %22, %7, %cst_28 {dimension_numbers = #tpu.dot_dimension_numbers<[1], [0], [0], [1], [0, 0, 1, 1], [], []>} : vector<8x128xf32>, vector<128x384xf32>, vector<8x384xf32> -> vector<8x384xf32>
    %60 = vector.extract_strided_slice %59 {offsets = [0, 0], sizes = [8, 128], strides = [1, 1]} : vector<8x384xf32> to vector<8x128xf32>
    %61 = arith.addf %56, %60 : vector<8x128xf32>
    %cst_29 = arith.constant 5.000000e-01 : f32
    %62 = vector.broadcast %cst_29 : f32 to vector<8x128xf32>
    %63 = arith.mulf %62, %61 : vector<8x128xf32>
    %64 = math.tanh %63 : vector<8x128xf32>
    %cst_30 = arith.constant 5.000000e-01 : f32
    %65 = vector.broadcast %cst_30 : f32 to vector<8x128xf32>
    %66 = arith.mulf %65, %64 : vector<8x128xf32>
    %cst_31 = arith.constant 5.000000e-01 : f32
    %67 = vector.broadcast %cst_31 : f32 to vector<8x128xf32>
    %68 = arith.addf %66, %67 : vector<8x128xf32>
    %69 = vector.extract_strided_slice %59 {offsets = [0, 128], sizes = [8, 128], strides = [1, 1]} : vector<8x384xf32> to vector<8x128xf32>
    %70 = arith.addf %57, %69 : vector<8x128xf32>
    %cst_32 = arith.constant 5.000000e-01 : f32
    %71 = vector.broadcast %cst_32 : f32 to vector<8x128xf32>
    %72 = arith.mulf %71, %70 : vector<8x128xf32>
    %73 = math.tanh %72 : vector<8x128xf32>
    %cst_33 = arith.constant 5.000000e-01 : f32
    %74 = vector.broadcast %cst_33 : f32 to vector<8x128xf32>
    %75 = arith.mulf %74, %73 : vector<8x128xf32>
    %cst_34 = arith.constant 5.000000e-01 : f32
    %76 = vector.broadcast %cst_34 : f32 to vector<8x128xf32>
    %77 = arith.addf %75, %76 : vector<8x128xf32>
    %78 = vector.extract_strided_slice %59 {offsets = [0, 256], sizes = [8, 128], strides = [1, 1]} : vector<8x384xf32> to vector<8x128xf32>
    %79 = arith.addf %78, %13 : vector<8x128xf32>
    %80 = arith.mulf %68, %79 : vector<8x128xf32>
    %81 = arith.addf %58, %80 : vector<8x128xf32>
    %82 = math.tanh %81 : vector<8x128xf32>
    %cst_35 = arith.constant 1.000000e+00 : f32
    %83 = vector.broadcast %cst_35 : f32 to vector<8x128xf32>
    %84 = arith.subf %83, %77 : vector<8x128xf32>
    %85 = arith.mulf %84, %82 : vector<8x128xf32>
    %86 = arith.mulf %77, %22 : vector<8x128xf32>
    %87 = arith.addf %85, %86 : vector<8x128xf32>
    %88 = arith.mulf %55, %16 : vector<8x128xf32>
    %cst_36 = arith.constant dense<0.000000e+00> : vector<8xf32>
    %89 = vector.multi_reduction <add>, %88, %cst_36 [1] : vector<8x128xf32> to vector<8xf32>
    %90 = vector.shape_cast %89 : vector<8xf32> to vector<8x1xf32>
    %91 = arith.mulf %87, %19 : vector<8x128xf32>
    %cst_37 = arith.constant dense<0.000000e+00> : vector<8xf32>
    %92 = vector.multi_reduction <add>, %91, %cst_37 [1] : vector<8x128xf32> to vector<8xf32>
    %93 = vector.shape_cast %92 : vector<8xf32> to vector<8x1xf32>
    %c0_i32 = arith.constant 0 : i32
    %94 = vector.broadcast %c0_i32 : i32 to vector<8x8xi32>
    %95 = arith.cmpi eq, %20, %94 : vector<8x8xi32>
    %cst_38 = arith.constant 0.000000e+00 : f32
    %96 = vector.shape_cast %90 : vector<8x1xf32> to vector<8x1xf32>
    %97 = vector.broadcast %96 : vector<8x1xf32> to vector<8x8xf32>
    %98 = vector.broadcast %cst_38 : f32 to vector<8x8xf32>
    %99 = arith.select %95, %97, %98 : vector<8x8xi1>, vector<8x8xf32>
    %100 = arith.addf %23, %99 : vector<8x8xf32>
    %c7_i32 = arith.constant 7 : i32
    %101 = vector.broadcast %c7_i32 : i32 to vector<8x8xi32>
    %102 = arith.cmpi eq, %20, %101 : vector<8x8xi32>
    %cst_39 = arith.constant 0.000000e+00 : f32
    %103 = vector.shape_cast %93 : vector<8x1xf32> to vector<8x1xf32>
    %104 = vector.broadcast %103 : vector<8x1xf32> to vector<8x8xf32>
    %105 = vector.broadcast %cst_39 : f32 to vector<8x8xf32>
    %106 = arith.select %102, %104, %105 : vector<8x8xi1>, vector<8x8xf32>
    %107 = arith.addf %100, %106 : vector<8x8xf32>
    %108 = vector.extract_strided_slice %5 {offsets = [8, 0], sizes = [8, 128], strides = [1, 1]} : vector<64x768xf32> to vector<8x128xf32>
    %109 = vector.extract_strided_slice %5 {offsets = [8, 128], sizes = [8, 128], strides = [1, 1]} : vector<64x768xf32> to vector<8x128xf32>
    %110 = vector.extract_strided_slice %5 {offsets = [8, 256], sizes = [8, 128], strides = [1, 1]} : vector<64x768xf32> to vector<8x128xf32>
    %cst_40 = arith.constant dense<0.000000e+00> : vector<8x384xf32>
    %111 = tpu.matmul %55, %6, %cst_40 {dimension_numbers = #tpu.dot_dimension_numbers<[1], [0], [0], [1], [0, 0, 1, 1], [], []>} : vector<8x128xf32>, vector<128x384xf32>, vector<8x384xf32> -> vector<8x384xf32>
    %112 = vector.extract_strided_slice %111 {offsets = [0, 0], sizes = [8, 128], strides = [1, 1]} : vector<8x384xf32> to vector<8x128xf32>
    %113 = arith.addf %108, %112 : vector<8x128xf32>
    %cst_41 = arith.constant 5.000000e-01 : f32
    %114 = vector.broadcast %cst_41 : f32 to vector<8x128xf32>
    %115 = arith.mulf %114, %113 : vector<8x128xf32>
    %116 = math.tanh %115 : vector<8x128xf32>
    %cst_42 = arith.constant 5.000000e-01 : f32
    %117 = vector.broadcast %cst_42 : f32 to vector<8x128xf32>
    %118 = arith.mulf %117, %116 : vector<8x128xf32>
    %cst_43 = arith.constant 5.000000e-01 : f32
    %119 = vector.broadcast %cst_43 : f32 to vector<8x128xf32>
    %120 = arith.addf %118, %119 : vector<8x128xf32>
    %121 = vector.extract_strided_slice %111 {offsets = [0, 128], sizes = [8, 128], strides = [1, 1]} : vector<8x384xf32> to vector<8x128xf32>
    %122 = arith.addf %109, %121 : vector<8x128xf32>
    %cst_44 = arith.constant 5.000000e-01 : f32
    %123 = vector.broadcast %cst_44 : f32 to vector<8x128xf32>
    %124 = arith.mulf %123, %122 : vector<8x128xf32>
    %125 = math.tanh %124 : vector<8x128xf32>
    %cst_45 = arith.constant 5.000000e-01 : f32
    %126 = vector.broadcast %cst_45 : f32 to vector<8x128xf32>
    %127 = arith.mulf %126, %125 : vector<8x128xf32>
    %cst_46 = arith.constant 5.000000e-01 : f32
    %128 = vector.broadcast %cst_46 : f32 to vector<8x128xf32>
    %129 = arith.addf %127, %128 : vector<8x128xf32>
    %130 = vector.extract_strided_slice %111 {offsets = [0, 256], sizes = [8, 128], strides = [1, 1]} : vector<8x384xf32> to vector<8x128xf32>
    %131 = arith.addf %130, %10 : vector<8x128xf32>
    %132 = arith.mulf %120, %131 : vector<8x128xf32>
    %133 = arith.addf %110, %132 : vector<8x128xf32>
    %134 = math.tanh %133 : vector<8x128xf32>
    %cst_47 = arith.constant 1.000000e+00 : f32
    %135 = vector.broadcast %cst_47 : f32 to vector<8x128xf32>
    %136 = arith.subf %135, %129 : vector<8x128xf32>
    %137 = arith.mulf %136, %134 : vector<8x128xf32>
    %138 = arith.mulf %129, %55 : vector<8x128xf32>
    %139 = arith.addf %137, %138 : vector<8x128xf32>
    %140 = vector.extract_strided_slice %5 {offsets = [48, 384], sizes = [8, 128], strides = [1, 1]} : vector<64x768xf32> to vector<8x128xf32>
    %141 = vector.extract_strided_slice %5 {offsets = [48, 512], sizes = [8, 128], strides = [1, 1]} : vector<64x768xf32> to vector<8x128xf32>
    %142 = vector.extract_strided_slice %5 {offsets = [48, 640], sizes = [8, 128], strides = [1, 1]} : vector<64x768xf32> to vector<8x128xf32>
    %cst_48 = arith.constant dense<0.000000e+00> : vector<8x384xf32>
    %143 = tpu.matmul %87, %7, %cst_48 {dimension_numbers = #tpu.dot_dimension_numbers<[1], [0], [0], [1], [0, 0, 1, 1], [], []>} : vector<8x128xf32>, vector<128x384xf32>, vector<8x384xf32> -> vector<8x384xf32>
    %144 = vector.extract_strided_slice %143 {offsets = [0, 0], sizes = [8, 128], strides = [1, 1]} : vector<8x384xf32> to vector<8x128xf32>
    %145 = arith.addf %140, %144 : vector<8x128xf32>
    %cst_49 = arith.constant 5.000000e-01 : f32
    %146 = vector.broadcast %cst_49 : f32 to vector<8x128xf32>
    %147 = arith.mulf %146, %145 : vector<8x128xf32>
    %148 = math.tanh %147 : vector<8x128xf32>
    %cst_50 = arith.constant 5.000000e-01 : f32
    %149 = vector.broadcast %cst_50 : f32 to vector<8x128xf32>
    %150 = arith.mulf %149, %148 : vector<8x128xf32>
    %cst_51 = arith.constant 5.000000e-01 : f32
    %151 = vector.broadcast %cst_51 : f32 to vector<8x128xf32>
    %152 = arith.addf %150, %151 : vector<8x128xf32>
    %153 = vector.extract_strided_slice %143 {offsets = [0, 128], sizes = [8, 128], strides = [1, 1]} : vector<8x384xf32> to vector<8x128xf32>
    %154 = arith.addf %141, %153 : vector<8x128xf32>
    %cst_52 = arith.constant 5.000000e-01 : f32
    %155 = vector.broadcast %cst_52 : f32 to vector<8x128xf32>
    %156 = arith.mulf %155, %154 : vector<8x128xf32>
    %157 = math.tanh %156 : vector<8x128xf32>
    %cst_53 = arith.constant 5.000000e-01 : f32
    %158 = vector.broadcast %cst_53 : f32 to vector<8x128xf32>
    %159 = arith.mulf %158, %157 : vector<8x128xf32>
    %cst_54 = arith.constant 5.000000e-01 : f32
    %160 = vector.broadcast %cst_54 : f32 to vector<8x128xf32>
    %161 = arith.addf %159, %160 : vector<8x128xf32>
    %162 = vector.extract_strided_slice %143 {offsets = [0, 256], sizes = [8, 128], strides = [1, 1]} : vector<8x384xf32> to vector<8x128xf32>
    %163 = arith.addf %162, %13 : vector<8x128xf32>
    %164 = arith.mulf %152, %163 : vector<8x128xf32>
    %165 = arith.addf %142, %164 : vector<8x128xf32>
    %166 = math.tanh %165 : vector<8x128xf32>
    %cst_55 = arith.constant 1.000000e+00 : f32
    %167 = vector.broadcast %cst_55 : f32 to vector<8x128xf32>
    %168 = arith.subf %167, %161 : vector<8x128xf32>
    %169 = arith.mulf %168, %166 : vector<8x128xf32>
    %170 = arith.mulf %161, %87 : vector<8x128xf32>
    %171 = arith.addf %169, %170 : vector<8x128xf32>
    %172 = arith.mulf %139, %16 : vector<8x128xf32>
    %cst_56 = arith.constant dense<0.000000e+00> : vector<8xf32>
    %173 = vector.multi_reduction <add>, %172, %cst_56 [1] : vector<8x128xf32> to vector<8xf32>
    %174 = vector.shape_cast %173 : vector<8xf32> to vector<8x1xf32>
    %175 = arith.mulf %171, %19 : vector<8x128xf32>
    %cst_57 = arith.constant dense<0.000000e+00> : vector<8xf32>
    %176 = vector.multi_reduction <add>, %175, %cst_57 [1] : vector<8x128xf32> to vector<8xf32>
    %177 = vector.shape_cast %176 : vector<8xf32> to vector<8x1xf32>
    %c1_i32 = arith.constant 1 : i32
    %178 = vector.broadcast %c1_i32 : i32 to vector<8x8xi32>
    %179 = arith.cmpi eq, %20, %178 : vector<8x8xi32>
    %cst_58 = arith.constant 0.000000e+00 : f32
    %180 = vector.shape_cast %174 : vector<8x1xf32> to vector<8x1xf32>
    %181 = vector.broadcast %180 : vector<8x1xf32> to vector<8x8xf32>
    %182 = vector.broadcast %cst_58 : f32 to vector<8x8xf32>
    %183 = arith.select %179, %181, %182 : vector<8x8xi1>, vector<8x8xf32>
    %184 = arith.addf %107, %183 : vector<8x8xf32>
    %c6_i32 = arith.constant 6 : i32
    %185 = vector.broadcast %c6_i32 : i32 to vector<8x8xi32>
    %186 = arith.cmpi eq, %20, %185 : vector<8x8xi32>
    %cst_59 = arith.constant 0.000000e+00 : f32
    %187 = vector.shape_cast %177 : vector<8x1xf32> to vector<8x1xf32>
    %188 = vector.broadcast %187 : vector<8x1xf32> to vector<8x8xf32>
    %189 = vector.broadcast %cst_59 : f32 to vector<8x8xf32>
    %190 = arith.select %186, %188, %189 : vector<8x8xi1>, vector<8x8xf32>
    %191 = arith.addf %184, %190 : vector<8x8xf32>
    %192 = vector.extract_strided_slice %5 {offsets = [16, 0], sizes = [8, 128], strides = [1, 1]} : vector<64x768xf32> to vector<8x128xf32>
    %193 = vector.extract_strided_slice %5 {offsets = [16, 128], sizes = [8, 128], strides = [1, 1]} : vector<64x768xf32> to vector<8x128xf32>
    %194 = vector.extract_strided_slice %5 {offsets = [16, 256], sizes = [8, 128], strides = [1, 1]} : vector<64x768xf32> to vector<8x128xf32>
    %cst_60 = arith.constant dense<0.000000e+00> : vector<8x384xf32>
    %195 = tpu.matmul %139, %6, %cst_60 {dimension_numbers = #tpu.dot_dimension_numbers<[1], [0], [0], [1], [0, 0, 1, 1], [], []>} : vector<8x128xf32>, vector<128x384xf32>, vector<8x384xf32> -> vector<8x384xf32>
    %196 = vector.extract_strided_slice %195 {offsets = [0, 0], sizes = [8, 128], strides = [1, 1]} : vector<8x384xf32> to vector<8x128xf32>
    %197 = arith.addf %192, %196 : vector<8x128xf32>
    %cst_61 = arith.constant 5.000000e-01 : f32
    %198 = vector.broadcast %cst_61 : f32 to vector<8x128xf32>
    %199 = arith.mulf %198, %197 : vector<8x128xf32>
    %200 = math.tanh %199 : vector<8x128xf32>
    %cst_62 = arith.constant 5.000000e-01 : f32
    %201 = vector.broadcast %cst_62 : f32 to vector<8x128xf32>
    %202 = arith.mulf %201, %200 : vector<8x128xf32>
    %cst_63 = arith.constant 5.000000e-01 : f32
    %203 = vector.broadcast %cst_63 : f32 to vector<8x128xf32>
    %204 = arith.addf %202, %203 : vector<8x128xf32>
    %205 = vector.extract_strided_slice %195 {offsets = [0, 128], sizes = [8, 128], strides = [1, 1]} : vector<8x384xf32> to vector<8x128xf32>
    %206 = arith.addf %193, %205 : vector<8x128xf32>
    %cst_64 = arith.constant 5.000000e-01 : f32
    %207 = vector.broadcast %cst_64 : f32 to vector<8x128xf32>
    %208 = arith.mulf %207, %206 : vector<8x128xf32>
    %209 = math.tanh %208 : vector<8x128xf32>
    %cst_65 = arith.constant 5.000000e-01 : f32
    %210 = vector.broadcast %cst_65 : f32 to vector<8x128xf32>
    %211 = arith.mulf %210, %209 : vector<8x128xf32>
    %cst_66 = arith.constant 5.000000e-01 : f32
    %212 = vector.broadcast %cst_66 : f32 to vector<8x128xf32>
    %213 = arith.addf %211, %212 : vector<8x128xf32>
    %214 = vector.extract_strided_slice %195 {offsets = [0, 256], sizes = [8, 128], strides = [1, 1]} : vector<8x384xf32> to vector<8x128xf32>
    %215 = arith.addf %214, %10 : vector<8x128xf32>
    %216 = arith.mulf %204, %215 : vector<8x128xf32>
    %217 = arith.addf %194, %216 : vector<8x128xf32>
    %218 = math.tanh %217 : vector<8x128xf32>
    %cst_67 = arith.constant 1.000000e+00 : f32
    %219 = vector.broadcast %cst_67 : f32 to vector<8x128xf32>
    %220 = arith.subf %219, %213 : vector<8x128xf32>
    %221 = arith.mulf %220, %218 : vector<8x128xf32>
    %222 = arith.mulf %213, %139 : vector<8x128xf32>
    %223 = arith.addf %221, %222 : vector<8x128xf32>
    %224 = vector.extract_strided_slice %5 {offsets = [40, 384], sizes = [8, 128], strides = [1, 1]} : vector<64x768xf32> to vector<8x128xf32>
    %225 = vector.extract_strided_slice %5 {offsets = [40, 512], sizes = [8, 128], strides = [1, 1]} : vector<64x768xf32> to vector<8x128xf32>
    %226 = vector.extract_strided_slice %5 {offsets = [40, 640], sizes = [8, 128], strides = [1, 1]} : vector<64x768xf32> to vector<8x128xf32>
    %cst_68 = arith.constant dense<0.000000e+00> : vector<8x384xf32>
    %227 = tpu.matmul %171, %7, %cst_68 {dimension_numbers = #tpu.dot_dimension_numbers<[1], [0], [0], [1], [0, 0, 1, 1], [], []>} : vector<8x128xf32>, vector<128x384xf32>, vector<8x384xf32> -> vector<8x384xf32>
    %228 = vector.extract_strided_slice %227 {offsets = [0, 0], sizes = [8, 128], strides = [1, 1]} : vector<8x384xf32> to vector<8x128xf32>
    %229 = arith.addf %224, %228 : vector<8x128xf32>
    %cst_69 = arith.constant 5.000000e-01 : f32
    %230 = vector.broadcast %cst_69 : f32 to vector<8x128xf32>
    %231 = arith.mulf %230, %229 : vector<8x128xf32>
    %232 = math.tanh %231 : vector<8x128xf32>
    %cst_70 = arith.constant 5.000000e-01 : f32
    %233 = vector.broadcast %cst_70 : f32 to vector<8x128xf32>
    %234 = arith.mulf %233, %232 : vector<8x128xf32>
    %cst_71 = arith.constant 5.000000e-01 : f32
    %235 = vector.broadcast %cst_71 : f32 to vector<8x128xf32>
    %236 = arith.addf %234, %235 : vector<8x128xf32>
    %237 = vector.extract_strided_slice %227 {offsets = [0, 128], sizes = [8, 128], strides = [1, 1]} : vector<8x384xf32> to vector<8x128xf32>
    %238 = arith.addf %225, %237 : vector<8x128xf32>
    %cst_72 = arith.constant 5.000000e-01 : f32
    %239 = vector.broadcast %cst_72 : f32 to vector<8x128xf32>
    %240 = arith.mulf %239, %238 : vector<8x128xf32>
    %241 = math.tanh %240 : vector<8x128xf32>
    %cst_73 = arith.constant 5.000000e-01 : f32
    %242 = vector.broadcast %cst_73 : f32 to vector<8x128xf32>
    %243 = arith.mulf %242, %241 : vector<8x128xf32>
    %cst_74 = arith.constant 5.000000e-01 : f32
    %244 = vector.broadcast %cst_74 : f32 to vector<8x128xf32>
    %245 = arith.addf %243, %244 : vector<8x128xf32>
    %246 = vector.extract_strided_slice %227 {offsets = [0, 256], sizes = [8, 128], strides = [1, 1]} : vector<8x384xf32> to vector<8x128xf32>
    %247 = arith.addf %246, %13 : vector<8x128xf32>
    %248 = arith.mulf %236, %247 : vector<8x128xf32>
    %249 = arith.addf %226, %248 : vector<8x128xf32>
    %250 = math.tanh %249 : vector<8x128xf32>
    %cst_75 = arith.constant 1.000000e+00 : f32
    %251 = vector.broadcast %cst_75 : f32 to vector<8x128xf32>
    %252 = arith.subf %251, %245 : vector<8x128xf32>
    %253 = arith.mulf %252, %250 : vector<8x128xf32>
    %254 = arith.mulf %245, %171 : vector<8x128xf32>
    %255 = arith.addf %253, %254 : vector<8x128xf32>
    %256 = arith.mulf %223, %16 : vector<8x128xf32>
    %cst_76 = arith.constant dense<0.000000e+00> : vector<8xf32>
    %257 = vector.multi_reduction <add>, %256, %cst_76 [1] : vector<8x128xf32> to vector<8xf32>
    %258 = vector.shape_cast %257 : vector<8xf32> to vector<8x1xf32>
    %259 = arith.mulf %255, %19 : vector<8x128xf32>
    %cst_77 = arith.constant dense<0.000000e+00> : vector<8xf32>
    %260 = vector.multi_reduction <add>, %259, %cst_77 [1] : vector<8x128xf32> to vector<8xf32>
    %261 = vector.shape_cast %260 : vector<8xf32> to vector<8x1xf32>
    %c2_i32 = arith.constant 2 : i32
    %262 = vector.broadcast %c2_i32 : i32 to vector<8x8xi32>
    %263 = arith.cmpi eq, %20, %262 : vector<8x8xi32>
    %cst_78 = arith.constant 0.000000e+00 : f32
    %264 = vector.shape_cast %258 : vector<8x1xf32> to vector<8x1xf32>
    %265 = vector.broadcast %264 : vector<8x1xf32> to vector<8x8xf32>
    %266 = vector.broadcast %cst_78 : f32 to vector<8x8xf32>
    %267 = arith.select %263, %265, %266 : vector<8x8xi1>, vector<8x8xf32>
    %268 = arith.addf %191, %267 : vector<8x8xf32>
    %c5_i32 = arith.constant 5 : i32
    %269 = vector.broadcast %c5_i32 : i32 to vector<8x8xi32>
    %270 = arith.cmpi eq, %20, %269 : vector<8x8xi32>
    %cst_79 = arith.constant 0.000000e+00 : f32
    %271 = vector.shape_cast %261 : vector<8x1xf32> to vector<8x1xf32>
    %272 = vector.broadcast %271 : vector<8x1xf32> to vector<8x8xf32>
    %273 = vector.broadcast %cst_79 : f32 to vector<8x8xf32>
    %274 = arith.select %270, %272, %273 : vector<8x8xi1>, vector<8x8xf32>
    %275 = arith.addf %268, %274 : vector<8x8xf32>
    %276 = vector.extract_strided_slice %5 {offsets = [24, 0], sizes = [8, 128], strides = [1, 1]} : vector<64x768xf32> to vector<8x128xf32>
    %277 = vector.extract_strided_slice %5 {offsets = [24, 128], sizes = [8, 128], strides = [1, 1]} : vector<64x768xf32> to vector<8x128xf32>
    %278 = vector.extract_strided_slice %5 {offsets = [24, 256], sizes = [8, 128], strides = [1, 1]} : vector<64x768xf32> to vector<8x128xf32>
    %cst_80 = arith.constant dense<0.000000e+00> : vector<8x384xf32>
    %279 = tpu.matmul %223, %6, %cst_80 {dimension_numbers = #tpu.dot_dimension_numbers<[1], [0], [0], [1], [0, 0, 1, 1], [], []>} : vector<8x128xf32>, vector<128x384xf32>, vector<8x384xf32> -> vector<8x384xf32>
    %280 = vector.extract_strided_slice %279 {offsets = [0, 0], sizes = [8, 128], strides = [1, 1]} : vector<8x384xf32> to vector<8x128xf32>
    %281 = arith.addf %276, %280 : vector<8x128xf32>
    %cst_81 = arith.constant 5.000000e-01 : f32
    %282 = vector.broadcast %cst_81 : f32 to vector<8x128xf32>
    %283 = arith.mulf %282, %281 : vector<8x128xf32>
    %284 = math.tanh %283 : vector<8x128xf32>
    %cst_82 = arith.constant 5.000000e-01 : f32
    %285 = vector.broadcast %cst_82 : f32 to vector<8x128xf32>
    %286 = arith.mulf %285, %284 : vector<8x128xf32>
    %cst_83 = arith.constant 5.000000e-01 : f32
    %287 = vector.broadcast %cst_83 : f32 to vector<8x128xf32>
    %288 = arith.addf %286, %287 : vector<8x128xf32>
    %289 = vector.extract_strided_slice %279 {offsets = [0, 128], sizes = [8, 128], strides = [1, 1]} : vector<8x384xf32> to vector<8x128xf32>
    %290 = arith.addf %277, %289 : vector<8x128xf32>
    %cst_84 = arith.constant 5.000000e-01 : f32
    %291 = vector.broadcast %cst_84 : f32 to vector<8x128xf32>
    %292 = arith.mulf %291, %290 : vector<8x128xf32>
    %293 = math.tanh %292 : vector<8x128xf32>
    %cst_85 = arith.constant 5.000000e-01 : f32
    %294 = vector.broadcast %cst_85 : f32 to vector<8x128xf32>
    %295 = arith.mulf %294, %293 : vector<8x128xf32>
    %cst_86 = arith.constant 5.000000e-01 : f32
    %296 = vector.broadcast %cst_86 : f32 to vector<8x128xf32>
    %297 = arith.addf %295, %296 : vector<8x128xf32>
    %298 = vector.extract_strided_slice %279 {offsets = [0, 256], sizes = [8, 128], strides = [1, 1]} : vector<8x384xf32> to vector<8x128xf32>
    %299 = arith.addf %298, %10 : vector<8x128xf32>
    %300 = arith.mulf %288, %299 : vector<8x128xf32>
    %301 = arith.addf %278, %300 : vector<8x128xf32>
    %302 = math.tanh %301 : vector<8x128xf32>
    %cst_87 = arith.constant 1.000000e+00 : f32
    %303 = vector.broadcast %cst_87 : f32 to vector<8x128xf32>
    %304 = arith.subf %303, %297 : vector<8x128xf32>
    %305 = arith.mulf %304, %302 : vector<8x128xf32>
    %306 = arith.mulf %297, %223 : vector<8x128xf32>
    %307 = arith.addf %305, %306 : vector<8x128xf32>
    %308 = vector.extract_strided_slice %5 {offsets = [32, 384], sizes = [8, 128], strides = [1, 1]} : vector<64x768xf32> to vector<8x128xf32>
    %309 = vector.extract_strided_slice %5 {offsets = [32, 512], sizes = [8, 128], strides = [1, 1]} : vector<64x768xf32> to vector<8x128xf32>
    %310 = vector.extract_strided_slice %5 {offsets = [32, 640], sizes = [8, 128], strides = [1, 1]} : vector<64x768xf32> to vector<8x128xf32>
    %cst_88 = arith.constant dense<0.000000e+00> : vector<8x384xf32>
    %311 = tpu.matmul %255, %7, %cst_88 {dimension_numbers = #tpu.dot_dimension_numbers<[1], [0], [0], [1], [0, 0, 1, 1], [], []>} : vector<8x128xf32>, vector<128x384xf32>, vector<8x384xf32> -> vector<8x384xf32>
    %312 = vector.extract_strided_slice %311 {offsets = [0, 0], sizes = [8, 128], strides = [1, 1]} : vector<8x384xf32> to vector<8x128xf32>
    %313 = arith.addf %308, %312 : vector<8x128xf32>
    %cst_89 = arith.constant 5.000000e-01 : f32
    %314 = vector.broadcast %cst_89 : f32 to vector<8x128xf32>
    %315 = arith.mulf %314, %313 : vector<8x128xf32>
    %316 = math.tanh %315 : vector<8x128xf32>
    %cst_90 = arith.constant 5.000000e-01 : f32
    %317 = vector.broadcast %cst_90 : f32 to vector<8x128xf32>
    %318 = arith.mulf %317, %316 : vector<8x128xf32>
    %cst_91 = arith.constant 5.000000e-01 : f32
    %319 = vector.broadcast %cst_91 : f32 to vector<8x128xf32>
    %320 = arith.addf %318, %319 : vector<8x128xf32>
    %321 = vector.extract_strided_slice %311 {offsets = [0, 128], sizes = [8, 128], strides = [1, 1]} : vector<8x384xf32> to vector<8x128xf32>
    %322 = arith.addf %309, %321 : vector<8x128xf32>
    %cst_92 = arith.constant 5.000000e-01 : f32
    %323 = vector.broadcast %cst_92 : f32 to vector<8x128xf32>
    %324 = arith.mulf %323, %322 : vector<8x128xf32>
    %325 = math.tanh %324 : vector<8x128xf32>
    %cst_93 = arith.constant 5.000000e-01 : f32
    %326 = vector.broadcast %cst_93 : f32 to vector<8x128xf32>
    %327 = arith.mulf %326, %325 : vector<8x128xf32>
    %cst_94 = arith.constant 5.000000e-01 : f32
    %328 = vector.broadcast %cst_94 : f32 to vector<8x128xf32>
    %329 = arith.addf %327, %328 : vector<8x128xf32>
    %330 = vector.extract_strided_slice %311 {offsets = [0, 256], sizes = [8, 128], strides = [1, 1]} : vector<8x384xf32> to vector<8x128xf32>
    %331 = arith.addf %330, %13 : vector<8x128xf32>
    %332 = arith.mulf %320, %331 : vector<8x128xf32>
    %333 = arith.addf %310, %332 : vector<8x128xf32>
    %334 = math.tanh %333 : vector<8x128xf32>
    %cst_95 = arith.constant 1.000000e+00 : f32
    %335 = vector.broadcast %cst_95 : f32 to vector<8x128xf32>
    %336 = arith.subf %335, %329 : vector<8x128xf32>
    %337 = arith.mulf %336, %334 : vector<8x128xf32>
    %338 = arith.mulf %329, %255 : vector<8x128xf32>
    %339 = arith.addf %337, %338 : vector<8x128xf32>
    %340 = arith.mulf %307, %16 : vector<8x128xf32>
    %cst_96 = arith.constant dense<0.000000e+00> : vector<8xf32>
    %341 = vector.multi_reduction <add>, %340, %cst_96 [1] : vector<8x128xf32> to vector<8xf32>
    %342 = vector.shape_cast %341 : vector<8xf32> to vector<8x1xf32>
    %343 = arith.mulf %339, %19 : vector<8x128xf32>
    %cst_97 = arith.constant dense<0.000000e+00> : vector<8xf32>
    %344 = vector.multi_reduction <add>, %343, %cst_97 [1] : vector<8x128xf32> to vector<8xf32>
    %345 = vector.shape_cast %344 : vector<8xf32> to vector<8x1xf32>
    %c3_i32 = arith.constant 3 : i32
    %346 = vector.broadcast %c3_i32 : i32 to vector<8x8xi32>
    %347 = arith.cmpi eq, %20, %346 : vector<8x8xi32>
    %cst_98 = arith.constant 0.000000e+00 : f32
    %348 = vector.shape_cast %342 : vector<8x1xf32> to vector<8x1xf32>
    %349 = vector.broadcast %348 : vector<8x1xf32> to vector<8x8xf32>
    %350 = vector.broadcast %cst_98 : f32 to vector<8x8xf32>
    %351 = arith.select %347, %349, %350 : vector<8x8xi1>, vector<8x8xf32>
    %352 = arith.addf %275, %351 : vector<8x8xf32>
    %c4_i32 = arith.constant 4 : i32
    %353 = vector.broadcast %c4_i32 : i32 to vector<8x8xi32>
    %354 = arith.cmpi eq, %20, %353 : vector<8x8xi32>
    %cst_99 = arith.constant 0.000000e+00 : f32
    %355 = vector.shape_cast %345 : vector<8x1xf32> to vector<8x1xf32>
    %356 = vector.broadcast %355 : vector<8x1xf32> to vector<8x8xf32>
    %357 = vector.broadcast %cst_99 : f32 to vector<8x8xf32>
    %358 = arith.select %354, %356, %357 : vector<8x8xi1>, vector<8x8xf32>
    %359 = arith.addf %352, %358 : vector<8x8xf32>
    %360 = vector.extract_strided_slice %5 {offsets = [32, 0], sizes = [8, 128], strides = [1, 1]} : vector<64x768xf32> to vector<8x128xf32>
    %361 = vector.extract_strided_slice %5 {offsets = [32, 128], sizes = [8, 128], strides = [1, 1]} : vector<64x768xf32> to vector<8x128xf32>
    %362 = vector.extract_strided_slice %5 {offsets = [32, 256], sizes = [8, 128], strides = [1, 1]} : vector<64x768xf32> to vector<8x128xf32>
    %cst_100 = arith.constant dense<0.000000e+00> : vector<8x384xf32>
    %363 = tpu.matmul %307, %6, %cst_100 {dimension_numbers = #tpu.dot_dimension_numbers<[1], [0], [0], [1], [0, 0, 1, 1], [], []>} : vector<8x128xf32>, vector<128x384xf32>, vector<8x384xf32> -> vector<8x384xf32>
    %364 = vector.extract_strided_slice %363 {offsets = [0, 0], sizes = [8, 128], strides = [1, 1]} : vector<8x384xf32> to vector<8x128xf32>
    %365 = arith.addf %360, %364 : vector<8x128xf32>
    %cst_101 = arith.constant 5.000000e-01 : f32
    %366 = vector.broadcast %cst_101 : f32 to vector<8x128xf32>
    %367 = arith.mulf %366, %365 : vector<8x128xf32>
    %368 = math.tanh %367 : vector<8x128xf32>
    %cst_102 = arith.constant 5.000000e-01 : f32
    %369 = vector.broadcast %cst_102 : f32 to vector<8x128xf32>
    %370 = arith.mulf %369, %368 : vector<8x128xf32>
    %cst_103 = arith.constant 5.000000e-01 : f32
    %371 = vector.broadcast %cst_103 : f32 to vector<8x128xf32>
    %372 = arith.addf %370, %371 : vector<8x128xf32>
    %373 = vector.extract_strided_slice %363 {offsets = [0, 128], sizes = [8, 128], strides = [1, 1]} : vector<8x384xf32> to vector<8x128xf32>
    %374 = arith.addf %361, %373 : vector<8x128xf32>
    %cst_104 = arith.constant 5.000000e-01 : f32
    %375 = vector.broadcast %cst_104 : f32 to vector<8x128xf32>
    %376 = arith.mulf %375, %374 : vector<8x128xf32>
    %377 = math.tanh %376 : vector<8x128xf32>
    %cst_105 = arith.constant 5.000000e-01 : f32
    %378 = vector.broadcast %cst_105 : f32 to vector<8x128xf32>
    %379 = arith.mulf %378, %377 : vector<8x128xf32>
    %cst_106 = arith.constant 5.000000e-01 : f32
    %380 = vector.broadcast %cst_106 : f32 to vector<8x128xf32>
    %381 = arith.addf %379, %380 : vector<8x128xf32>
    %382 = vector.extract_strided_slice %363 {offsets = [0, 256], sizes = [8, 128], strides = [1, 1]} : vector<8x384xf32> to vector<8x128xf32>
    %383 = arith.addf %382, %10 : vector<8x128xf32>
    %384 = arith.mulf %372, %383 : vector<8x128xf32>
    %385 = arith.addf %362, %384 : vector<8x128xf32>
    %386 = math.tanh %385 : vector<8x128xf32>
    %cst_107 = arith.constant 1.000000e+00 : f32
    %387 = vector.broadcast %cst_107 : f32 to vector<8x128xf32>
    %388 = arith.subf %387, %381 : vector<8x128xf32>
    %389 = arith.mulf %388, %386 : vector<8x128xf32>
    %390 = arith.mulf %381, %307 : vector<8x128xf32>
    %391 = arith.addf %389, %390 : vector<8x128xf32>
    %392 = vector.extract_strided_slice %5 {offsets = [24, 384], sizes = [8, 128], strides = [1, 1]} : vector<64x768xf32> to vector<8x128xf32>
    %393 = vector.extract_strided_slice %5 {offsets = [24, 512], sizes = [8, 128], strides = [1, 1]} : vector<64x768xf32> to vector<8x128xf32>
    %394 = vector.extract_strided_slice %5 {offsets = [24, 640], sizes = [8, 128], strides = [1, 1]} : vector<64x768xf32> to vector<8x128xf32>
    %cst_108 = arith.constant dense<0.000000e+00> : vector<8x384xf32>
    %395 = tpu.matmul %339, %7, %cst_108 {dimension_numbers = #tpu.dot_dimension_numbers<[1], [0], [0], [1], [0, 0, 1, 1], [], []>} : vector<8x128xf32>, vector<128x384xf32>, vector<8x384xf32> -> vector<8x384xf32>
    %396 = vector.extract_strided_slice %395 {offsets = [0, 0], sizes = [8, 128], strides = [1, 1]} : vector<8x384xf32> to vector<8x128xf32>
    %397 = arith.addf %392, %396 : vector<8x128xf32>
    %cst_109 = arith.constant 5.000000e-01 : f32
    %398 = vector.broadcast %cst_109 : f32 to vector<8x128xf32>
    %399 = arith.mulf %398, %397 : vector<8x128xf32>
    %400 = math.tanh %399 : vector<8x128xf32>
    %cst_110 = arith.constant 5.000000e-01 : f32
    %401 = vector.broadcast %cst_110 : f32 to vector<8x128xf32>
    %402 = arith.mulf %401, %400 : vector<8x128xf32>
    %cst_111 = arith.constant 5.000000e-01 : f32
    %403 = vector.broadcast %cst_111 : f32 to vector<8x128xf32>
    %404 = arith.addf %402, %403 : vector<8x128xf32>
    %405 = vector.extract_strided_slice %395 {offsets = [0, 128], sizes = [8, 128], strides = [1, 1]} : vector<8x384xf32> to vector<8x128xf32>
    %406 = arith.addf %393, %405 : vector<8x128xf32>
    %cst_112 = arith.constant 5.000000e-01 : f32
    %407 = vector.broadcast %cst_112 : f32 to vector<8x128xf32>
    %408 = arith.mulf %407, %406 : vector<8x128xf32>
    %409 = math.tanh %408 : vector<8x128xf32>
    %cst_113 = arith.constant 5.000000e-01 : f32
    %410 = vector.broadcast %cst_113 : f32 to vector<8x128xf32>
    %411 = arith.mulf %410, %409 : vector<8x128xf32>
    %cst_114 = arith.constant 5.000000e-01 : f32
    %412 = vector.broadcast %cst_114 : f32 to vector<8x128xf32>
    %413 = arith.addf %411, %412 : vector<8x128xf32>
    %414 = vector.extract_strided_slice %395 {offsets = [0, 256], sizes = [8, 128], strides = [1, 1]} : vector<8x384xf32> to vector<8x128xf32>
    %415 = arith.addf %414, %13 : vector<8x128xf32>
    %416 = arith.mulf %404, %415 : vector<8x128xf32>
    %417 = arith.addf %394, %416 : vector<8x128xf32>
    %418 = math.tanh %417 : vector<8x128xf32>
    %cst_115 = arith.constant 1.000000e+00 : f32
    %419 = vector.broadcast %cst_115 : f32 to vector<8x128xf32>
    %420 = arith.subf %419, %413 : vector<8x128xf32>
    %421 = arith.mulf %420, %418 : vector<8x128xf32>
    %422 = arith.mulf %413, %339 : vector<8x128xf32>
    %423 = arith.addf %421, %422 : vector<8x128xf32>
    %424 = arith.mulf %391, %16 : vector<8x128xf32>
    %cst_116 = arith.constant dense<0.000000e+00> : vector<8xf32>
    %425 = vector.multi_reduction <add>, %424, %cst_116 [1] : vector<8x128xf32> to vector<8xf32>
    %426 = vector.shape_cast %425 : vector<8xf32> to vector<8x1xf32>
    %427 = arith.mulf %423, %19 : vector<8x128xf32>
    %cst_117 = arith.constant dense<0.000000e+00> : vector<8xf32>
    %428 = vector.multi_reduction <add>, %427, %cst_117 [1] : vector<8x128xf32> to vector<8xf32>
    %429 = vector.shape_cast %428 : vector<8xf32> to vector<8x1xf32>
    %c4_i32_118 = arith.constant 4 : i32
    %430 = vector.broadcast %c4_i32_118 : i32 to vector<8x8xi32>
    %431 = arith.cmpi eq, %20, %430 : vector<8x8xi32>
    %cst_119 = arith.constant 0.000000e+00 : f32
    %432 = vector.shape_cast %426 : vector<8x1xf32> to vector<8x1xf32>
    %433 = vector.broadcast %432 : vector<8x1xf32> to vector<8x8xf32>
    %434 = vector.broadcast %cst_119 : f32 to vector<8x8xf32>
    %435 = arith.select %431, %433, %434 : vector<8x8xi1>, vector<8x8xf32>
    %436 = arith.addf %359, %435 : vector<8x8xf32>
    %c3_i32_120 = arith.constant 3 : i32
    %437 = vector.broadcast %c3_i32_120 : i32 to vector<8x8xi32>
    %438 = arith.cmpi eq, %20, %437 : vector<8x8xi32>
    %cst_121 = arith.constant 0.000000e+00 : f32
    %439 = vector.shape_cast %429 : vector<8x1xf32> to vector<8x1xf32>
    %440 = vector.broadcast %439 : vector<8x1xf32> to vector<8x8xf32>
    %441 = vector.broadcast %cst_121 : f32 to vector<8x8xf32>
    %442 = arith.select %438, %440, %441 : vector<8x8xi1>, vector<8x8xf32>
    %443 = arith.addf %436, %442 : vector<8x8xf32>
    %444 = vector.extract_strided_slice %5 {offsets = [40, 0], sizes = [8, 128], strides = [1, 1]} : vector<64x768xf32> to vector<8x128xf32>
    %445 = vector.extract_strided_slice %5 {offsets = [40, 128], sizes = [8, 128], strides = [1, 1]} : vector<64x768xf32> to vector<8x128xf32>
    %446 = vector.extract_strided_slice %5 {offsets = [40, 256], sizes = [8, 128], strides = [1, 1]} : vector<64x768xf32> to vector<8x128xf32>
    %cst_122 = arith.constant dense<0.000000e+00> : vector<8x384xf32>
    %447 = tpu.matmul %391, %6, %cst_122 {dimension_numbers = #tpu.dot_dimension_numbers<[1], [0], [0], [1], [0, 0, 1, 1], [], []>} : vector<8x128xf32>, vector<128x384xf32>, vector<8x384xf32> -> vector<8x384xf32>
    %448 = vector.extract_strided_slice %447 {offsets = [0, 0], sizes = [8, 128], strides = [1, 1]} : vector<8x384xf32> to vector<8x128xf32>
    %449 = arith.addf %444, %448 : vector<8x128xf32>
    %cst_123 = arith.constant 5.000000e-01 : f32
    %450 = vector.broadcast %cst_123 : f32 to vector<8x128xf32>
    %451 = arith.mulf %450, %449 : vector<8x128xf32>
    %452 = math.tanh %451 : vector<8x128xf32>
    %cst_124 = arith.constant 5.000000e-01 : f32
    %453 = vector.broadcast %cst_124 : f32 to vector<8x128xf32>
    %454 = arith.mulf %453, %452 : vector<8x128xf32>
    %cst_125 = arith.constant 5.000000e-01 : f32
    %455 = vector.broadcast %cst_125 : f32 to vector<8x128xf32>
    %456 = arith.addf %454, %455 : vector<8x128xf32>
    %457 = vector.extract_strided_slice %447 {offsets = [0, 128], sizes = [8, 128], strides = [1, 1]} : vector<8x384xf32> to vector<8x128xf32>
    %458 = arith.addf %445, %457 : vector<8x128xf32>
    %cst_126 = arith.constant 5.000000e-01 : f32
    %459 = vector.broadcast %cst_126 : f32 to vector<8x128xf32>
    %460 = arith.mulf %459, %458 : vector<8x128xf32>
    %461 = math.tanh %460 : vector<8x128xf32>
    %cst_127 = arith.constant 5.000000e-01 : f32
    %462 = vector.broadcast %cst_127 : f32 to vector<8x128xf32>
    %463 = arith.mulf %462, %461 : vector<8x128xf32>
    %cst_128 = arith.constant 5.000000e-01 : f32
    %464 = vector.broadcast %cst_128 : f32 to vector<8x128xf32>
    %465 = arith.addf %463, %464 : vector<8x128xf32>
    %466 = vector.extract_strided_slice %447 {offsets = [0, 256], sizes = [8, 128], strides = [1, 1]} : vector<8x384xf32> to vector<8x128xf32>
    %467 = arith.addf %466, %10 : vector<8x128xf32>
    %468 = arith.mulf %456, %467 : vector<8x128xf32>
    %469 = arith.addf %446, %468 : vector<8x128xf32>
    %470 = math.tanh %469 : vector<8x128xf32>
    %cst_129 = arith.constant 1.000000e+00 : f32
    %471 = vector.broadcast %cst_129 : f32 to vector<8x128xf32>
    %472 = arith.subf %471, %465 : vector<8x128xf32>
    %473 = arith.mulf %472, %470 : vector<8x128xf32>
    %474 = arith.mulf %465, %391 : vector<8x128xf32>
    %475 = arith.addf %473, %474 : vector<8x128xf32>
    %476 = vector.extract_strided_slice %5 {offsets = [16, 384], sizes = [8, 128], strides = [1, 1]} : vector<64x768xf32> to vector<8x128xf32>
    %477 = vector.extract_strided_slice %5 {offsets = [16, 512], sizes = [8, 128], strides = [1, 1]} : vector<64x768xf32> to vector<8x128xf32>
    %478 = vector.extract_strided_slice %5 {offsets = [16, 640], sizes = [8, 128], strides = [1, 1]} : vector<64x768xf32> to vector<8x128xf32>
    %cst_130 = arith.constant dense<0.000000e+00> : vector<8x384xf32>
    %479 = tpu.matmul %423, %7, %cst_130 {dimension_numbers = #tpu.dot_dimension_numbers<[1], [0], [0], [1], [0, 0, 1, 1], [], []>} : vector<8x128xf32>, vector<128x384xf32>, vector<8x384xf32> -> vector<8x384xf32>
    %480 = vector.extract_strided_slice %479 {offsets = [0, 0], sizes = [8, 128], strides = [1, 1]} : vector<8x384xf32> to vector<8x128xf32>
    %481 = arith.addf %476, %480 : vector<8x128xf32>
    %cst_131 = arith.constant 5.000000e-01 : f32
    %482 = vector.broadcast %cst_131 : f32 to vector<8x128xf32>
    %483 = arith.mulf %482, %481 : vector<8x128xf32>
    %484 = math.tanh %483 : vector<8x128xf32>
    %cst_132 = arith.constant 5.000000e-01 : f32
    %485 = vector.broadcast %cst_132 : f32 to vector<8x128xf32>
    %486 = arith.mulf %485, %484 : vector<8x128xf32>
    %cst_133 = arith.constant 5.000000e-01 : f32
    %487 = vector.broadcast %cst_133 : f32 to vector<8x128xf32>
    %488 = arith.addf %486, %487 : vector<8x128xf32>
    %489 = vector.extract_strided_slice %479 {offsets = [0, 128], sizes = [8, 128], strides = [1, 1]} : vector<8x384xf32> to vector<8x128xf32>
    %490 = arith.addf %477, %489 : vector<8x128xf32>
    %cst_134 = arith.constant 5.000000e-01 : f32
    %491 = vector.broadcast %cst_134 : f32 to vector<8x128xf32>
    %492 = arith.mulf %491, %490 : vector<8x128xf32>
    %493 = math.tanh %492 : vector<8x128xf32>
    %cst_135 = arith.constant 5.000000e-01 : f32
    %494 = vector.broadcast %cst_135 : f32 to vector<8x128xf32>
    %495 = arith.mulf %494, %493 : vector<8x128xf32>
    %cst_136 = arith.constant 5.000000e-01 : f32
    %496 = vector.broadcast %cst_136 : f32 to vector<8x128xf32>
    %497 = arith.addf %495, %496 : vector<8x128xf32>
    %498 = vector.extract_strided_slice %479 {offsets = [0, 256], sizes = [8, 128], strides = [1, 1]} : vector<8x384xf32> to vector<8x128xf32>
    %499 = arith.addf %498, %13 : vector<8x128xf32>
    %500 = arith.mulf %488, %499 : vector<8x128xf32>
    %501 = arith.addf %478, %500 : vector<8x128xf32>
    %502 = math.tanh %501 : vector<8x128xf32>
    %cst_137 = arith.constant 1.000000e+00 : f32
    %503 = vector.broadcast %cst_137 : f32 to vector<8x128xf32>
    %504 = arith.subf %503, %497 : vector<8x128xf32>
    %505 = arith.mulf %504, %502 : vector<8x128xf32>
    %506 = arith.mulf %497, %423 : vector<8x128xf32>
    %507 = arith.addf %505, %506 : vector<8x128xf32>
    %508 = arith.mulf %475, %16 : vector<8x128xf32>
    %cst_138 = arith.constant dense<0.000000e+00> : vector<8xf32>
    %509 = vector.multi_reduction <add>, %508, %cst_138 [1] : vector<8x128xf32> to vector<8xf32>
    %510 = vector.shape_cast %509 : vector<8xf32> to vector<8x1xf32>
    %511 = arith.mulf %507, %19 : vector<8x128xf32>
    %cst_139 = arith.constant dense<0.000000e+00> : vector<8xf32>
    %512 = vector.multi_reduction <add>, %511, %cst_139 [1] : vector<8x128xf32> to vector<8xf32>
    %513 = vector.shape_cast %512 : vector<8xf32> to vector<8x1xf32>
    %c5_i32_140 = arith.constant 5 : i32
    %514 = vector.broadcast %c5_i32_140 : i32 to vector<8x8xi32>
    %515 = arith.cmpi eq, %20, %514 : vector<8x8xi32>
    %cst_141 = arith.constant 0.000000e+00 : f32
    %516 = vector.shape_cast %510 : vector<8x1xf32> to vector<8x1xf32>
    %517 = vector.broadcast %516 : vector<8x1xf32> to vector<8x8xf32>
    %518 = vector.broadcast %cst_141 : f32 to vector<8x8xf32>
    %519 = arith.select %515, %517, %518 : vector<8x8xi1>, vector<8x8xf32>
    %520 = arith.addf %443, %519 : vector<8x8xf32>
    %c2_i32_142 = arith.constant 2 : i32
    %521 = vector.broadcast %c2_i32_142 : i32 to vector<8x8xi32>
    %522 = arith.cmpi eq, %20, %521 : vector<8x8xi32>
    %cst_143 = arith.constant 0.000000e+00 : f32
    %523 = vector.shape_cast %513 : vector<8x1xf32> to vector<8x1xf32>
    %524 = vector.broadcast %523 : vector<8x1xf32> to vector<8x8xf32>
    %525 = vector.broadcast %cst_143 : f32 to vector<8x8xf32>
    %526 = arith.select %522, %524, %525 : vector<8x8xi1>, vector<8x8xf32>
    %527 = arith.addf %520, %526 : vector<8x8xf32>
    %528 = vector.extract_strided_slice %5 {offsets = [48, 0], sizes = [8, 128], strides = [1, 1]} : vector<64x768xf32> to vector<8x128xf32>
    %529 = vector.extract_strided_slice %5 {offsets = [48, 128], sizes = [8, 128], strides = [1, 1]} : vector<64x768xf32> to vector<8x128xf32>
    %530 = vector.extract_strided_slice %5 {offsets = [48, 256], sizes = [8, 128], strides = [1, 1]} : vector<64x768xf32> to vector<8x128xf32>
    %cst_144 = arith.constant dense<0.000000e+00> : vector<8x384xf32>
    %531 = tpu.matmul %475, %6, %cst_144 {dimension_numbers = #tpu.dot_dimension_numbers<[1], [0], [0], [1], [0, 0, 1, 1], [], []>} : vector<8x128xf32>, vector<128x384xf32>, vector<8x384xf32> -> vector<8x384xf32>
    %532 = vector.extract_strided_slice %531 {offsets = [0, 0], sizes = [8, 128], strides = [1, 1]} : vector<8x384xf32> to vector<8x128xf32>
    %533 = arith.addf %528, %532 : vector<8x128xf32>
    %cst_145 = arith.constant 5.000000e-01 : f32
    %534 = vector.broadcast %cst_145 : f32 to vector<8x128xf32>
    %535 = arith.mulf %534, %533 : vector<8x128xf32>
    %536 = math.tanh %535 : vector<8x128xf32>
    %cst_146 = arith.constant 5.000000e-01 : f32
    %537 = vector.broadcast %cst_146 : f32 to vector<8x128xf32>
    %538 = arith.mulf %537, %536 : vector<8x128xf32>
    %cst_147 = arith.constant 5.000000e-01 : f32
    %539 = vector.broadcast %cst_147 : f32 to vector<8x128xf32>
    %540 = arith.addf %538, %539 : vector<8x128xf32>
    %541 = vector.extract_strided_slice %531 {offsets = [0, 128], sizes = [8, 128], strides = [1, 1]} : vector<8x384xf32> to vector<8x128xf32>
    %542 = arith.addf %529, %541 : vector<8x128xf32>
    %cst_148 = arith.constant 5.000000e-01 : f32
    %543 = vector.broadcast %cst_148 : f32 to vector<8x128xf32>
    %544 = arith.mulf %543, %542 : vector<8x128xf32>
    %545 = math.tanh %544 : vector<8x128xf32>
    %cst_149 = arith.constant 5.000000e-01 : f32
    %546 = vector.broadcast %cst_149 : f32 to vector<8x128xf32>
    %547 = arith.mulf %546, %545 : vector<8x128xf32>
    %cst_150 = arith.constant 5.000000e-01 : f32
    %548 = vector.broadcast %cst_150 : f32 to vector<8x128xf32>
    %549 = arith.addf %547, %548 : vector<8x128xf32>
    %550 = vector.extract_strided_slice %531 {offsets = [0, 256], sizes = [8, 128], strides = [1, 1]} : vector<8x384xf32> to vector<8x128xf32>
    %551 = arith.addf %550, %10 : vector<8x128xf32>
    %552 = arith.mulf %540, %551 : vector<8x128xf32>
    %553 = arith.addf %530, %552 : vector<8x128xf32>
    %554 = math.tanh %553 : vector<8x128xf32>
    %cst_151 = arith.constant 1.000000e+00 : f32
    %555 = vector.broadcast %cst_151 : f32 to vector<8x128xf32>
    %556 = arith.subf %555, %549 : vector<8x128xf32>
    %557 = arith.mulf %556, %554 : vector<8x128xf32>
    %558 = arith.mulf %549, %475 : vector<8x128xf32>
    %559 = arith.addf %557, %558 : vector<8x128xf32>
    %560 = vector.extract_strided_slice %5 {offsets = [8, 384], sizes = [8, 128], strides = [1, 1]} : vector<64x768xf32> to vector<8x128xf32>
    %561 = vector.extract_strided_slice %5 {offsets = [8, 512], sizes = [8, 128], strides = [1, 1]} : vector<64x768xf32> to vector<8x128xf32>
    %562 = vector.extract_strided_slice %5 {offsets = [8, 640], sizes = [8, 128], strides = [1, 1]} : vector<64x768xf32> to vector<8x128xf32>
    %cst_152 = arith.constant dense<0.000000e+00> : vector<8x384xf32>
    %563 = tpu.matmul %507, %7, %cst_152 {dimension_numbers = #tpu.dot_dimension_numbers<[1], [0], [0], [1], [0, 0, 1, 1], [], []>} : vector<8x128xf32>, vector<128x384xf32>, vector<8x384xf32> -> vector<8x384xf32>
    %564 = vector.extract_strided_slice %563 {offsets = [0, 0], sizes = [8, 128], strides = [1, 1]} : vector<8x384xf32> to vector<8x128xf32>
    %565 = arith.addf %560, %564 : vector<8x128xf32>
    %cst_153 = arith.constant 5.000000e-01 : f32
    %566 = vector.broadcast %cst_153 : f32 to vector<8x128xf32>
    %567 = arith.mulf %566, %565 : vector<8x128xf32>
    %568 = math.tanh %567 : vector<8x128xf32>
    %cst_154 = arith.constant 5.000000e-01 : f32
    %569 = vector.broadcast %cst_154 : f32 to vector<8x128xf32>
    %570 = arith.mulf %569, %568 : vector<8x128xf32>
    %cst_155 = arith.constant 5.000000e-01 : f32
    %571 = vector.broadcast %cst_155 : f32 to vector<8x128xf32>
    %572 = arith.addf %570, %571 : vector<8x128xf32>
    %573 = vector.extract_strided_slice %563 {offsets = [0, 128], sizes = [8, 128], strides = [1, 1]} : vector<8x384xf32> to vector<8x128xf32>
    %574 = arith.addf %561, %573 : vector<8x128xf32>
    %cst_156 = arith.constant 5.000000e-01 : f32
    %575 = vector.broadcast %cst_156 : f32 to vector<8x128xf32>
    %576 = arith.mulf %575, %574 : vector<8x128xf32>
    %577 = math.tanh %576 : vector<8x128xf32>
    %cst_157 = arith.constant 5.000000e-01 : f32
    %578 = vector.broadcast %cst_157 : f32 to vector<8x128xf32>
    %579 = arith.mulf %578, %577 : vector<8x128xf32>
    %cst_158 = arith.constant 5.000000e-01 : f32
    %580 = vector.broadcast %cst_158 : f32 to vector<8x128xf32>
    %581 = arith.addf %579, %580 : vector<8x128xf32>
    %582 = vector.extract_strided_slice %563 {offsets = [0, 256], sizes = [8, 128], strides = [1, 1]} : vector<8x384xf32> to vector<8x128xf32>
    %583 = arith.addf %582, %13 : vector<8x128xf32>
    %584 = arith.mulf %572, %583 : vector<8x128xf32>
    %585 = arith.addf %562, %584 : vector<8x128xf32>
    %586 = math.tanh %585 : vector<8x128xf32>
    %cst_159 = arith.constant 1.000000e+00 : f32
    %587 = vector.broadcast %cst_159 : f32 to vector<8x128xf32>
    %588 = arith.subf %587, %581 : vector<8x128xf32>
    %589 = arith.mulf %588, %586 : vector<8x128xf32>
    %590 = arith.mulf %581, %507 : vector<8x128xf32>
    %591 = arith.addf %589, %590 : vector<8x128xf32>
    %592 = arith.mulf %559, %16 : vector<8x128xf32>
    %cst_160 = arith.constant dense<0.000000e+00> : vector<8xf32>
    %593 = vector.multi_reduction <add>, %592, %cst_160 [1] : vector<8x128xf32> to vector<8xf32>
    %594 = vector.shape_cast %593 : vector<8xf32> to vector<8x1xf32>
    %595 = arith.mulf %591, %19 : vector<8x128xf32>
    %cst_161 = arith.constant dense<0.000000e+00> : vector<8xf32>
    %596 = vector.multi_reduction <add>, %595, %cst_161 [1] : vector<8x128xf32> to vector<8xf32>
    %597 = vector.shape_cast %596 : vector<8xf32> to vector<8x1xf32>
    %c6_i32_162 = arith.constant 6 : i32
    %598 = vector.broadcast %c6_i32_162 : i32 to vector<8x8xi32>
    %599 = arith.cmpi eq, %20, %598 : vector<8x8xi32>
    %cst_163 = arith.constant 0.000000e+00 : f32
    %600 = vector.shape_cast %594 : vector<8x1xf32> to vector<8x1xf32>
    %601 = vector.broadcast %600 : vector<8x1xf32> to vector<8x8xf32>
    %602 = vector.broadcast %cst_163 : f32 to vector<8x8xf32>
    %603 = arith.select %599, %601, %602 : vector<8x8xi1>, vector<8x8xf32>
    %604 = arith.addf %527, %603 : vector<8x8xf32>
    %c1_i32_164 = arith.constant 1 : i32
    %605 = vector.broadcast %c1_i32_164 : i32 to vector<8x8xi32>
    %606 = arith.cmpi eq, %20, %605 : vector<8x8xi32>
    %cst_165 = arith.constant 0.000000e+00 : f32
    %607 = vector.shape_cast %597 : vector<8x1xf32> to vector<8x1xf32>
    %608 = vector.broadcast %607 : vector<8x1xf32> to vector<8x8xf32>
    %609 = vector.broadcast %cst_165 : f32 to vector<8x8xf32>
    %610 = arith.select %606, %608, %609 : vector<8x8xi1>, vector<8x8xf32>
    %611 = arith.addf %604, %610 : vector<8x8xf32>
    %612 = vector.extract_strided_slice %5 {offsets = [56, 0], sizes = [8, 128], strides = [1, 1]} : vector<64x768xf32> to vector<8x128xf32>
    %613 = vector.extract_strided_slice %5 {offsets = [56, 128], sizes = [8, 128], strides = [1, 1]} : vector<64x768xf32> to vector<8x128xf32>
    %614 = vector.extract_strided_slice %5 {offsets = [56, 256], sizes = [8, 128], strides = [1, 1]} : vector<64x768xf32> to vector<8x128xf32>
    %cst_166 = arith.constant dense<0.000000e+00> : vector<8x384xf32>
    %615 = tpu.matmul %559, %6, %cst_166 {dimension_numbers = #tpu.dot_dimension_numbers<[1], [0], [0], [1], [0, 0, 1, 1], [], []>} : vector<8x128xf32>, vector<128x384xf32>, vector<8x384xf32> -> vector<8x384xf32>
    %616 = vector.extract_strided_slice %615 {offsets = [0, 0], sizes = [8, 128], strides = [1, 1]} : vector<8x384xf32> to vector<8x128xf32>
    %617 = arith.addf %612, %616 : vector<8x128xf32>
    %cst_167 = arith.constant 5.000000e-01 : f32
    %618 = vector.broadcast %cst_167 : f32 to vector<8x128xf32>
    %619 = arith.mulf %618, %617 : vector<8x128xf32>
    %620 = math.tanh %619 : vector<8x128xf32>
    %cst_168 = arith.constant 5.000000e-01 : f32
    %621 = vector.broadcast %cst_168 : f32 to vector<8x128xf32>
    %622 = arith.mulf %621, %620 : vector<8x128xf32>
    %cst_169 = arith.constant 5.000000e-01 : f32
    %623 = vector.broadcast %cst_169 : f32 to vector<8x128xf32>
    %624 = arith.addf %622, %623 : vector<8x128xf32>
    %625 = vector.extract_strided_slice %615 {offsets = [0, 128], sizes = [8, 128], strides = [1, 1]} : vector<8x384xf32> to vector<8x128xf32>
    %626 = arith.addf %613, %625 : vector<8x128xf32>
    %cst_170 = arith.constant 5.000000e-01 : f32
    %627 = vector.broadcast %cst_170 : f32 to vector<8x128xf32>
    %628 = arith.mulf %627, %626 : vector<8x128xf32>
    %629 = math.tanh %628 : vector<8x128xf32>
    %cst_171 = arith.constant 5.000000e-01 : f32
    %630 = vector.broadcast %cst_171 : f32 to vector<8x128xf32>
    %631 = arith.mulf %630, %629 : vector<8x128xf32>
    %cst_172 = arith.constant 5.000000e-01 : f32
    %632 = vector.broadcast %cst_172 : f32 to vector<8x128xf32>
    %633 = arith.addf %631, %632 : vector<8x128xf32>
    %634 = vector.extract_strided_slice %615 {offsets = [0, 256], sizes = [8, 128], strides = [1, 1]} : vector<8x384xf32> to vector<8x128xf32>
    %635 = arith.addf %634, %10 : vector<8x128xf32>
    %636 = arith.mulf %624, %635 : vector<8x128xf32>
    %637 = arith.addf %614, %636 : vector<8x128xf32>
    %638 = math.tanh %637 : vector<8x128xf32>
    %cst_173 = arith.constant 1.000000e+00 : f32
    %639 = vector.broadcast %cst_173 : f32 to vector<8x128xf32>
    %640 = arith.subf %639, %633 : vector<8x128xf32>
    %641 = arith.mulf %640, %638 : vector<8x128xf32>
    %642 = arith.mulf %633, %559 : vector<8x128xf32>
    %643 = arith.addf %641, %642 : vector<8x128xf32>
    %644 = vector.extract_strided_slice %5 {offsets = [0, 384], sizes = [8, 128], strides = [1, 1]} : vector<64x768xf32> to vector<8x128xf32>
    %645 = vector.extract_strided_slice %5 {offsets = [0, 512], sizes = [8, 128], strides = [1, 1]} : vector<64x768xf32> to vector<8x128xf32>
    %646 = vector.extract_strided_slice %5 {offsets = [0, 640], sizes = [8, 128], strides = [1, 1]} : vector<64x768xf32> to vector<8x128xf32>
    %cst_174 = arith.constant dense<0.000000e+00> : vector<8x384xf32>
    %647 = tpu.matmul %591, %7, %cst_174 {dimension_numbers = #tpu.dot_dimension_numbers<[1], [0], [0], [1], [0, 0, 1, 1], [], []>} : vector<8x128xf32>, vector<128x384xf32>, vector<8x384xf32> -> vector<8x384xf32>
    %648 = vector.extract_strided_slice %647 {offsets = [0, 0], sizes = [8, 128], strides = [1, 1]} : vector<8x384xf32> to vector<8x128xf32>
    %649 = arith.addf %644, %648 : vector<8x128xf32>
    %cst_175 = arith.constant 5.000000e-01 : f32
    %650 = vector.broadcast %cst_175 : f32 to vector<8x128xf32>
    %651 = arith.mulf %650, %649 : vector<8x128xf32>
    %652 = math.tanh %651 : vector<8x128xf32>
    %cst_176 = arith.constant 5.000000e-01 : f32
    %653 = vector.broadcast %cst_176 : f32 to vector<8x128xf32>
    %654 = arith.mulf %653, %652 : vector<8x128xf32>
    %cst_177 = arith.constant 5.000000e-01 : f32
    %655 = vector.broadcast %cst_177 : f32 to vector<8x128xf32>
    %656 = arith.addf %654, %655 : vector<8x128xf32>
    %657 = vector.extract_strided_slice %647 {offsets = [0, 128], sizes = [8, 128], strides = [1, 1]} : vector<8x384xf32> to vector<8x128xf32>
    %658 = arith.addf %645, %657 : vector<8x128xf32>
    %cst_178 = arith.constant 5.000000e-01 : f32
    %659 = vector.broadcast %cst_178 : f32 to vector<8x128xf32>
    %660 = arith.mulf %659, %658 : vector<8x128xf32>
    %661 = math.tanh %660 : vector<8x128xf32>
    %cst_179 = arith.constant 5.000000e-01 : f32
    %662 = vector.broadcast %cst_179 : f32 to vector<8x128xf32>
    %663 = arith.mulf %662, %661 : vector<8x128xf32>
    %cst_180 = arith.constant 5.000000e-01 : f32
    %664 = vector.broadcast %cst_180 : f32 to vector<8x128xf32>
    %665 = arith.addf %663, %664 : vector<8x128xf32>
    %666 = vector.extract_strided_slice %647 {offsets = [0, 256], sizes = [8, 128], strides = [1, 1]} : vector<8x384xf32> to vector<8x128xf32>
    %667 = arith.addf %666, %13 : vector<8x128xf32>
    %668 = arith.mulf %656, %667 : vector<8x128xf32>
    %669 = arith.addf %646, %668 : vector<8x128xf32>
    %670 = math.tanh %669 : vector<8x128xf32>
    %cst_181 = arith.constant 1.000000e+00 : f32
    %671 = vector.broadcast %cst_181 : f32 to vector<8x128xf32>
    %672 = arith.subf %671, %665 : vector<8x128xf32>
    %673 = arith.mulf %672, %670 : vector<8x128xf32>
    %674 = arith.mulf %665, %591 : vector<8x128xf32>
    %675 = arith.addf %673, %674 : vector<8x128xf32>
    %676 = arith.mulf %643, %16 : vector<8x128xf32>
    %cst_182 = arith.constant dense<0.000000e+00> : vector<8xf32>
    %677 = vector.multi_reduction <add>, %676, %cst_182 [1] : vector<8x128xf32> to vector<8xf32>
    %678 = vector.shape_cast %677 : vector<8xf32> to vector<8x1xf32>
    %679 = arith.mulf %675, %19 : vector<8x128xf32>
    %cst_183 = arith.constant dense<0.000000e+00> : vector<8xf32>
    %680 = vector.multi_reduction <add>, %679, %cst_183 [1] : vector<8x128xf32> to vector<8xf32>
    %681 = vector.shape_cast %680 : vector<8xf32> to vector<8x1xf32>
    %c7_i32_184 = arith.constant 7 : i32
    %682 = vector.broadcast %c7_i32_184 : i32 to vector<8x8xi32>
    %683 = arith.cmpi eq, %20, %682 : vector<8x8xi32>
    %cst_185 = arith.constant 0.000000e+00 : f32
    %684 = vector.shape_cast %678 : vector<8x1xf32> to vector<8x1xf32>
    %685 = vector.broadcast %684 : vector<8x1xf32> to vector<8x8xf32>
    %686 = vector.broadcast %cst_185 : f32 to vector<8x8xf32>
    %687 = arith.select %683, %685, %686 : vector<8x8xi1>, vector<8x8xf32>
    %688 = arith.addf %611, %687 : vector<8x8xf32>
    %c0_i32_186 = arith.constant 0 : i32
    %689 = vector.broadcast %c0_i32_186 : i32 to vector<8x8xi32>
    %690 = arith.cmpi eq, %20, %689 : vector<8x8xi32>
    %cst_187 = arith.constant 0.000000e+00 : f32
    %691 = vector.shape_cast %681 : vector<8x1xf32> to vector<8x1xf32>
    %692 = vector.broadcast %691 : vector<8x1xf32> to vector<8x8xf32>
    %693 = vector.broadcast %cst_187 : f32 to vector<8x8xf32>
    %694 = arith.select %690, %692, %693 : vector<8x8xi1>, vector<8x8xf32>
    %695 = arith.addf %688, %694 : vector<8x8xf32>
    %c0_188 = arith.constant 0 : index
    %c0_189 = arith.constant 0 : index
    %696 = vector.load %arg9[%c0_188, %c0_189] : memref<1x1xf32, #tpu.memory_space<vmem>>, vector<1x1xf32>
    %697 = vector.broadcast %696 : vector<1x1xf32> to vector<8x8xf32>
    %698 = arith.addf %695, %697 : vector<8x8xf32>
    %cst_190 = arith.constant 5.000000e-01 : f32
    %699 = vector.broadcast %cst_190 : f32 to vector<8x8xf32>
    %700 = arith.mulf %699, %698 : vector<8x8xf32>
    %701 = math.tanh %700 : vector<8x8xf32>
    %cst_191 = arith.constant 5.000000e-01 : f32
    %702 = vector.broadcast %cst_191 : f32 to vector<8x8xf32>
    %703 = arith.mulf %702, %701 : vector<8x8xf32>
    %cst_192 = arith.constant 5.000000e-01 : f32
    %704 = vector.broadcast %cst_192 : f32 to vector<8x8xf32>
    %705 = arith.addf %703, %704 : vector<8x8xf32>
    %c0_193 = arith.constant 0 : index
    %c0_194 = arith.constant 0 : index
    %706 = vector.load %arg10[%c0_193, %c0_194] : memref<8x8xf32, #tpu.memory_space<vmem>>, vector<8x8xf32>
    tpu.vector_store %arg10[%c0_193, %c0_194], %705 {strides = array<i32>} : memref<8x8xf32, #tpu.memory_space<vmem>>, vector<8x8xf32>,
    return
  }
}

</mosaic_0001>

<bundles_post_ra>
// kernel: tpu_custom_call.1
= control target key start
LH: loop header
LB: loop body
LE: loop exit
PB: predicated region body
PF: predicated region fallthrough
CT: control target
= control target key end

     0   :  { %s6541_s0 = inlined_call_operand.vmem [shape: f32[64,16], index: 0, kind: input, shape index: {}]   ;;  %s6542_s1 = inlined_call_operand.hbm [shape: f32[16,768], index: 1, kind: input, shape index: {}]   ;;  %s6543_s2 = inlined_call_operand.vmem [shape: f32[1,768], index: 2, kind: input, shape index: {}]   ;;  %s6544_s3 = inlined_call_operand.hbm [shape: f32[128,384], index: 3, kind: input, shape index: {}]   ;;  %s6545_s4 = inlined_call_operand.hbm [shape: f32[128,384], index: 4, kind: input, shape index: {}]   ;;  %s6546_s5 = inlined_call_operand.vmem [shape: f32[1,128], index: 5, kind: input, shape index: {}]   ;;  %s6547_s6 = inlined_call_operand.vmem [shape: f32[1,128], index: 6, kind: input, shape index: {}]   ;;  %s6548_s7 = inlined_call_operand.vmem [shape: f32[1,128], index: 7, kind: input, shape index: {}]   ;;  %s6549_s8 = inlined_call_operand.vmem [shape: f32[1,128], index: 8, kind: input, shape index: {}]   ;;  %s6550_s9 = inlined_call_operand.<no memory space> [shape: f32[1,1], index: 9, kind: input, shape index: {}]   ;;  %s6551_s10 = inlined_call_operand.hbm [shape: f32[8,8], index: 10, kind: output, shape index: {}]  }
   0x1   :  { %v15_v0 = vstv %s6550_s9 }
   0x2   :  { %16 = vst [vmem:[#allocation2] sm:$0x1] %v15_v0 }
   0x3   :  { %17 = vsyncpa [#allocation4], 0 }
   0x4   :  { %18 = vsyncpa [#allocation7], 0 }
   0x5   :  { %19 = vsyncpa [#allocation5], 0  ;;  %s5298_s15 = smov [#allocation6]   ;;  %s5204_s19 = scalar_lea.hbm %s6544_s3, 6144 }
   0x6   :  { %s41_s16 = sshll.u32 %s5298_s15, 4  ;;  %p5205_p0 = scmp.ne.s32.totalorder %s6544_s3, %s5204_s19  ;;  %s42_s16 = int_to_ptr.vmem [resolvable:$true] %s41_s16 }
   0x7   :  { %p5208_p1 = scmp.lt.u32.totalorder %s5204_s19, %s6544_s3 }
   0x9   :  { %p5210_p2 = pnand %p5208_p1, %p5205_p0 }
   0xb   :  { %5213 = shalt.err (!%p5210_p2)
}
   0xc   :  { %s5214_s9 = scalar_lea.vmem %s42_s16, 6144  ;;  %p5219_p4 = scmp.lt.s32.totalorder %s42_s16, %s42_s16 }
   0xd   :  { %p5215_p3 = scmp.ne.s32.totalorder %s42_s16, %s5214_s9  ;;  %p5220_p5 = scmp.lt.s32.totalorder %s5214_s9, %s5214_s9 }
   0xf   :  { %p5221_p6 = por %p5220_p5, %p5219_p4 }
  0x11   :  { %p5222_p7 = pnand %p5221_p6, %p5215_p3 }
  0x13   :  { %5225 = shalt.err (!%p5222_p7)
}
  0x14   :  { %s5299_s24 = smov 384   ;;  %s5300_s25 = smov 24  }
  0x15   :  { %47 = dma.hbm_to_vmem [thread:$0]  %s6544_s3, 6144, %s42_s16, [#allocation7], %s5299_s24, %s5299_s24, %s5300_s25  }
  0x16   :  { %s5301_s28 = smov [#allocation3]   ;;  %s5226_s12 = scalar_lea.hbm %s6542_s1, 1536 }
  0x17   :  { %s27_s29 = sshll.u32 %s5301_s28, 4  ;;  %p5227_p8 = scmp.ne.s32.totalorder %s6542_s1, %s5226_s12  ;;  %s28_s29 = int_to_ptr.vmem [resolvable:$true] %s27_s29 }
  0x18   :  { %p5230_p9 = scmp.lt.u32.totalorder %s5226_s12, %s6542_s1 }
  0x1a   :  { %p5232_p10 = pnand %p5230_p9, %p5227_p8 }
  0x1c   :  { %5235 = shalt.err (!%p5232_p10)
}
  0x1d   :  { %s5236_s18 = scalar_lea.vmem %s28_s29, 1536  ;;  %p5241_p12 = scmp.lt.s32.totalorder %s28_s29, %s28_s29 }
  0x1e   :  { %p5237_p11 = scmp.ne.s32.totalorder %s28_s29, %s5236_s18  ;;  %p5242_p13 = scmp.lt.s32.totalorder %s5236_s18, %s5236_s18 }
  0x20   :  { %p5243_p0 = por %p5242_p13, %p5241_p12 }
  0x22   :  { %p5244_p1 = pnand %p5243_p0, %p5237_p11 }
  0x24   :  { %5247 = shalt.err (!%p5244_p1)
}
  0x25   :  { %s5302_s3 = smov 768   ;;  %s5303_s16 = smov 48  }
  0x26   :  { %33 = dma.hbm_to_vmem [thread:$0]  %s6542_s1, 1536, %s28_s29, [#allocation4], %s5302_s3, %s5302_s3, %s5303_s16  }
  0x27   :  { %s5304_s21 = smov [#allocation8]   ;;  %s5248_s26 = scalar_lea.hbm %s6545_s4, 6144 }
  0x28   :  { %s53_s22 = sshll.u32 %s5304_s21, 4  ;;  %p5249_p2 = scmp.ne.s32.totalorder %s6545_s4, %s5248_s26  ;;  %s54_s22 = int_to_ptr.vmem [resolvable:$true] %s53_s22 }
  0x29   :  { %p5252_p3 = scmp.lt.u32.totalorder %s5248_s26, %s6545_s4 }
  0x2b   :  { %p5254_p4 = pnand %p5252_p3, %p5249_p2 }
  0x2d   :  { %5257 = shalt.err (!%p5254_p4)
}
  0x2e   :  { %s5258_s12 = scalar_lea.vmem %s54_s22, 6144  ;;  %p5263_p6 = scmp.lt.s32.totalorder %s54_s22, %s54_s22 }
  0x2f   :  { %p5259_p5 = scmp.ne.s32.totalorder %s54_s22, %s5258_s12  ;;  %p5264_p7 = scmp.lt.s32.totalorder %s5258_s12, %s5258_s12 }
  0x31   :  { %p5265_p8 = por %p5264_p7, %p5263_p6 }
  0x33   :  { %p5266_p9 = pnand %p5265_p8, %p5259_p5 }
  0x35   :  { %5269 = shalt.err (!%p5266_p9)
}
  0x36   :  { %59 = dma.hbm_to_vmem [thread:$0]  %s6545_s4, 6144, %s54_s22, [#allocation7], %s5299_s24, %s5299_s24, %s5300_s25  }
  0x37   :  { %5292 = dma.done.wait [#allocation4], 1536  }
  0x38   :  { %5293 = vsyncadd [#allocation4], 4294965760 }
  0x39   :  { %5294 = dma.done.wait [#allocation7], 12288  }
  0x3a   :  { %5295 = vsyncadd [#allocation7], 4294955008  ;;  %v6553_v1 = vmov 0.0   ;;  %v88_v2 = vld [vmem:[#allocation3 + $0x8] sm:$0xff]  ;;  %v94_v3 = vld [vmem:[#allocation3 + $0x38] sm:$0xff]  ;;  %vm131_vm0 = vcmask 130048  }
  0x3b   :  { %220 = vmatprep.mubr.f32.mxu0 %v6553_v1  ;;  %244 = vmatprep.mubr.f32.mxu1 %v6553_v1  ;;  %v87_v4 = vld [vmem:[#allocation3] sm:$0xff]  ;;  %v4147_v5 = vpack.c.bf16 %v94_v3, %v88_v2  ;;  %v93_v6 = vld [vmem:[#allocation3 + $0x30] sm:$0xff]  ;;  %v90_v9 = vld [vmem:[#allocation3 + $0x18] sm:$0xff]  ;;  %v6555_v27 = vmov 0.0|0.0   ;;  %vm5307_vm1 = vmmov 0   ;;  %vm3268_vm10 = vcmask 64512  }
  0x3c   :  { %v4149_v7 = vpack.c.bf16 %v93_v6, %v87_v4  ;;  %v5415_v8 = vld [vmem:[%s6541_s0] sm:$0xff]  ;;  %v96_v10 = vld [vmem:[#allocation3 + $0x48] sm:$0xff]  ;;  %v89_v14 = vld [vmem:[#allocation3 + $0x10] sm:$0xff] }
  0x3d   :  { %v92_v11 = vld [vmem:[#allocation3 + $0x28] sm:$0xff]  ;;  %4148 = vmatprep.subr.bf16.mxu0 %v4147_v5  ;;  %5055 = vmatprep.subr.bf16.mxu1 %v4147_v5  ;;  %v4151_v12 = vpack.c.bf16 %v96_v10, %v90_v9  ;;  %v98_v13 = vld [vmem:[#allocation3 + $0x58] sm:$0xff]  ;;  %v95_v15 = vld [vmem:[#allocation3 + $0x40] sm:$0xff] }
  0x3e   :  { %4150 = vmatpush1.bf16.msra.mxu0 %v4149_v7  ;;  %5056 = vmatpush1.bf16.msra.mxu1 %v4149_v7  ;;  %v5420_v16 = vld [vmem:[%s6541_s0 + $0x20] sm:$0xff]  ;;  %v4155_v17 = vpack.c.bf16 %v98_v13, %v92_v11  ;;  %v4153_v18 = vpack.c.bf16 %v95_v15, %v89_v14  ;;  %v97_v20 = vld [vmem:[#allocation3 + $0x50] sm:$0xff]  ;;  %v496_v22 = vld [vmem:[#allocation6 + $0x8] sm:$0xff] }
  0x3f   :  { %v91_v19 = vld [vmem:[#allocation3 + $0x20] sm:$0xff]  ;;  %4152 = vmatprep.subr.bf16.mxu1 %v4151_v12  ;;  %v81_v28 = vld [vmem:[%s6541_s0 + $0x10] sm:$0xff]  ;;  %v5461_v30 = vld [vmem:[%s6541_s0 + $0x18] sm:$0xff] }
  0x40   :  { %v4157_v21 = vpack.c.bf16 %v97_v20, %v91_v19  ;;  %4156 = vmatprep.subr.bf16.mxu0 %v4155_v17  ;;  %v499_v23 = vld [vmem:[#allocation6 + $0x20] sm:$0xff]  ;;  %v5451_v29 = vld [vmem:[%s6541_s0 + $0x30] sm:$0xff]  ;;  %v5466_v31 = vld [vmem:[%s6541_s0 + $0x38] sm:$0xff] }
  0x41   :  { %3286 = vmatmul.mubr.msk.f32.vlgmr.msra.gmra.mrb[0].mxu0 %vm131_vm0, %v5415_v8  ;;  %3290 = vmatmul.mubr.msk.f32.vlgmr.msra.gmra.mrb[0].mxu1 %vm131_vm0, %v5420_v16  ;;  %v80_v24 = vld [vmem:[%s6541_s0 + $0x8] sm:$0xff]  ;;  %v5434_v26 = vpack.c.bf16 %v499_v23, %v496_v22  ;;  %v497_v32 = vld [vmem:[#allocation6 + $0x10] sm:$0xff]  ;;  %v498_v35 = vld [vmem:[#allocation6 + $0x18] sm:$0xff] }
  0x42   :  { %4154 = vmatpush1.bf16.msra.mxu1 %v4153_v18  ;;  %4158 = vmatpush1.bf16.msra.mxu0 %v4157_v21  ;;  %v5432_v25 = vld [vmem:[%s6541_s0 + $0x28] sm:$0xff]  ;;  %v502_v36 = vld [vmem:[#allocation6 + $0x38] sm:$0xff]  ;;  %v505_v37 = vld [vmem:[#allocation6 + $0x50] sm:$0xff] }
  0x43   :  { %226 = vmatprep.mubr.f32.mxu0 %v6553_v1  ;;  %250 = vmatprep.mubr.f32.mxu1 %v6553_v1  ;;  %v500_v33 = vld [vmem:[#allocation6 + $0x28] sm:$0xff]  ;;  %v495_v34 = vld [vmem:[#allocation6] sm:$0xff]  ;;  %v506_v41 = vld [vmem:[#allocation6 + $0x58] sm:$0xff]  ;;  %v5478_v44 = vpack.c.bf16 %v505_v37, %v502_v36 }
  0x44   :  { %4191 = vmatprep.subr.bf16.mxu1 %v6555_v27  ;;  %4160 = vmatprep.subr.bf16.mxu0 %v5434_v26  ;;  %v5474_v38 = vpack.c.bf16 %v500_v33, %v497_v32  ;;  %v5476_v39 = vpack.c.bf16 %v498_v35, %v495_v34  ;;  %v503_v40 = vld [vmem:[#allocation6 + $0x40] sm:$0xff]  ;;  %v501_v42 = vld [vmem:[#allocation6 + $0x30] sm:$0xff]  ;;  %v504_v43 = vld [vmem:[#allocation6 + $0x48] sm:$0xff] }
  0x45   :  { %3287 = vmatmul.mubr.msk.f32.gmra.mrb[2].mxu0 %vm131_vm0, %v80_v24  ;;  %3291 = vmatmul.mubr.msk.f32.gmra.mrb[2].mxu1 %vm131_vm0, %v5432_v25  ;;  %v508_v45 = vld [vmem:[#allocation6 + $0x68] sm:$0xff]  ;;  %v511_v46 = vld [vmem:[#allocation6 + $0x80] sm:$0xff]  ;;  %v5486_v47 = vpack.c.bf16 %v506_v41, %v503_v40  ;;  %v5488_v48 = vpack.c.bf16 %v504_v43, %v501_v42  ;;  %v509_v49 = vld [vmem:[#allocation6 + $0x70] sm:$0xff] }
  0x46   :  { %232 = vmatprep.mubr.f32.mxu0 %v6553_v1  ;;  %256 = vmatprep.mubr.f32.mxu1 %v6553_v1  ;;  %v512_v50 = vld [vmem:[#allocation6 + $0x88] sm:$0xff]  ;;  %v507_v51 = vld [vmem:[#allocation6 + $0x60] sm:$0xff]  ;;  %v510_v52 = vld [vmem:[#allocation6 + $0x78] sm:$0xff]  ;;  %v5494_v53 = vpack.c.bf16 %v511_v46, %v508_v45 }
  0x47   :  { %v514_v54 = vld [vmem:[#allocation6 + $0x98] sm:$0xff]  ;;  %v517_v55 = vld [vmem:[#allocation6 + $0xb0] sm:$0xff]  ;;  %v5500_v56 = vpack.c.bf16 %v512_v50, %v509_v49  ;;  %v5502_v57 = vpack.c.bf16 %v510_v52, %v507_v51  ;;  %v515_v58 = vld [vmem:[#allocation6 + $0xa0] sm:$0xff] }
  0x48   :  { %v518_v59 = vld [vmem:[#allocation6 + $0xb8] sm:$0xff]  ;;  %v513_v60 = vld [vmem:[#allocation6 + $0x90] sm:$0xff]  ;;  %v516_v61 = vld [vmem:[#allocation6 + $0xa8] sm:$0xff]  ;;  %v5508_v62 = vpack.c.bf16 %v517_v55, %v514_v54 }
  0x49   :  { %3288 = vmatmul.mubr.msk.f32.gmra.mrb[4].mxu0 %vm131_vm0, %v81_v28  ;;  %3292 = vmatmul.mubr.msk.f32.gmra.mrb[4].mxu1 %vm131_vm0, %v5451_v29  ;;  %v520_v63 = vld [vmem:[#allocation6 + $0xc8] sm:$0xff]  ;;  %v523_v0 = vld [vmem:[#allocation6 + $0xe0] sm:$0xff]  ;;  %v5514_v2 = vpack.c.bf16 %v518_v59, %v515_v58  ;;  %v5516_v3 = vpack.c.bf16 %v516_v61, %v513_v60  ;;  %v521_v4 = vld [vmem:[#allocation6 + $0xd0] sm:$0xff] }
  0x4a   :  { %238 = vmatprep.mubr.f32.mxu0 %v6553_v1  ;;  %262 = vmatprep.mubr.f32.mxu1 %v6553_v1  ;;  %v524_v5 = vld [vmem:[#allocation6 + $0xe8] sm:$0xff]  ;;  %v519_v6 = vld [vmem:[#allocation6 + $0xc0] sm:$0xff]  ;;  %v522_v7 = vld [vmem:[#allocation6 + $0xd8] sm:$0xff] }
  0x4b   :  { %v526_v9 = vld [vmem:[#allocation6 + $0xf8] sm:$0xff]  ;;  %v529_v10 = vld [vmem:[#allocation6 + $0x110] sm:$0xff]  ;;  %v5530_v11 = vpack.c.bf16 %v524_v5, %v521_v4  ;;  %v5532_v12 = vpack.c.bf16 %v522_v7, %v519_v6  ;;  %v527_v13 = vld [vmem:[#allocation6 + $0x100] sm:$0xff] }
  0x4c   :  { %v530_v14 = vld [vmem:[#allocation6 + $0x118] sm:$0xff]  ;;  %v525_v15 = vld [vmem:[#allocation6 + $0xf0] sm:$0xff]  ;;  %v528_v17 = vld [vmem:[#allocation6 + $0x108] sm:$0xff]  ;;  %v5538_v18 = vpack.c.bf16 %v529_v10, %v526_v9 }
  0x4d   :  { %3289 = vmatmul.mubr.msk.f32.gmra.mrb[6].mxu0 %vm131_vm0, %v5461_v30  ;;  %3293 = vmatmul.mubr.msk.f32.gmra.mrb[6].mxu1 %vm131_vm0, %v5466_v31  ;;  %6590 = vst [vmem:[#allocation13_spill] sm:$0xff] %v5530_v11  ;;  %6591 = vst [vmem:[#allocation14_spill] sm:$0xff] %v5532_v12  ;;  %v532_v19 = vld [vmem:[#allocation6 + $0x128] sm:$0xff]  ;;  %v535_v20 = vld [vmem:[#allocation6 + $0x140] sm:$0xff]  ;;  %v5546_v21 = vpack.c.bf16 %v530_v14, %v527_v13  ;;  %v5548_v22 = vpack.c.bf16 %v528_v17, %v525_v15 }
  0x4e   :  { %333 = vmatprep.mubr.f32.mxu1 %v6553_v1  ;;  %446 = vmatprep.mubr.f32.mxu0 %v6553_v1  ;;  %6592 = vst [vmem:[#allocation15_spill] sm:$0xff] %v5538_v18  ;;  %v533_v23 = vld [vmem:[#allocation6 + $0x130] sm:$0xff]  ;;  %v538_v32 = vld [vmem:[#allocation6 + $0x158] sm:$0xff]  ;;  %v539_v36 = vld [vmem:[#allocation6 + $0x160] sm:$0xff] }
  0x4f   :  { %6593 = vst [vmem:[#allocation16_spill] sm:$0xff] %v5546_v21  ;;  %6594 = vst [vmem:[#allocation17_spill] sm:$0xff] %v5548_v22  ;;  %v541_v33 = vld [vmem:[#allocation6 + $0x170] sm:$0xff]  ;;  %v542_v37 = vld [vmem:[#allocation6 + $0x178] sm:$0xff] }
  0x50   :  { %v537_v40 = vld [vmem:[#allocation6 + $0x150] sm:$0xff]  ;;  %v540_v41 = vld [vmem:[#allocation6 + $0x168] sm:$0xff]  ;;  %v547_v43 = vld [vmem:[#allocation8 + $0x20] sm:$0xff]  ;;  %v5578_v45 = vpack.c.bf16 %v542_v37, %v539_v36 }
  0x51   :  { %3294 = vmatmul.mubr.msk.f32.vlgmr.msra.gmra.mrb[8].mxu1 %vm131_vm0, %v5415_v8  ;;  %3302 = vmatmul.mubr.msk.f32.vlgmr.msra.gmra.mrb[8].mxu0 %vm131_vm0, %v5415_v8  ;;  %v5522_v8 = vpack.c.bf16 %v523_v0, %v520_v63  ;;  %v544_v42 = vld [vmem:[#allocation8 + $0x8] sm:$0xff]  ;;  %v5580_v46 = vpack.c.bf16 %v540_v41, %v537_v40  ;;  %v543_v49 = vld [vmem:[#allocation8] sm:$0xff]  ;;  %v546_v50 = vld [vmem:[#allocation8 + $0x18] sm:$0xff] }
  0x52   :  { %4193 = vmatpush3.bf16.msra.mxu1 %v5474_v38  ;;  %4162 = vmatpush1.bf16.msra.mxu0 %v5476_v39  ;;  %6599 = vst [vmem:[#allocation22_spill] sm:$0xff] %v5578_v45  ;;  %v545_v51 = vld [vmem:[#allocation8 + $0x10] sm:$0xff]  ;;  %v548_v52 = vld [vmem:[#allocation8 + $0x28] sm:$0xff]  ;;  %v550_v54 = vld [vmem:[#allocation8 + $0x38] sm:$0xff]  ;;  %v5594_v58 = vpack.c.bf16 %v546_v50, %v543_v49 }
  0x53   :  { %339 = vmatprep.mubr.f32.mxu1 %v6553_v1  ;;  %452 = vmatprep.mubr.f32.mxu0 %v6553_v1  ;;  %6600 = vst [vmem:[#allocation23_spill] sm:$0xff] %v5580_v46  ;;  %v553_v55 = vld [vmem:[#allocation8 + $0x50] sm:$0xff]  ;;  %v5596_v60 = vpack.c.bf16 %v548_v52, %v545_v51  ;;  %v552_v63 = vld [vmem:[#allocation8 + $0x48] sm:$0xff]  ;;  %v551_v0 = vld [vmem:[#allocation8 + $0x40] sm:$0xff] }
  0x54   :  { %4194 = vmatprep.subr.bf16.mxu1 %v6555_v27  ;;  %4164 = vmatprep.subr.bf16.mxu0 %v5478_v44  ;;  %v549_v59 = vld [vmem:[#allocation8 + $0x30] sm:$0xff]  ;;  %v5601_v61 = vpack.c.bf16 %v553_v55, %v550_v54  ;;  %v556_v4 = vld [vmem:[#allocation8 + $0x68] sm:$0xff]  ;;  %v559_v5 = vld [vmem:[#allocation8 + $0x80] sm:$0xff] }
  0x55   :  { %3295 = vmatmul.mubr.msk.f32.gmra.mrb[10].mxu1 %vm131_vm0, %v80_v24  ;;  %3303 = vmatmul.mubr.msk.f32.gmra.mrb[10].mxu0 %vm131_vm0, %v80_v24  ;;  %v536_v24 = vld [vmem:[#allocation6 + $0x148] sm:$0xff]  ;;  %v5608_v6 = vpack.c.bf16 %v552_v63, %v549_v59  ;;  %v555_v7 = vld [vmem:[#allocation8 + $0x60] sm:$0xff]  ;;  %v5614_v10 = vpack.c.bf16 %v559_v5, %v556_v4  ;;  %v558_v13 = vld [vmem:[#allocation8 + $0x78] sm:$0xff] }
  0x56   :  { %4196 = vmatpush3.bf16.msra.mxu1 %v5486_v47  ;;  %4166 = vmatpush1.bf16.msra.mxu0 %v5488_v48  ;;  %v5562_v34 = vpack.c.bf16 %v536_v24, %v533_v23  ;;  %v557_v14 = vld [vmem:[#allocation8 + $0x70] sm:$0xff]  ;;  %v560_v15 = vld [vmem:[#allocation8 + $0x88] sm:$0xff]  ;;  %v562_v17 = vld [vmem:[#allocation8 + $0x98] sm:$0xff] }
  0x57   :  { %345 = vmatprep.mubr.f32.mxu1 %v6553_v1  ;;  %458 = vmatprep.mubr.f32.mxu0 %v6553_v1  ;;  %v561_v23 = vld [vmem:[#allocation8 + $0x90] sm:$0xff]  ;;  %v5624_v24 = vpack.c.bf16 %v560_v15, %v557_v14  ;;  %v568_v36 = vld [vmem:[#allocation8 + $0xc8] sm:$0xff]  ;;  %v571_v37 = vld [vmem:[#allocation8 + $0xe0] sm:$0xff] }
  0x58   :  { %4197 = vmatprep.subr.bf16.mxu1 %v6555_v27  ;;  %4168 = vmatprep.subr.bf16.mxu0 %v5494_v53  ;;  %6596 = vst [vmem:[#allocation19_spill] sm:$0xff] %v5562_v34  ;;  %v567_v41 = vld [vmem:[#allocation8 + $0xc0] sm:$0xff]  ;;  %v570_v49 = vld [vmem:[#allocation8 + $0xd8] sm:$0xff]  ;;  %v569_v50 = vld [vmem:[#allocation8 + $0xd0] sm:$0xff] }
  0x59   :  { %3296 = vmatmul.mubr.msk.f32.gmra.mrb[12].mxu1 %vm131_vm0, %v81_v28  ;;  %3304 = vmatmul.mubr.msk.f32.gmra.mrb[12].mxu0 %vm131_vm0, %v81_v28  ;;  %v531_v28 = vld [vmem:[#allocation6 + $0x120] sm:$0xff]  ;;  %v572_v51 = vld [vmem:[#allocation8 + $0xe8] sm:$0xff]  ;;  %v574_v52 = vld [vmem:[#allocation8 + $0xf8] sm:$0xff]  ;;  %v5641_v55 = vpack.c.bf16 %v570_v49, %v567_v41 }
  0x5a   :  { %4199 = vmatpush3.bf16.msra.mxu1 %v5500_v56  ;;  %4170 = vmatpush1.bf16.msra.mxu0 %v5502_v57  ;;  %v577_v54 = vld [vmem:[#allocation8 + $0x110] sm:$0xff]  ;;  %v5644_v63 = vpack.c.bf16 %v572_v51, %v569_v50  ;;  %v575_v4 = vld [vmem:[#allocation8 + $0x100] sm:$0xff]  ;;  %v578_v5 = vld [vmem:[#allocation8 + $0x118] sm:$0xff] }
  0x5b   :  { %351 = vmatprep.mubr.f32.mxu1 %v6553_v1  ;;  %464 = vmatprep.mubr.f32.mxu0 %v6553_v1  ;;  %v573_v59 = vld [vmem:[#allocation8 + $0xf0] sm:$0xff]  ;;  %v579_v15 = vld [vmem:[#allocation8 + $0x120] sm:$0xff]  ;;  %v588_v51 = vld [vmem:[#allocation8 + $0x168] sm:$0xff] }
  0x5c   :  { %4200 = vmatprep.subr.bf16.mxu1 %v6555_v27  ;;  %4172 = vmatprep.subr.bf16.mxu0 %v5508_v62  ;;  %v585_v41 = vld [vmem:[#allocation8 + $0x150] sm:$0xff] }
  0x5d   :  { %3297 = vmatmul.mubr.msk.f32.gmra.mrb[14].mxu1 %vm131_vm0, %v5461_v30  ;;  %3305 = vmatmul.mubr.msk.f32.gmra.mrb[14].mxu0 %vm131_vm0, %v5461_v30  ;;  %v534_v30 = vld [vmem:[#allocation6 + $0x138] sm:$0xff] }
  0x5e   :  { %4202 = vmatpush3.bf16.msra.mxu1 %v5514_v2  ;;  %4174 = vmatpush1.bf16.msra.mxu0 %v5516_v3  ;;  %v5564_v35 = vpack.c.bf16 %v534_v30, %v531_v28  ;;  %v564_v30 = vld [vmem:[#allocation8 + $0xa8] sm:$0xff] }
  0x5f   :  { %357 = vmatprep.mubr.f32.mxu1 %v6553_v1  ;;  %470 = vmatprep.mubr.f32.mxu0 %v6553_v1  ;;  %v5631_v40 = vpack.c.bf16 %v564_v30, %v561_v23  ;;  %v582_v23 = vld [vmem:[#allocation8 + $0x138] sm:$0xff]  ;;  %v581_v30 = vld [vmem:[#allocation8 + $0x130] sm:$0xff] }
  0x60   :  { %4203 = vmatprep.subr.bf16.mxu1 %v6555_v27  ;;  %4176 = vmatprep.subr.bf16.mxu0 %v5522_v8  ;;  %6597 = vst [vmem:[#allocation20_spill] sm:$0xff] %v5564_v35 }
  0x61   :  { %3298 = vmatmul.mubr.msk.f32.gmra.mrb[16].mxu1 %vm131_vm0, %v5420_v16  ;;  %3306 = vmatmul.mubr.msk.f32.gmra.mrb[16].mxu0 %vm131_vm0, %v5420_v16  ;;  %v5554_v16 = vpack.c.bf16 %v535_v20, %v532_v19  ;;  %v565_v19 = vld [vmem:[#allocation8 + $0xb0] sm:$0xff]  ;;  %v5621_v20 = vpack.c.bf16 %v558_v13, %v555_v7  ;;  %v580_v7 = vld [vmem:[#allocation8 + $0x128] sm:$0xff]  ;;  %v583_v13 = vld [vmem:[#allocation8 + $0x140] sm:$0xff] }
  0x62   :  { %4205 = vmatpush3.bf16.msra.mxu1 %v5530_v11  ;;  %4178 = vmatpush1.bf16.msra.mxu0 %v5532_v12  ;;  %v5627_v28 = vpack.c.bf16 %v565_v19, %v562_v17  ;;  %v5654_v17 = vpack.c.bf16 %v578_v5, %v575_v4  ;;  %v5657_v19 = vpack.c.bf16 %v583_v13, %v580_v7  ;;  %v6552_v7 = vlaneseq }
  0x63   :  { %363 = vmatprep.mubr.f32.mxu1 %v6553_v1  ;;  %476 = vmatprep.mubr.f32.mxu0 %v6553_v1  ;;  %6595 = vst [vmem:[#allocation18_spill] sm:$0xff] %v5554_v16 }
  0x64   :  { %4206 = vmatprep.subr.bf16.mxu1 %v6555_v27  ;;  %4180 = vmatprep.subr.bf16.mxu0 %v5538_v18 }
  0x65   :  { %3299 = vmatmul.mubr.msk.f32.gmra.mrb[18].mxu1 %vm131_vm0, %v5432_v25  ;;  %3307 = vmatmul.mubr.msk.f32.gmra.mrb[18].mxu0 %vm131_vm0, %v5432_v25  ;;  %v5570_v25 = vpack.c.bf16 %v541_v33, %v538_v32  ;;  %v563_v32 = vld [vmem:[#allocation8 + $0xa0] sm:$0xff]  ;;  %v566_v33 = vld [vmem:[#allocation8 + $0xb8] sm:$0xff] }
  0x66   :  { %4208 = vmatpush3.bf16.msra.mxu1 %v5546_v21  ;;  %4182 = vmatpush1.bf16.msra.mxu0 %v5548_v22 }
  0x67   :  { %369 = vmatprep.mubr.f32.mxu1 %v6553_v1  ;;  %482 = vmatprep.mubr.f32.mxu0 %v6553_v1  ;;  %6598 = vst [vmem:[#allocation21_spill] sm:$0xff] %v5570_v25 }
  0x68   :  { %4209 = vmatprep.subr.bf16.mxu1 %v6555_v27  ;;  %4184 = vmatprep.subr.bf16.mxu0 %v5554_v16 }
  0x69   :  { %3300 = vmatmul.mubr.msk.f32.gmra.mrb[20].mxu1 %vm131_vm0, %v5451_v29  ;;  %3308 = vmatmul.mubr.msk.f32.gmra.mrb[20].mxu0 %vm131_vm0, %v5451_v29  ;;  %v5586_v29 = vpack.c.bf16 %v547_v43, %v544_v42  ;;  %v5634_v42 = vpack.c.bf16 %v566_v33, %v563_v32  ;;  %v5637_v43 = vpack.c.bf16 %v571_v37, %v568_v36  ;;  %v584_v32 = vld [vmem:[#allocation8 + $0x148] sm:$0xff]  ;;  %v586_v33 = vld [vmem:[#allocation8 + $0x158] sm:$0xff]  ;;  %v589_v36 = vld [vmem:[#allocation8 + $0x170] sm:$0xff] }
  0x6a   :  { %4211 = vmatpush3.bf16.msra.mxu1 %v5562_v34  ;;  %4186 = vmatpush1.bf16.msra.mxu0 %v5564_v35  ;;  %v5661_v37 = vpack.c.bf16 %v582_v23, %v579_v15  ;;  %v5664_v49 = vpack.c.bf16 %v584_v32, %v581_v30  ;;  %v5667_v50 = vpack.c.bf16 %v589_v36, %v586_v33  ;;  %v5728_v23 = vshrl.u32 %v6552_v7, 7 }
  0x6b   :  { %375 = vmatprep.mubr.f32.mxu1 %v6553_v1  ;;  %488 = vmatprep.mubr.f32.mxu0 %v6553_v1  ;;  %6601 = vst [vmem:[#allocation24_spill] sm:$0xff] %v5586_v29 }
  0x6c   :  { %4212 = vmatprep.subr.bf16.mxu1 %v6555_v27  ;;  %4188 = vmatprep.subr.bf16.mxu0 %v5570_v25  ;;  %v119_v33 = vsub.s32 4, %v5728_v23  ;;  %v115_v36 = vsub.s32 3, %v5728_v23 }
  0x6d   :  { %3301 = vmatmul.mubr.msk.f32.gmra.mrb[22].mxu1 %vm131_vm0, %v5466_v31  ;;  %3309 = vmatmul.mubr.msk.f32.gmra.mrb[22].mxu0 %vm131_vm0, %v5466_v31  ;;  %v554_v31 = vld [vmem:[#allocation8 + $0x58] sm:$0xff] }
  0x6e   :  { %4214 = vmatpush3.bf16.msra.mxu1 %v5578_v45  ;;  %4190 = vmatpush1.bf16.msra.mxu0 %v5580_v46  ;;  %v5611_v9 = vpack.c.bf16 %v554_v31, %v551_v0  ;;  %v5647_v0 = vpack.c.bf16 %v577_v54, %v574_v52  ;;  %v576_v31 = vld [vmem:[#allocation8 + $0x108] sm:$0xff]  ;;  %v587_v52 = vld [vmem:[#allocation8 + $0x160] sm:$0xff]  ;;  %v590_v54 = vld [vmem:[#allocation8 + $0x178] sm:$0xff] }
  0x6f   :  { %685 = vmatprep.mubr.f32.mxu0 %v6553_v1  ;;  %3619 = vmatprep.mubr.msk.f32.mxu1 %vm5307_vm1, %v6553_v1  ;;  %v5651_v14 = vpack.c.bf16 %v576_v31, %v573_v59  ;;  %v5671_v59 = vpack.c.bf16 %v588_v51, %v585_v41  ;;  %v5674_v31 = vpack.c.bf16 %v590_v54, %v587_v52  ;;  %v123_v41 = vsub.s32 5, %v5728_v23  ;;  %v5740_v51 = vld [vmem:[%s6543_s2] sm:$0x3f] }
  0x70   :  { %4216 = vmatprep.subr.bf16.mxu1 %v5586_v29  ;;  %4247 = vmatprep.subr.bf16.mxu0 %v6555_v27  ;;  %v5747_v7 = vrot.slane %v5740_v51, %v119_v33 }
  0x71   :  { %686 = vmatmul.mubr.f32.vlgmr.msra.gmra.mrb[0].mxu0 %v6553_v1  ;;  %3620 = vmatmul.mubr.f32.vlgmr.msra.gmra.mrb[24].mxu1 %v6553_v1 }
  0x72   :  { %4218 = vmatpush1.bf16.msra.mxu1 %v5594_v58  ;;  %4249 = vmatpush3.bf16.msra.mxu0 %v5596_v60 }
  0x73   :  { %4220 = vmatprep.subr.bf16.mxu1 %v5601_v61  ;;  %4250 = vmatprep.subr.bf16.mxu0 %v6555_v27 }
  0x74   :  { %844 = vmatprep.mubr.f32.mxu1 %v6553_v1  ;;  %3654 = vmatprep.mubr.msk.f32.mxu0 %vm5307_vm1, %v6553_v1 }
  0x76   :  { %4222 = vmatpush1.bf16.msra.mxu1 %v5608_v6  ;;  %4252 = vmatpush3.bf16.msra.mxu0 %v5611_v9 }
  0x77   :  { %4224 = vmatprep.subr.bf16.mxu1 %v5614_v10  ;;  %4253 = vmatprep.subr.bf16.mxu0 %v6555_v27 }
  0x7a   :  { %4226 = vmatpush1.bf16.msra.mxu1 %v5621_v20  ;;  %4255 = vmatpush3.bf16.msra.mxu0 %v5624_v24 }
  0x7b   :  { %4228 = vmatprep.subr.bf16.mxu1 %v5627_v28  ;;  %4256 = vmatprep.subr.bf16.mxu0 %v6555_v27 }
  0x7e   :  { %4230 = vmatpush1.bf16.msra.mxu1 %v5631_v40  ;;  %4258 = vmatpush3.bf16.msra.mxu0 %v5634_v42 }
  0x7f   :  { %4232 = vmatprep.subr.bf16.mxu1 %v5637_v43  ;;  %4259 = vmatprep.subr.bf16.mxu0 %v6555_v27 }
  0x82   :  { %4234 = vmatpush1.bf16.msra.mxu1 %v5641_v55  ;;  %4261 = vmatpush3.bf16.msra.mxu0 %v5644_v63 }
  0x83   :  { %4236 = vmatprep.subr.bf16.mxu1 %v5647_v0  ;;  %4262 = vmatprep.subr.bf16.mxu0 %v6555_v27 }
  0x86   :  { %4238 = vmatpush1.bf16.msra.mxu1 %v5651_v14  ;;  %4264 = vmatpush3.bf16.msra.mxu0 %v5654_v17 }
  0x87   :  { %4240 = vmatprep.subr.bf16.mxu1 %v5657_v19  ;;  %4265 = vmatprep.subr.bf16.mxu0 %v6555_v27 }
  0x8a   :  { %4242 = vmatpush1.bf16.msra.mxu1 %v5661_v37  ;;  %4267 = vmatpush3.bf16.msra.mxu0 %v5664_v49 }
  0x8b   :  { %4244 = vmatprep.subr.bf16.mxu1 %v5667_v50  ;;  %4268 = vmatprep.subr.bf16.mxu0 %v6555_v27 }
  0x8e   :  { %4246 = vmatpush1.bf16.msra.mxu1 %v5671_v59  ;;  %4270 = vmatpush3.bf16.msra.mxu0 %v5674_v31 }
  0x8f   :  { %4272 = vmatprep.subr.bf16.mxu0 %v5434_v26  ;;  %4303 = vmatprep.subr.bf16.mxu1 %v6555_v27 }
  0x91   :  { %845 = vmatmul.mubr.f32.vlgmr.msra.gmra.mrb[26].mxu1 %v6553_v1  ;;  %3655 = vmatmul.mubr.f32.vlgmr.msra.gmra.mrb[24].mxu0 %v6553_v1 }
  0x92   :  { %4274 = vmatpush1.bf16.msra.mxu0 %v5476_v39  ;;  %4305 = vmatpush3.bf16.msra.mxu1 %v5474_v38 }
  0x93   :  { %4276 = vmatprep.subr.bf16.mxu0 %v5478_v44  ;;  %4306 = vmatprep.subr.bf16.mxu1 %v6555_v27 }
  0x94   :  { %1015 = vmatprep.mubr.f32.mxu0 %v6553_v1  ;;  %3689 = vmatprep.mubr.msk.f32.mxu1 %vm5307_vm1, %v6553_v1  ;;  %v5750_v1 = vrot.slane %v5740_v51, %v115_v36 }
  0x96   :  { %4278 = vmatpush1.bf16.msra.mxu0 %v5488_v48  ;;  %4308 = vmatpush3.bf16.msra.mxu1 %v5486_v47 }
  0x97   :  { %4280 = vmatprep.subr.bf16.mxu0 %v5494_v53  ;;  %4309 = vmatprep.subr.bf16.mxu1 %v6555_v27 }
  0x9a   :  { %4282 = vmatpush1.bf16.msra.mxu0 %v5502_v57  ;;  %4311 = vmatpush3.bf16.msra.mxu1 %v5500_v56 }
  0x9b   :  { %4284 = vmatprep.subr.bf16.mxu0 %v5508_v62  ;;  %4312 = vmatprep.subr.bf16.mxu1 %v6555_v27 }
  0x9e   :  { %4286 = vmatpush1.bf16.msra.mxu0 %v5516_v3  ;;  %4314 = vmatpush3.bf16.msra.mxu1 %v5514_v2 }
  0x9f   :  { %4288 = vmatprep.subr.bf16.mxu0 %v5522_v8  ;;  %4315 = vmatprep.subr.bf16.mxu1 %v6555_v27 }
  0xa2   :  { %4290 = vmatpush1.bf16.msra.mxu0 %v5532_v12  ;;  %4317 = vmatpush3.bf16.msra.mxu1 %v5530_v11 }
  0xa3   :  { %4292 = vmatprep.subr.bf16.mxu0 %v5538_v18  ;;  %4318 = vmatprep.subr.bf16.mxu1 %v6555_v27 }
  0xa6   :  { %4294 = vmatpush1.bf16.msra.mxu0 %v5548_v22  ;;  %4320 = vmatpush3.bf16.msra.mxu1 %v5546_v21 }
  0xa7   :  { %4296 = vmatprep.subr.bf16.mxu0 %v5554_v16  ;;  %4321 = vmatprep.subr.bf16.mxu1 %v6555_v27 }
  0xaa   :  { %4298 = vmatpush1.bf16.msra.mxu0 %v5564_v35  ;;  %4323 = vmatpush3.bf16.msra.mxu1 %v5562_v34 }
  0xab   :  { %4300 = vmatprep.subr.bf16.mxu0 %v5570_v25  ;;  %4324 = vmatprep.subr.bf16.mxu1 %v6555_v27 }
  0xae   :  { %4302 = vmatpush1.bf16.msra.mxu0 %v5580_v46  ;;  %4326 = vmatpush3.bf16.msra.mxu1 %v5578_v45 }
  0xaf   :  { %4328 = vmatprep.subr.bf16.mxu1 %v5586_v29  ;;  %4359 = vmatprep.subr.bf16.mxu0 %v6555_v27  ;;  %v5753_v27 = vrot.slane %v5740_v51, %v123_v41 }
 0x114   :  { %v5719_v4 = vpop.f32.mrb[0].mxu1 }
 0x115   :  { %6602 = vst [vmem:[#allocation25_spill] sm:$0xff] %v5719_v4  ;;  %v5721_v5 = vpop.f32.mrb[1].mxu1 }
 0x116   :  { %6603 = vst [vmem:[#allocation26_spill] sm:$0xff] %v5721_v5 }
 0x118   :  { %v5723_v13 = vpop.f32.mrb[2].mxu1 }
 0x119   :  { %6604 = vst [vmem:[#allocation27_spill] sm:$0xff] %v5723_v13  ;;  %v5725_v15 = vpop.f32.mrb[3].mxu1 }
 0x11a   :  { %6605 = vst [vmem:[#allocation28_spill] sm:$0xff] %v5725_v15 }
 0x11c   :  { %v5730_v30 = vpop.f32.mrb[4].mxu1 }
 0x11d   :  { %6606 = vst [vmem:[#allocation29_spill] sm:$0xff] %v5730_v30  ;;  %v5732_v32 = vpop.f32.mrb[5].mxu1 }
 0x11e   :  { %6607 = vst [vmem:[#allocation30_spill] sm:$0xff] %v5732_v32  ;;  %v111_v32 = vsub.s32 2, %v5728_v23 }
 0x120   :  { %v5742_v52 = vpop.f32.mrb[6].mxu1  ;;  %v5768_v36 = vrot.slane %v5740_v51, %v111_v32 }
 0x121   :  { %6608 = vst [vmem:[#allocation31_spill] sm:$0xff] %v5742_v52  ;;  %v5744_v54 = vpop.f32.mrb[7].mxu1 }
 0x122   :  { %6609 = vst [vmem:[#allocation32_spill] sm:$0xff] %v5744_v54 }
 0x124   :  { %v5756_v30 = vpop.f32.mrb[8].mxu1  ;;  %v448_v15 = vpop.f32.mrb[8].mxu0 }
 0x125   :  { %v5759_v13 = vadd.f32 %v448_v15, %v5747_v7  ;;  %v337_v52 = vpop.f32.mrb[9].mxu1  ;;  %v450_v5 = vpop.f32.mrb[9].mxu0 }
 0x126   :  { %v5762_v54 = vadd.f32 %v337_v52, %v5750_v1  ;;  %v5765_v33 = vadd.f32 %v450_v5, %v5753_v27 }
 0x127   :  { %6610 = vst [vmem:[#allocation33_spill] sm:$0xff] %v5759_v13 }
 0x128   :  { %6611 = vst [vmem:[#allocation34_spill] sm:$0xff] %v5762_v54  ;;  %6612 = vst [vmem:[#allocation35_spill] sm:$0xff] %v5765_v33  ;;  %v341_v41 = vpop.f32.mrb[10].mxu1  ;;  %v454_v4 = vpop.f32.mrb[10].mxu0 }
 0x129   :  { %v5771_v29 = vadd.f32 %v341_v41, %v5768_v36  ;;  %v5774_v45 = vadd.f32 %v454_v4, %v5747_v7  ;;  %v343_v15 = vpop.f32.mrb[11].mxu1  ;;  %v456_v13 = vpop.f32.mrb[11].mxu0 }
 0x12a   :  { %v5777_v46 = vadd.f32 %v343_v15, %v5750_v1  ;;  %v5780_v52 = vadd.f32 %v456_v13, %v5753_v27 }
 0x12b   :  { %6613 = vst [vmem:[#allocation36_spill] sm:$0xff] %v5771_v29  ;;  %6614 = vst [vmem:[#allocation37_spill] sm:$0xff] %v5774_v45 }
 0x12c   :  { %6615 = vst [vmem:[#allocation38_spill] sm:$0xff] %v5777_v46  ;;  %6616 = vst [vmem:[#allocation39_spill] sm:$0xff] %v5780_v52  ;;  %v347_v5 = vpop.f32.mrb[12].mxu1  ;;  %v460_v33 = vpop.f32.mrb[12].mxu0 }
 0x12d   :  { %v5783_v32 = vadd.f32 %v347_v5, %v5768_v36  ;;  %v5786_v54 = vadd.f32 %v460_v33, %v5747_v7  ;;  %v349_v41 = vpop.f32.mrb[13].mxu1  ;;  %v462_v29 = vpop.f32.mrb[13].mxu0 }
 0x12e   :  { %v5789_v4 = vadd.f32 %v349_v41, %v5750_v1  ;;  %v5792_v45 = vadd.f32 %v462_v29, %v5753_v27 }
 0x12f   :  { %6617 = vst [vmem:[#allocation40_spill] sm:$0xff] %v5783_v32  ;;  %6618 = vst [vmem:[#allocation41_spill] sm:$0xff] %v5786_v54 }
 0x130   :  { %6619 = vst [vmem:[#allocation42_spill] sm:$0xff] %v5789_v4  ;;  %6620 = vst [vmem:[#allocation43_spill] sm:$0xff] %v5792_v45  ;;  %v353_v15 = vpop.f32.mrb[14].mxu1  ;;  %v466_v46 = vpop.f32.mrb[14].mxu0 }
 0x131   :  { %v5795_v13 = vadd.f32 %v353_v15, %v5768_v36  ;;  %v5798_v52 = vadd.f32 %v466_v46, %v5747_v7  ;;  %v355_v5 = vpop.f32.mrb[15].mxu1  ;;  %v468_v32 = vpop.f32.mrb[15].mxu0 }
 0x132   :  { %v5801_v33 = vadd.f32 %v355_v5, %v5750_v1  ;;  %v5804_v54 = vadd.f32 %v468_v32, %v5753_v27 }
 0x133   :  { %6621 = vst [vmem:[#allocation44_spill] sm:$0xff] %v5795_v13  ;;  %6622 = vst [vmem:[#allocation45_spill] sm:$0xff] %v5798_v52 }
 0x134   :  { %6623 = vst [vmem:[#allocation46_spill] sm:$0xff] %v5801_v33  ;;  %6624 = vst [vmem:[#allocation47_spill] sm:$0xff] %v5804_v54  ;;  %v359_v41 = vpop.f32.mrb[16].mxu1  ;;  %v472_v4 = vpop.f32.mrb[16].mxu0 }
 0x135   :  { %v5807_v29 = vadd.f32 %v359_v41, %v5768_v36  ;;  %v5810_v45 = vadd.f32 %v472_v4, %v5747_v7  ;;  %v361_v15 = vpop.f32.mrb[17].mxu1  ;;  %v474_v13 = vpop.f32.mrb[17].mxu0 }
 0x136   :  { %v5813_v46 = vadd.f32 %v361_v15, %v5750_v1  ;;  %v5816_v52 = vadd.f32 %v474_v13, %v5753_v27 }
 0x137   :  { %6625 = vst [vmem:[#allocation48_spill] sm:$0xff] %v5807_v29  ;;  %6626 = vst [vmem:[#allocation49_spill] sm:$0xff] %v5810_v45 }
 0x138   :  { %6627 = vst [vmem:[#allocation50_spill] sm:$0xff] %v5813_v46  ;;  %6628 = vst [vmem:[#allocation51_spill] sm:$0xff] %v5816_v52  ;;  %v365_v5 = vpop.f32.mrb[18].mxu1  ;;  %v478_v33 = vpop.f32.mrb[18].mxu0 }
 0x139   :  { %v5819_v32 = vadd.f32 %v365_v5, %v5768_v36  ;;  %v5822_v54 = vadd.f32 %v478_v33, %v5747_v7  ;;  %v367_v41 = vpop.f32.mrb[19].mxu1  ;;  %v480_v29 = vpop.f32.mrb[19].mxu0 }
 0x13a   :  { %v5825_v4 = vadd.f32 %v367_v41, %v5750_v1  ;;  %v5828_v45 = vadd.f32 %v480_v29, %v5753_v27  ;;  %v103_v41 = vsub.s32 0, %v5728_v23 }
 0x13b   :  { %6629 = vst [vmem:[#allocation52_spill] sm:$0xff] %v5819_v32  ;;  %6630 = vst [vmem:[#allocation53_spill] sm:$0xff] %v5822_v54 }
 0x13c   :  { %6631 = vst [vmem:[#allocation54_spill] sm:$0xff] %v5825_v4  ;;  %6632 = vst [vmem:[#allocation55_spill] sm:$0xff] %v5828_v45  ;;  %v371_v15 = vpop.f32.mrb[20].mxu1  ;;  %v484_v46 = vpop.f32.mrb[20].mxu0 }
 0x13d   :  { %v5831_v13 = vadd.f32 %v371_v15, %v5768_v36  ;;  %v5834_v52 = vadd.f32 %v484_v46, %v5747_v7  ;;  %v373_v5 = vpop.f32.mrb[21].mxu1  ;;  %v486_v32 = vpop.f32.mrb[21].mxu0  ;;  %v107_v46 = vsub.s32 1, %v5728_v23  ;;  %v5860_v23 = vld [vmem:[%s6546_s5] ss:$0 sm:$0xff] }
 0x13e   :  { %v5837_v33 = vadd.f32 %v373_v5, %v5750_v1  ;;  %v5840_v54 = vadd.f32 %v486_v32, %v5753_v27  ;;  %6640 = vst [vmem:[#allocation63_spill] sm:$0xff] %v5860_v23 }
 0x13f   :  { %6633 = vst [vmem:[#allocation56_spill] sm:$0xff] %v5831_v13  ;;  %6634 = vst [vmem:[#allocation57_spill] sm:$0xff] %v5834_v52  ;;  %v5850_v52 = vrot.slane %v5740_v51, %v103_v41  ;;  %v5854_v34 = vrot.slane %v5740_v51, %v107_v46 }
 0x140   :  { %6635 = vst [vmem:[#allocation58_spill] sm:$0xff] %v5837_v33  ;;  %6636 = vst [vmem:[#allocation59_spill] sm:$0xff] %v5840_v54  ;;  %v377_v29 = vpop.f32.mrb[22].mxu1  ;;  %v490_v45 = vpop.f32.mrb[22].mxu0 }
 0x141   :  { %v5844_v4 = vadd.f32 %v377_v29, %v5768_v36  ;;  %v379_v15 = vpop.f32.mrb[23].mxu1  ;;  %v5846_v13 = vpop.f32.mrb[23].mxu0  ;;  %6638 = vst [vmem:[#allocation61_spill] sm:$0xff] %v5850_v52  ;;  %6639 = vst [vmem:[#allocation62_spill] sm:$0xff] %v5854_v34 }
 0x143   :  { %6637 = vst [vmem:[#allocation60_spill] sm:$0xff] %v5844_v4 }
 0x144   :  { %v687_v5 = vpop.f32.mrb[0].mxu0  ;;  %v758_v33 = vpop.f32.mrb[24].mxu1 }
 0x145   :  { %v5057_v32 = vadd.f32 %v687_v5, %v5850_v52  ;;  %v689_v54 = vpop.f32.mrb[1].mxu0  ;;  %v3621_v25 = vpop.f32.mrb[25].mxu1  ;;  %v772_v5 = vadd.f32 %v5860_v23, %v758_v33 }
 0x146   :  { %v5058_v29 = vadd.f32 %v689_v54, %v5854_v34  ;;  %v336_v25 = vadd.f32 %v5756_v30, %v5768_v36  ;;  %v5870_v36 = vld [vmem:[%s6548_s7] ss:$0 sm:$0xff] }
 0x147   :  { %v763_v35 = vmul.f32 0.5, %v5057_v32 }
 0x148   :  { %v768_v4 = vmul.f32 0.5, %v5058_v29  ;;  %v491_v29 = vadd.f32 %v490_v45, %v5747_v7  ;;  %v6642_v45 = vmov 0.0  }
 0x149   :  { %5102 = vtanh.f32 %v763_v35 }
 0x14a   :  { %5104 = vtanh.f32 %v768_v4  ;;  %v380_v4 = vadd.f32 %v379_v15, %v5750_v1 }
 0x153   :  { %v5103_v16 = vpop.eup %5102 }
 0x154   :  { %v765_v41 = vmul.f32 0.5, %v5103_v16  ;;  %v5105_v46 = vpop.eup %5104 }
 0x155   :  { %v770_v35 = vmul.f32 0.5, %v5105_v46 }
 0x156   :  { %v766_v21 = vadd.f32 0.5, %v765_v41 }
 0x157   :  { %v771_v54 = vadd.f32 0.5, %v770_v35 }
 0x158   :  { %v773_v51 = vmul.f32 %v772_v5, %v766_v21 }
 0x159   :  { %v776_v22 = vsub.f32 1.0, %v771_v54  ;;  %v778_v30 = vmul.f32 0.0, %v771_v54 }
 0x15a   :  { %v774_v32 = vadd.f32 %v773_v51, %v336_v25  ;;  %v493_v25 = vadd.f32 %v5846_v13, %v5753_v27 }
 0x15c   :  { %5106 = vtanh.f32 %v774_v32 }
 0x164   :  { %v846_v34 = vpop.f32.mrb[26].mxu1  ;;  %v917_v52 = vpop.f32.mrb[24].mxu0 }
 0x165   :  { %v921_v16 = vadd.f32 %v846_v34, %v380_v4  ;;  %v848_v41 = vpop.f32.mrb[27].mxu1  ;;  %v3656_v18 = vpop.f32.mrb[25].mxu0 }
 0x166   :  { %v5107_v33 = vpop.eup %5106  ;;  %v926_v23 = vadd.f32 %v848_v41, %v491_v29  ;;  %v5922_v29 = vld [vmem:[%s6549_s8] ss:$0 sm:$0xff] }
 0x167   :  { %v777_v11 = vmul.f32 %v5107_v33, %v776_v22  ;;  %v922_v21 = vmul.f32 0.5, %v921_v16  ;;  %v6641_v22 = vmov 0.0|0.0   ;;  %v6643_v33 = vld [vmem:[#allocation13_spill] sm:$0xff] }
 0x168   :  { %v927_v34 = vmul.f32 0.5, %v926_v23 }
 0x169   :  { %5108 = vtanh.f32 %v922_v21  ;;  %v5872_v1 = vadd.f32 %v778_v30, %v777_v11  ;;  %v5892_v11 = vld [vmem:[%s6547_s6] ss:$0 sm:$0xff]  ;;  %v6645_v21 = vld [vmem:[#allocation17_spill] sm:$0xff] }
 0x16a   :  { %5110 = vtanh.f32 %v927_v34  ;;  %v931_v23 = vadd.f32 %v5892_v11, %v917_v52  ;;  %v6644_v30 = vld [vmem:[#allocation15_spill] sm:$0xff]  ;;  %v6647_v34 = vld [vmem:[#allocation18_spill] sm:$0xff] }
 0x16b   :  { %1016 = vmatmul.mubr.f32.vlgmr.msra.gmra.mrb[2].mxu0 %v5872_v1  ;;  %3690 = vmatmul.mubr.f32.vlgmr.msra.gmra.mrb[28].mxu1 %v5872_v1  ;;  %v939_v18 = vmul.f32 %v5870_v36, %v5872_v1 }
 0x16c   :  { %4330 = vmatpush1.bf16.msra.mxu1 %v5594_v58  ;;  %4361 = vmatpush3.bf16.msra.mxu0 %v5596_v60 }
 0x16d   :  { %940 = vadd.xlane.f32.xlu0 %v939_v18  ;;  %4332 = vmatprep.subr.bf16.mxu1 %v5601_v61  ;;  %v6646_v18 = vld [vmem:[#allocation16_spill] sm:$0xff] }
 0x16e   :  { %4362 = vmatprep.subr.bf16.mxu0 %v6641_v22  ;;  %1174 = vmatprep.mubr.f32.mxu1 %v6642_v45 }
 0x16f   :  { %3724 = vmatprep.mubr.msk.f32.mxu0 %vm5307_vm1, %v6642_v45 }
 0x170   :  { %4334 = vmatpush1.bf16.msra.mxu1 %v5608_v6  ;;  %4364 = vmatpush3.bf16.msra.mxu0 %v5611_v9 }
 0x171   :  { %4336 = vmatprep.subr.bf16.mxu1 %v5614_v10  ;;  %4365 = vmatprep.subr.bf16.mxu0 %v6641_v22 }
 0x173   :  { %v5109_v7 = vpop.eup %5108 }
 0x174   :  { %v924_v15 = vmul.f32 0.5, %v5109_v7  ;;  %4338 = vmatpush1.bf16.msra.mxu1 %v5621_v20  ;;  %4367 = vmatpush3.bf16.msra.mxu0 %v5624_v24  ;;  %v5111_v46 = vpop.eup %5110  ;;  %v6648_v7 = vld [vmem:[#allocation20_spill] sm:$0xff] }
 0x175   :  { %4340 = vmatprep.subr.bf16.mxu1 %v5627_v28  ;;  %4368 = vmatprep.subr.bf16.mxu0 %v6641_v22  ;;  %v929_v52 = vmul.f32 0.5, %v5111_v46 }
 0x176   :  { %v925_v5 = vadd.f32 0.5, %v924_v15  ;;  %v6649_v15 = vld [vmem:[#allocation19_spill] sm:$0xff] }
 0x177   :  { %v930_v27 = vadd.f32 0.5, %v929_v52  ;;  %v6654_v52 = vld [vmem:[#allocation61_spill] sm:$0xff] }
 0x178   :  { %v932_v51 = vmul.f32 %v931_v23, %v925_v5  ;;  %4342 = vmatpush1.bf16.msra.mxu1 %v5631_v40  ;;  %4370 = vmatpush3.bf16.msra.mxu0 %v5634_v42  ;;  %v6650_v23 = vld [vmem:[#allocation21_spill] sm:$0xff]  ;;  %v6651_v5 = vld [vmem:[#allocation23_spill] sm:$0xff] }
 0x179   :  { %4344 = vmatprep.subr.bf16.mxu1 %v5637_v43  ;;  %4371 = vmatprep.subr.bf16.mxu0 %v6641_v22  ;;  %v935_v13 = vsub.f32 1.0, %v930_v27  ;;  %v937_v54 = vmul.f32 0.0, %v930_v27 }
 0x17a   :  { %v933_v32 = vadd.f32 %v932_v51, %v493_v25  ;;  %v6652_v25 = vld [vmem:[#allocation22_spill] sm:$0xff]  ;;  %v6653_v51 = vld [vmem:[#allocation24_spill] sm:$0xff] }
 0x17c   :  { %5112 = vtanh.f32 %v933_v32  ;;  %4346 = vmatpush1.bf16.msra.mxu1 %v5641_v55  ;;  %4373 = vmatpush3.bf16.msra.mxu0 %v5644_v63 }
 0x17d   :  { %4348 = vmatprep.subr.bf16.mxu1 %v5647_v0  ;;  %4374 = vmatprep.subr.bf16.mxu0 %v6641_v22 }
 0x180   :  { %4350 = vmatpush1.bf16.msra.mxu1 %v5651_v14  ;;  %4376 = vmatpush3.bf16.msra.mxu0 %v5654_v17 }
 0x181   :  { %4352 = vmatprep.subr.bf16.mxu1 %v5657_v19  ;;  %4377 = vmatprep.subr.bf16.mxu0 %v6641_v22 }
 0x184   :  { %4354 = vmatpush1.bf16.msra.mxu1 %v5661_v37  ;;  %4379 = vmatpush3.bf16.msra.mxu0 %v5664_v49 }
 0x185   :  { %4356 = vmatprep.subr.bf16.mxu1 %v5667_v50  ;;  %4380 = vmatprep.subr.bf16.mxu0 %v6641_v22 }
 0x186   :  { %v5113_v35 = vpop.eup %5112 }
 0x187   :  { %v936_v4 = vmul.f32 %v5113_v35, %v935_v13 }
 0x188   :  { %4358 = vmatpush1.bf16.msra.mxu1 %v5671_v59  ;;  %4382 = vmatpush3.bf16.msra.mxu0 %v5674_v31 }
 0x189   :  { %v5924_v16 = vadd.f32 %v937_v54, %v936_v4  ;;  %4384 = vmatprep.subr.bf16.mxu0 %v5434_v26  ;;  %4415 = vmatprep.subr.bf16.mxu1 %v6641_v22  ;;  %v6655_v4 = vld [vmem:[#allocation62_spill] sm:$0xff] }
 0x18b   :  { %1175 = vmatmul.mubr.f32.vlgmr.msra.gmra.mrb[30].mxu1 %v5924_v16  ;;  %3725 = vmatmul.mubr.f32.vlgmr.msra.gmra.mrb[26].mxu0 %v5924_v16  ;;  %v942_v41 = vmul.f32 %v5922_v29, %v5924_v16 }
 0x18c   :  { %4386 = vmatpush1.bf16.msra.mxu0 %v5476_v39  ;;  %4417 = vmatpush3.bf16.msra.mxu1 %v5474_v38 }
 0x18d   :  { %943 = vadd.xlane.f32.xlu0 %v942_v41  ;;  %4388 = vmatprep.subr.bf16.mxu0 %v5478_v44 }
 0x18e   :  { %4418 = vmatprep.subr.bf16.mxu1 %v6641_v22  ;;  %1345 = vmatprep.mubr.f32.mxu0 %v6642_v45 }
 0x18f   :  { %3759 = vmatprep.mubr.msk.f32.mxu1 %vm5307_vm1, %v6642_v45 }
 0x190   :  { %4390 = vmatpush1.bf16.msra.mxu0 %v5488_v48  ;;  %4420 = vmatpush3.bf16.msra.mxu1 %v5486_v47 }
 0x191   :  { %4392 = vmatprep.subr.bf16.mxu0 %v5494_v53  ;;  %4421 = vmatprep.subr.bf16.mxu1 %v6641_v22 }
 0x194   :  { %4394 = vmatpush1.bf16.msra.mxu0 %v5502_v57  ;;  %4423 = vmatpush3.bf16.msra.mxu1 %v5500_v56 }
 0x195   :  { %4396 = vmatprep.subr.bf16.mxu0 %v5508_v62  ;;  %4424 = vmatprep.subr.bf16.mxu1 %v6641_v22 }
 0x198   :  { %4398 = vmatpush1.bf16.msra.mxu0 %v5516_v3  ;;  %4426 = vmatpush3.bf16.msra.mxu1 %v5514_v2 }
 0x199   :  { %4400 = vmatprep.subr.bf16.mxu0 %v5522_v8  ;;  %4427 = vmatprep.subr.bf16.mxu1 %v6641_v22 }
 0x19c   :  { %4402 = vmatpush1.bf16.msra.mxu0 %v5532_v12  ;;  %4429 = vmatpush3.bf16.msra.mxu1 %v6643_v33  ;;  %v6658_v12 = vld [vmem:[#allocation58_spill] sm:$0xff] }
 0x19d   :  { %4404 = vmatprep.subr.bf16.mxu0 %v6644_v30  ;;  %4430 = vmatprep.subr.bf16.mxu1 %v6641_v22 }
 0x1a0   :  { %4406 = vmatpush1.bf16.msra.mxu0 %v6645_v21  ;;  %4432 = vmatpush3.bf16.msra.mxu1 %v6646_v18  ;;  %v6657_v21 = vld [vmem:[#allocation36_spill] sm:$0xff] }
 0x1a1   :  { %4408 = vmatprep.subr.bf16.mxu0 %v6647_v34  ;;  %4433 = vmatprep.subr.bf16.mxu1 %v6641_v22 }
 0x1a4   :  { %4410 = vmatpush1.bf16.msra.mxu0 %v6648_v7  ;;  %4435 = vmatpush3.bf16.msra.mxu1 %v6649_v15 }
 0x1a5   :  { %4412 = vmatprep.subr.bf16.mxu0 %v6650_v23  ;;  %4436 = vmatprep.subr.bf16.mxu1 %v6641_v22 }
 0x1a8   :  { %4414 = vmatpush1.bf16.msra.mxu0 %v6651_v5  ;;  %4438 = vmatpush3.bf16.msra.mxu1 %v6652_v25  ;;  %v6656_v25 = vld [vmem:[#allocation63_spill] sm:$0xff] }
 0x1a9   :  { %4440 = vmatprep.subr.bf16.mxu1 %v6653_v51  ;;  %4471 = vmatprep.subr.bf16.mxu0 %v6641_v22 }
 0x23e   :  { %v1017_v46 = vpop.f32.mrb[2].mxu0  ;;  %v1088_v32 = vpop.f32.mrb[28].mxu1 }
 0x23f   :  { %v5059_v27 = vadd.f32 %v1017_v46, %v6654_v52  ;;  %v1019_v13 = vpop.f32.mrb[3].mxu0  ;;  %v3691_v35 = vpop.f32.mrb[29].mxu1  ;;  %v1102_v34 = vadd.f32 %v6656_v25, %v1088_v32 }
 0x240   :  { %v5060_v41 = vadd.f32 %v1019_v13, %v6655_v4  ;;  %v6659_v4 = vld [vmem:[#allocation57_spill] sm:$0xff] }
 0x241   :  { %v1093_v54 = vmul.f32 0.5, %v5059_v27 }
 0x242   :  { %v1098_v23 = vmul.f32 0.5, %v5060_v41 }
 0x243   :  { %5114 = vtanh.f32 %v1093_v54 }
 0x244   :  { %5116 = vtanh.f32 %v1098_v23 }
 0x24d   :  { %v5115_v15 = vpop.eup %5114 }
 0x24e   :  { %v1095_v5 = vmul.f32 0.5, %v5115_v15  ;;  %v5117_v18 = vpop.eup %5116 }
 0x24f   :  { %v1100_v33 = vmul.f32 0.5, %v5117_v18 }
 0x250   :  { %v1096_v7 = vadd.f32 0.5, %v1095_v5 }
 0x251   :  { %v1101_v46 = vadd.f32 0.5, %v1100_v33 }
 0x252   :  { %v1103_v51 = vmul.f32 %v1102_v34, %v1096_v7 }
 0x253   :  { %v1106_v27 = vsub.f32 1.0, %v1101_v46  ;;  %v1108_v32 = vmul.f32 %v1101_v46, %v5872_v1 }
 0x254   :  { %v1104_v30 = vadd.f32 %v1103_v51, %v6657_v21 }
 0x256   :  { %5118 = vtanh.f32 %v1104_v30 }
 0x25e   :  { %v1176_v52 = vpop.f32.mrb[30].mxu1  ;;  %v1247_v35 = vpop.f32.mrb[26].mxu0 }
 0x25f   :  { %v1251_v13 = vadd.f32 %v1176_v52, %v6658_v12  ;;  %v1178_v54 = vpop.f32.mrb[31].mxu1  ;;  %v3726_v41 = vpop.f32.mrb[27].mxu0  ;;  %v1261_v18 = vadd.f32 %v5892_v11, %v1247_v35 }
 0x260   :  { %v5119_v23 = vpop.eup %5118  ;;  %v1256_v15 = vadd.f32 %v1178_v54, %v6659_v4  ;;  %v6660_v4 = vld [vmem:[#allocation59_spill] sm:$0xff] }
 0x261   :  { %v1107_v5 = vmul.f32 %v5119_v23, %v1106_v27  ;;  %v1252_v34 = vmul.f32 0.5, %v1251_v13 }
 0x262   :  { %v1257_v12 = vmul.f32 0.5, %v1256_v15 }
 0x263   :  { %5120 = vtanh.f32 %v1252_v34  ;;  %v5974_v7 = vadd.f32 %v1108_v32, %v1107_v5  ;;  %v6662_v32 = vld [vmem:[#allocation13_spill] sm:$0xff]  ;;  %v6663_v34 = vld [vmem:[#allocation15_spill] sm:$0xff] }
 0x264   :  { %5122 = vtanh.f32 %v1257_v12  ;;  %v6665_v12 = vld [vmem:[#allocation16_spill] sm:$0xff] }
 0x265   :  { %1346 = vmatmul.mubr.f32.vlgmr.msra.gmra.mrb[4].mxu0 %v5974_v7  ;;  %3760 = vmatmul.mubr.f32.vlgmr.msra.gmra.mrb[32].mxu1 %v5974_v7  ;;  %v1269_v33 = vmul.f32 %v5870_v36, %v5974_v7 }
 0x266   :  { %4442 = vmatpush1.bf16.msra.mxu1 %v5594_v58  ;;  %4473 = vmatpush3.bf16.msra.mxu0 %v5596_v60 }
 0x267   :  { %1270 = vadd.xlane.f32.xlu1 %v1269_v33  ;;  %4444 = vmatprep.subr.bf16.mxu1 %v5601_v61  ;;  %v6664_v33 = vld [vmem:[#allocation17_spill] sm:$0xff] }
 0x268   :  { %4474 = vmatprep.subr.bf16.mxu0 %v6641_v22  ;;  %1504 = vmatprep.mubr.f32.mxu1 %v6642_v45 }
 0x269   :  { %3794 = vmatprep.mubr.msk.f32.mxu0 %vm5307_vm1, %v6642_v45 }
 0x26a   :  { %4446 = vmatpush1.bf16.msra.mxu1 %v5608_v6  ;;  %4476 = vmatpush3.bf16.msra.mxu0 %v5611_v9 }
 0x26b   :  { %4448 = vmatprep.subr.bf16.mxu1 %v5614_v10  ;;  %4477 = vmatprep.subr.bf16.mxu0 %v6641_v22 }
 0x26d   :  { %v5121_v1 = vpop.eup %5120 }
 0x26e   :  { %v1254_v30 = vmul.f32 0.5, %v5121_v1  ;;  %4450 = vmatpush1.bf16.msra.mxu1 %v5621_v20  ;;  %4479 = vmatpush3.bf16.msra.mxu0 %v5624_v24  ;;  %v5123_v52 = vpop.eup %5122  ;;  %v6666_v1 = vld [vmem:[#allocation18_spill] sm:$0xff] }
 0x26f   :  { %4452 = vmatprep.subr.bf16.mxu1 %v5627_v28  ;;  %4480 = vmatprep.subr.bf16.mxu0 %v6641_v22  ;;  %v1259_v27 = vmul.f32 0.5, %v5123_v52  ;;  %v6671_v52 = vld [vmem:[#allocation22_spill] sm:$0xff] }
 0x270   :  { %v1255_v21 = vadd.f32 0.5, %v1254_v30  ;;  %v6667_v30 = vld [vmem:[#allocation20_spill] sm:$0xff] }
 0x271   :  { %v1260_v35 = vadd.f32 0.5, %v1259_v27 }
 0x272   :  { %v1262_v51 = vmul.f32 %v1261_v18, %v1255_v21  ;;  %4454 = vmatpush1.bf16.msra.mxu1 %v5631_v40  ;;  %4482 = vmatpush3.bf16.msra.mxu0 %v5634_v42  ;;  %v6668_v21 = vld [vmem:[#allocation19_spill] sm:$0xff]  ;;  %v6669_v18 = vld [vmem:[#allocation21_spill] sm:$0xff] }
 0x273   :  { %4456 = vmatprep.subr.bf16.mxu1 %v5637_v43  ;;  %4483 = vmatprep.subr.bf16.mxu0 %v6641_v22  ;;  %v1265_v13 = vsub.f32 1.0, %v1260_v35  ;;  %v1267_v23 = vmul.f32 %v1260_v35, %v5924_v16  ;;  %v6661_v16 = vld [vmem:[#allocation14_spill] sm:$0xff]  ;;  %v6673_v35 = vld [vmem:[#allocation61_spill] sm:$0xff] }
 0x274   :  { %v1263_v46 = vadd.f32 %v1262_v51, %v6660_v4  ;;  %v6670_v51 = vld [vmem:[#allocation23_spill] sm:$0xff]  ;;  %v6672_v4 = vld [vmem:[#allocation24_spill] sm:$0xff] }
 0x276   :  { %5124 = vtanh.f32 %v1263_v46  ;;  %4458 = vmatpush1.bf16.msra.mxu1 %v5641_v55  ;;  %4485 = vmatpush3.bf16.msra.mxu0 %v5644_v63 }
 0x277   :  { %4460 = vmatprep.subr.bf16.mxu1 %v5647_v0  ;;  %4486 = vmatprep.subr.bf16.mxu0 %v6641_v22 }
 0x27a   :  { %4462 = vmatpush1.bf16.msra.mxu1 %v5651_v14  ;;  %4488 = vmatpush3.bf16.msra.mxu0 %v5654_v17 }
 0x27b   :  { %4464 = vmatprep.subr.bf16.mxu1 %v5657_v19  ;;  %4489 = vmatprep.subr.bf16.mxu0 %v6641_v22 }
 0x27e   :  { %4466 = vmatpush1.bf16.msra.mxu1 %v5661_v37  ;;  %4491 = vmatpush3.bf16.msra.mxu0 %v5664_v49 }
 0x27f   :  { %4468 = vmatprep.subr.bf16.mxu1 %v5667_v50  ;;  %4492 = vmatprep.subr.bf16.mxu0 %v6641_v22 }
 0x280   :  { %v5125_v54 = vpop.eup %5124 }
 0x281   :  { %v1266_v41 = vmul.f32 %v5125_v54, %v1265_v13 }
 0x282   :  { %4470 = vmatpush1.bf16.msra.mxu1 %v5671_v59  ;;  %4494 = vmatpush3.bf16.msra.mxu0 %v5674_v31 }
 0x283   :  { %v6016_v15 = vadd.f32 %v1267_v23, %v1266_v41  ;;  %4496 = vmatprep.subr.bf16.mxu0 %v5434_v26  ;;  %4527 = vmatprep.subr.bf16.mxu1 %v6641_v22 }
 0x285   :  { %1505 = vmatmul.mubr.f32.vlgmr.msra.gmra.mrb[34].mxu1 %v6016_v15  ;;  %3795 = vmatmul.mubr.f32.vlgmr.msra.gmra.mrb[28].mxu0 %v6016_v15  ;;  %v1272_v5 = vmul.f32 %v5922_v29, %v6016_v15 }
 0x286   :  { %4498 = vmatpush1.bf16.msra.mxu0 %v5476_v39  ;;  %4529 = vmatpush3.bf16.msra.mxu1 %v5474_v38 }
 0x287   :  { %1273 = vadd.xlane.f32.xlu1 %v1272_v5  ;;  %4500 = vmatprep.subr.bf16.mxu0 %v5478_v44  ;;  %v6674_v5 = vld [vmem:[#allocation62_spill] sm:$0xff] }
 0x288   :  { %4530 = vmatprep.subr.bf16.mxu1 %v6641_v22  ;;  %1675 = vmatprep.mubr.f32.mxu0 %v6642_v45 }
 0x289   :  { %3829 = vmatprep.mubr.msk.f32.mxu1 %vm5307_vm1, %v6642_v45 }
 0x28a   :  { %4502 = vmatpush1.bf16.msra.mxu0 %v5488_v48  ;;  %4532 = vmatpush3.bf16.msra.mxu1 %v5486_v47 }
 0x28b   :  { %4504 = vmatprep.subr.bf16.mxu0 %v5494_v53  ;;  %4533 = vmatprep.subr.bf16.mxu1 %v6641_v22 }
 0x28e   :  { %4506 = vmatpush1.bf16.msra.mxu0 %v5502_v57  ;;  %4535 = vmatpush3.bf16.msra.mxu1 %v5500_v56 }
 0x28f   :  { %4508 = vmatprep.subr.bf16.mxu0 %v5508_v62  ;;  %4536 = vmatprep.subr.bf16.mxu1 %v6641_v22 }
 0x292   :  { %4510 = vmatpush1.bf16.msra.mxu0 %v5516_v3  ;;  %4538 = vmatpush3.bf16.msra.mxu1 %v5514_v2 }
 0x293   :  { %4512 = vmatprep.subr.bf16.mxu0 %v5522_v8  ;;  %4539 = vmatprep.subr.bf16.mxu1 %v6641_v22 }
 0x296   :  { %4514 = vmatpush1.bf16.msra.mxu0 %v6661_v16  ;;  %4541 = vmatpush3.bf16.msra.mxu1 %v6662_v32  ;;  %v6676_v16 = vld [vmem:[#allocation54_spill] sm:$0xff] }
 0x297   :  { %4516 = vmatprep.subr.bf16.mxu0 %v6663_v34  ;;  %4542 = vmatprep.subr.bf16.mxu1 %v6641_v22 }
 0x29a   :  { %4518 = vmatpush1.bf16.msra.mxu0 %v6664_v33  ;;  %4544 = vmatpush3.bf16.msra.mxu1 %v6665_v12  ;;  %v6675_v33 = vld [vmem:[#allocation40_spill] sm:$0xff] }
 0x29b   :  { %4520 = vmatprep.subr.bf16.mxu0 %v6666_v1  ;;  %4545 = vmatprep.subr.bf16.mxu1 %v6641_v22 }
 0x29e   :  { %4522 = vmatpush1.bf16.msra.mxu0 %v6667_v30  ;;  %4547 = vmatpush3.bf16.msra.mxu1 %v6668_v21 }
 0x29f   :  { %4524 = vmatprep.subr.bf16.mxu0 %v6669_v18  ;;  %4548 = vmatprep.subr.bf16.mxu1 %v6641_v22 }
 0x2a2   :  { %4526 = vmatpush1.bf16.msra.mxu0 %v6670_v51  ;;  %4550 = vmatpush3.bf16.msra.mxu1 %v6671_v52 }
 0x2a3   :  { %4552 = vmatprep.subr.bf16.mxu1 %v6672_v4  ;;  %4583 = vmatprep.subr.bf16.mxu0 %v6641_v22 }
 0x338   :  { %v1347_v46 = vpop.f32.mrb[4].mxu0  ;;  %v1418_v27 = vpop.f32.mrb[32].mxu1 }
 0x339   :  { %v5061_v13 = vadd.f32 %v1347_v46, %v6673_v35  ;;  %v1349_v54 = vpop.f32.mrb[5].mxu0  ;;  %v3761_v41 = vpop.f32.mrb[33].mxu1  ;;  %v1432_v52 = vadd.f32 %v6656_v25, %v1418_v27 }
 0x33a   :  { %v5062_v21 = vadd.f32 %v1349_v54, %v6674_v5  ;;  %v6677_v5 = vld [vmem:[#allocation53_spill] sm:$0xff] }
 0x33b   :  { %v1423_v23 = vmul.f32 0.5, %v5061_v13 }
 0x33c   :  { %v1428_v18 = vmul.f32 0.5, %v5062_v21 }
 0x33d   :  { %5126 = vtanh.f32 %v1423_v23 }
 0x33e   :  { %5128 = vtanh.f32 %v1428_v18 }
 0x347   :  { %v5127_v30 = vpop.eup %5126 }
 0x348   :  { %v1425_v51 = vmul.f32 0.5, %v5127_v30  ;;  %v5129_v12 = vpop.eup %5128 }
 0x349   :  { %v1430_v32 = vmul.f32 0.5, %v5129_v12 }
 0x34a   :  { %v1426_v1 = vadd.f32 0.5, %v1425_v51 }
 0x34b   :  { %v1431_v46 = vadd.f32 0.5, %v1430_v32 }
 0x34c   :  { %v1433_v4 = vmul.f32 %v1432_v52, %v1426_v1 }
 0x34d   :  { %v1436_v13 = vsub.f32 1.0, %v1431_v46  ;;  %v1438_v27 = vmul.f32 %v1431_v46, %v5974_v7 }
 0x34e   :  { %v1434_v34 = vadd.f32 %v1433_v4, %v6675_v33 }
 0x350   :  { %5130 = vtanh.f32 %v1434_v34 }
 0x358   :  { %v1506_v35 = vpop.f32.mrb[34].mxu1  ;;  %v1577_v41 = vpop.f32.mrb[28].mxu0 }
 0x359   :  { %v1581_v54 = vadd.f32 %v1506_v35, %v6676_v16  ;;  %v1508_v23 = vpop.f32.mrb[35].mxu1  ;;  %v3796_v21 = vpop.f32.mrb[29].mxu0  ;;  %v1591_v12 = vadd.f32 %v5892_v11, %v1577_v41 }
 0x35a   :  { %v5131_v18 = vpop.eup %5130  ;;  %v1586_v30 = vadd.f32 %v1508_v23, %v6677_v5  ;;  %v6678_v5 = vld [vmem:[#allocation55_spill] sm:$0xff] }
 0x35b   :  { %v1437_v51 = vmul.f32 %v5131_v18, %v1436_v13  ;;  %v1582_v1 = vmul.f32 0.5, %v1581_v54 }
 0x35c   :  { %v1587_v16 = vmul.f32 0.5, %v1586_v30 }
 0x35d   :  { %5132 = vtanh.f32 %v1582_v1  ;;  %v6066_v52 = vadd.f32 %v1438_v27, %v1437_v51  ;;  %v6680_v27 = vld [vmem:[#allocation13_spill] sm:$0xff]  ;;  %v6681_v1 = vld [vmem:[#allocation15_spill] sm:$0xff] }
 0x35e   :  { %5134 = vtanh.f32 %v1587_v16  ;;  %v6683_v16 = vld [vmem:[#allocation16_spill] sm:$0xff] }
 0x35f   :  { %1676 = vmatmul.mubr.f32.vlgmr.msra.gmra.mrb[6].mxu0 %v6066_v52  ;;  %3830 = vmatmul.mubr.f32.vlgmr.msra.gmra.mrb[36].mxu1 %v6066_v52  ;;  %v1599_v32 = vmul.f32 %v5870_v36, %v6066_v52 }
 0x360   :  { %4554 = vmatpush1.bf16.msra.mxu1 %v5594_v58  ;;  %4585 = vmatpush3.bf16.msra.mxu0 %v5596_v60 }
 0x361   :  { %1600 = vadd.xlane.f32.xlu0 %v1599_v32  ;;  %4556 = vmatprep.subr.bf16.mxu1 %v5601_v61  ;;  %v6682_v32 = vld [vmem:[#allocation17_spill] sm:$0xff] }
 0x362   :  { %4586 = vmatprep.subr.bf16.mxu0 %v6641_v22  ;;  %1834 = vmatprep.mubr.f32.mxu1 %v6642_v45 }
 0x363   :  { %3864 = vmatprep.mubr.msk.f32.mxu0 %vm5307_vm1, %v6642_v45 }
 0x364   :  { %4558 = vmatpush1.bf16.msra.mxu1 %v5608_v6  ;;  %4588 = vmatpush3.bf16.msra.mxu0 %v5611_v9 }
 0x365   :  { %4560 = vmatprep.subr.bf16.mxu1 %v5614_v10  ;;  %4589 = vmatprep.subr.bf16.mxu0 %v6641_v22 }
 0x367   :  { %v5133_v7 = vpop.eup %5132 }
 0x368   :  { %v1584_v34 = vmul.f32 0.5, %v5133_v7  ;;  %4562 = vmatpush1.bf16.msra.mxu1 %v5621_v20  ;;  %4591 = vmatpush3.bf16.msra.mxu0 %v5624_v24  ;;  %v5135_v35 = vpop.eup %5134  ;;  %v6684_v7 = vld [vmem:[#allocation18_spill] sm:$0xff] }
 0x369   :  { %4564 = vmatprep.subr.bf16.mxu1 %v5627_v28  ;;  %4592 = vmatprep.subr.bf16.mxu0 %v6641_v22  ;;  %v1589_v13 = vmul.f32 0.5, %v5135_v35  ;;  %v6689_v35 = vld [vmem:[#allocation22_spill] sm:$0xff] }
 0x36a   :  { %v1585_v33 = vadd.f32 0.5, %v1584_v34  ;;  %v6685_v34 = vld [vmem:[#allocation20_spill] sm:$0xff] }
 0x36b   :  { %v1590_v41 = vadd.f32 0.5, %v1589_v13 }
 0x36c   :  { %v1592_v4 = vmul.f32 %v1591_v12, %v1585_v33  ;;  %4566 = vmatpush1.bf16.msra.mxu1 %v5631_v40  ;;  %4594 = vmatpush3.bf16.msra.mxu0 %v5634_v42  ;;  %v6686_v33 = vld [vmem:[#allocation19_spill] sm:$0xff]  ;;  %v6687_v12 = vld [vmem:[#allocation21_spill] sm:$0xff] }
 0x36d   :  { %4568 = vmatprep.subr.bf16.mxu1 %v5637_v43  ;;  %4595 = vmatprep.subr.bf16.mxu0 %v6641_v22  ;;  %v1595_v54 = vsub.f32 1.0, %v1590_v41  ;;  %v1597_v18 = vmul.f32 %v1590_v41, %v6016_v15  ;;  %v6679_v15 = vld [vmem:[#allocation14_spill] sm:$0xff]  ;;  %v6691_v41 = vld [vmem:[#allocation61_spill] sm:$0xff] }
 0x36e   :  { %v1593_v46 = vadd.f32 %v1592_v4, %v6678_v5  ;;  %v6688_v4 = vld [vmem:[#allocation23_spill] sm:$0xff]  ;;  %v6690_v5 = vld [vmem:[#allocation24_spill] sm:$0xff] }
 0x370   :  { %5136 = vtanh.f32 %v1593_v46  ;;  %4570 = vmatpush1.bf16.msra.mxu1 %v5641_v55  ;;  %4597 = vmatpush3.bf16.msra.mxu0 %v5644_v63 }
 0x371   :  { %4572 = vmatprep.subr.bf16.mxu1 %v5647_v0  ;;  %4598 = vmatprep.subr.bf16.mxu0 %v6641_v22 }
 0x374   :  { %4574 = vmatpush1.bf16.msra.mxu1 %v5651_v14  ;;  %4600 = vmatpush3.bf16.msra.mxu0 %v5654_v17 }
 0x375   :  { %4576 = vmatprep.subr.bf16.mxu1 %v5657_v19  ;;  %4601 = vmatprep.subr.bf16.mxu0 %v6641_v22 }
 0x378   :  { %4578 = vmatpush1.bf16.msra.mxu1 %v5661_v37  ;;  %4603 = vmatpush3.bf16.msra.mxu0 %v5664_v49 }
 0x379   :  { %4580 = vmatprep.subr.bf16.mxu1 %v5667_v50  ;;  %4604 = vmatprep.subr.bf16.mxu0 %v6641_v22 }
 0x37a   :  { %v5137_v23 = vpop.eup %5136 }
 0x37b   :  { %v1596_v21 = vmul.f32 %v5137_v23, %v1595_v54 }
 0x37c   :  { %4582 = vmatpush1.bf16.msra.mxu1 %v5671_v59  ;;  %4606 = vmatpush3.bf16.msra.mxu0 %v5674_v31 }
 0x37d   :  { %v6108_v30 = vadd.f32 %v1597_v18, %v1596_v21  ;;  %4608 = vmatprep.subr.bf16.mxu0 %v5434_v26  ;;  %4639 = vmatprep.subr.bf16.mxu1 %v6641_v22 }
 0x37f   :  { %1835 = vmatmul.mubr.f32.vlgmr.msra.gmra.mrb[38].mxu1 %v6108_v30  ;;  %3865 = vmatmul.mubr.f32.vlgmr.msra.gmra.mrb[30].mxu0 %v6108_v30  ;;  %v1602_v51 = vmul.f32 %v5922_v29, %v6108_v30 }
 0x380   :  { %4610 = vmatpush1.bf16.msra.mxu0 %v5476_v39  ;;  %4641 = vmatpush3.bf16.msra.mxu1 %v5474_v38 }
 0x381   :  { %1603 = vadd.xlane.f32.xlu1 %v1602_v51  ;;  %4612 = vmatprep.subr.bf16.mxu0 %v5478_v44  ;;  %v6692_v51 = vld [vmem:[#allocation62_spill] sm:$0xff] }
 0x382   :  { %4642 = vmatprep.subr.bf16.mxu1 %v6641_v22  ;;  %2005 = vmatprep.mubr.f32.mxu0 %v6642_v45 }
 0x383   :  { %3899 = vmatprep.mubr.msk.f32.mxu1 %vm5307_vm1, %v6642_v45 }
 0x384   :  { %4614 = vmatpush1.bf16.msra.mxu0 %v5488_v48  ;;  %4644 = vmatpush3.bf16.msra.mxu1 %v5486_v47 }
 0x385   :  { %4616 = vmatprep.subr.bf16.mxu0 %v5494_v53  ;;  %4645 = vmatprep.subr.bf16.mxu1 %v6641_v22 }
 0x388   :  { %4618 = vmatpush1.bf16.msra.mxu0 %v5502_v57  ;;  %4647 = vmatpush3.bf16.msra.mxu1 %v5500_v56 }
 0x389   :  { %4620 = vmatprep.subr.bf16.mxu0 %v5508_v62  ;;  %4648 = vmatprep.subr.bf16.mxu1 %v6641_v22 }
 0x38c   :  { %4622 = vmatpush1.bf16.msra.mxu0 %v5516_v3  ;;  %4650 = vmatpush3.bf16.msra.mxu1 %v5514_v2 }
 0x38d   :  { %4624 = vmatprep.subr.bf16.mxu0 %v5522_v8  ;;  %4651 = vmatprep.subr.bf16.mxu1 %v6641_v22 }
 0x390   :  { %4626 = vmatpush1.bf16.msra.mxu0 %v6679_v15  ;;  %4653 = vmatpush3.bf16.msra.mxu1 %v6680_v27  ;;  %v6694_v15 = vld [vmem:[#allocation50_spill] sm:$0xff] }
 0x391   :  { %4628 = vmatprep.subr.bf16.mxu0 %v6681_v1  ;;  %4654 = vmatprep.subr.bf16.mxu1 %v6641_v22 }
 0x394   :  { %4630 = vmatpush1.bf16.msra.mxu0 %v6682_v32  ;;  %4656 = vmatpush3.bf16.msra.mxu1 %v6683_v16  ;;  %v6693_v32 = vld [vmem:[#allocation44_spill] sm:$0xff] }
 0x395   :  { %4632 = vmatprep.subr.bf16.mxu0 %v6684_v7  ;;  %4657 = vmatprep.subr.bf16.mxu1 %v6641_v22 }
 0x398   :  { %4634 = vmatpush1.bf16.msra.mxu0 %v6685_v34  ;;  %4659 = vmatpush3.bf16.msra.mxu1 %v6686_v33 }
 0x399   :  { %4636 = vmatprep.subr.bf16.mxu0 %v6687_v12  ;;  %4660 = vmatprep.subr.bf16.mxu1 %v6641_v22 }
 0x39c   :  { %4638 = vmatpush1.bf16.msra.mxu0 %v6688_v4  ;;  %4662 = vmatpush3.bf16.msra.mxu1 %v6689_v35 }
 0x39d   :  { %4664 = vmatprep.subr.bf16.mxu1 %v6690_v5  ;;  %4695 = vmatprep.subr.bf16.mxu0 %v6641_v22 }
 0x432   :  { %v1677_v46 = vpop.f32.mrb[6].mxu0  ;;  %v1748_v13 = vpop.f32.mrb[36].mxu1 }
 0x433   :  { %v5063_v54 = vadd.f32 %v1677_v46, %v6691_v41  ;;  %v1679_v23 = vpop.f32.mrb[7].mxu0  ;;  %v3831_v21 = vpop.f32.mrb[37].mxu1  ;;  %v1762_v35 = vadd.f32 %v6656_v25, %v1748_v13  ;;  %v6696_v13 = vld [vmem:[#allocation51_spill] sm:$0xff] }
 0x434   :  { %v5064_v33 = vadd.f32 %v1679_v23, %v6692_v51  ;;  %v6695_v51 = vld [vmem:[#allocation49_spill] sm:$0xff] }
 0x435   :  { %v1753_v18 = vmul.f32 0.5, %v5063_v54 }
 0x436   :  { %v1758_v12 = vmul.f32 0.5, %v5064_v33 }
 0x437   :  { %5138 = vtanh.f32 %v1753_v18 }
 0x438   :  { %5140 = vtanh.f32 %v1758_v12 }
 0x441   :  { %v5139_v34 = vpop.eup %5138 }
 0x442   :  { %v1755_v4 = vmul.f32 0.5, %v5139_v34  ;;  %v5141_v16 = vpop.eup %5140 }
 0x443   :  { %v1760_v27 = vmul.f32 0.5, %v5141_v16 }
 0x444   :  { %v1756_v7 = vadd.f32 0.5, %v1755_v4 }
 0x445   :  { %v1761_v46 = vadd.f32 0.5, %v1760_v27 }
 0x446   :  { %v1763_v5 = vmul.f32 %v1762_v35, %v1756_v7 }
 0x447   :  { %v1766_v54 = vsub.f32 1.0, %v1761_v46  ;;  %v1768_v25 = vmul.f32 %v1761_v46, %v6066_v52 }
 0x448   :  { %v1764_v1 = vadd.f32 %v1763_v5, %v6693_v32 }
 0x44a   :  { %5142 = vtanh.f32 %v1764_v1 }
 0x452   :  { %v1836_v41 = vpop.f32.mrb[38].mxu1  ;;  %v1907_v21 = vpop.f32.mrb[30].mxu0 }
 0x453   :  { %v1911_v23 = vadd.f32 %v1836_v41, %v6694_v15  ;;  %v1838_v18 = vpop.f32.mrb[39].mxu1  ;;  %v3866_v33 = vpop.f32.mrb[31].mxu0  ;;  %v1921_v32 = vadd.f32 %v5892_v11, %v1907_v21 }
 0x454   :  { %v5143_v12 = vpop.eup %5142  ;;  %v1916_v34 = vadd.f32 %v1838_v18, %v6695_v51 }
 0x455   :  { %v1767_v4 = vmul.f32 %v5143_v12, %v1766_v54  ;;  %v1912_v7 = vmul.f32 0.5, %v1911_v23  ;;  %v6699_v12 = vld [vmem:[#allocation15_spill] sm:$0xff] }
 0x456   :  { %v1917_v15 = vmul.f32 0.5, %v1916_v34  ;;  %v6700_v34 = vld [vmem:[#allocation17_spill] sm:$0xff] }
 0x457   :  { %5144 = vtanh.f32 %v1912_v7  ;;  %v6158_v35 = vadd.f32 %v1768_v25, %v1767_v4  ;;  %v6701_v4 = vld [vmem:[#allocation16_spill] sm:$0xff]  ;;  %v6702_v25 = vld [vmem:[#allocation18_spill] sm:$0xff] }
 0x458   :  { %5146 = vtanh.f32 %v1917_v15  ;;  %v6703_v7 = vld [vmem:[#allocation20_spill] sm:$0xff]  ;;  %v6705_v15 = vld [vmem:[#allocation21_spill] sm:$0xff] }
 0x459   :  { %2006 = vmatmul.mubr.f32.vlgmr.msra.gmra.mrb[32].mxu0 %v6158_v35  ;;  %3900 = vmatmul.mubr.f32.vlgmr.msra.gmra.mrb[40].mxu1 %v6158_v35  ;;  %v1929_v27 = vmul.f32 %v5870_v36, %v6158_v35 }
 0x45a   :  { %4666 = vmatpush1.bf16.msra.mxu1 %v5594_v58  ;;  %4697 = vmatpush3.bf16.msra.mxu0 %v5596_v60 }
 0x45b   :  { %1930 = vadd.xlane.f32.xlu0 %v1929_v27  ;;  %4668 = vmatprep.subr.bf16.mxu1 %v5601_v61  ;;  %v6704_v27 = vld [vmem:[#allocation19_spill] sm:$0xff] }
 0x45c   :  { %4698 = vmatprep.subr.bf16.mxu0 %v6641_v22  ;;  %2164 = vmatprep.mubr.f32.mxu1 %v6642_v45 }
 0x45d   :  { %3934 = vmatprep.mubr.msk.f32.mxu0 %vm5307_vm1, %v6642_v45 }
 0x45e   :  { %4670 = vmatpush1.bf16.msra.mxu1 %v5608_v6  ;;  %4700 = vmatpush3.bf16.msra.mxu0 %v5611_v9 }
 0x45f   :  { %4672 = vmatprep.subr.bf16.mxu1 %v5614_v10  ;;  %4701 = vmatprep.subr.bf16.mxu0 %v6641_v22 }
 0x461   :  { %v5145_v36 = vpop.eup %5144 }
 0x462   :  { %v1914_v52 = vmul.f32 0.5, %v5145_v36  ;;  %4674 = vmatpush1.bf16.msra.mxu1 %v5621_v20  ;;  %4703 = vmatpush3.bf16.msra.mxu0 %v5624_v24  ;;  %v5147_v5 = vpop.eup %5146  ;;  %v6706_v36 = vld [vmem:[#allocation23_spill] sm:$0xff] }
 0x463   :  { %4676 = vmatprep.subr.bf16.mxu1 %v5627_v28  ;;  %4704 = vmatprep.subr.bf16.mxu0 %v6641_v22  ;;  %v1919_v51 = vmul.f32 0.5, %v5147_v5 }
 0x464   :  { %v1915_v1 = vadd.f32 0.5, %v1914_v52  ;;  %v6707_v52 = vld [vmem:[#allocation22_spill] sm:$0xff] }
 0x465   :  { %v1920_v11 = vadd.f32 0.5, %v1919_v51 }
 0x466   :  { %v1922_v16 = vmul.f32 %v1921_v32, %v1915_v1  ;;  %4678 = vmatpush1.bf16.msra.mxu1 %v5631_v40  ;;  %4706 = vmatpush3.bf16.msra.mxu0 %v5634_v42  ;;  %v6708_v1 = vld [vmem:[#allocation24_spill] sm:$0xff]  ;;  %v6709_v32 = vld [vmem:[#allocation61_spill] sm:$0xff] }
 0x467   :  { %4680 = vmatprep.subr.bf16.mxu1 %v5637_v43  ;;  %4707 = vmatprep.subr.bf16.mxu0 %v6641_v22  ;;  %v1925_v46 = vsub.f32 1.0, %v1920_v11  ;;  %v1927_v23 = vmul.f32 %v1920_v11, %v6108_v30  ;;  %v6698_v30 = vld [vmem:[#allocation13_spill] sm:$0xff] }
 0x468   :  { %v1923_v41 = vadd.f32 %v1922_v16, %v6696_v13  ;;  %v6710_v16 = vld [vmem:[#allocation25_spill] sm:$0xff]  ;;  %v6711_v13 = vld [vmem:[#allocation62_spill] sm:$0xff] }
 0x469   :  { %v247_v5 = vadd.f32 %v6710_v16, %v6709_v32  ;;  %v6250_v16 = vld [vmem:[%s6546_s5] ss:$0 sm:$0xff] }
 0x46a   :  { %5148 = vtanh.f32 %v1923_v41  ;;  %4682 = vmatpush1.bf16.msra.mxu1 %v5641_v55  ;;  %4709 = vmatpush3.bf16.msra.mxu0 %v5644_v63  ;;  %v6712_v41 = vld [vmem:[#allocation26_spill] sm:$0xff] }
 0x46b   :  { %4684 = vmatprep.subr.bf16.mxu1 %v5647_v0  ;;  %4710 = vmatprep.subr.bf16.mxu0 %v6641_v22  ;;  %v249_v51 = vadd.f32 %v6712_v41, %v6711_v13 }
 0x46e   :  { %4686 = vmatpush1.bf16.msra.mxu1 %v5651_v14  ;;  %4712 = vmatpush3.bf16.msra.mxu0 %v5654_v17 }
 0x46f   :  { %4688 = vmatprep.subr.bf16.mxu1 %v5657_v19  ;;  %4713 = vmatprep.subr.bf16.mxu0 %v6641_v22 }
 0x472   :  { %4690 = vmatpush1.bf16.msra.mxu1 %v5661_v37  ;;  %4715 = vmatpush3.bf16.msra.mxu0 %v5664_v49 }
 0x473   :  { %4692 = vmatprep.subr.bf16.mxu1 %v5667_v50  ;;  %4716 = vmatprep.subr.bf16.mxu0 %v6641_v22 }
 0x474   :  { %v5149_v21 = vpop.eup %5148 }
 0x475   :  { %v1926_v54 = vmul.f32 %v5149_v21, %v1925_v46 }
 0x476   :  { %4694 = vmatpush1.bf16.msra.mxu1 %v5671_v59  ;;  %4718 = vmatpush3.bf16.msra.mxu0 %v5674_v31 }
 0x477   :  { %v6200_v18 = vadd.f32 %v1927_v23, %v1926_v54  ;;  %4720 = vmatprep.subr.bf16.mxu0 %v5434_v26  ;;  %4751 = vmatprep.subr.bf16.mxu1 %v6641_v22 }
 0x479   :  { %2165 = vmatmul.mubr.f32.vlgmr.msra.gmra.mrb[42].mxu1 %v6200_v18  ;;  %3935 = vmatmul.mubr.f32.vlgmr.msra.gmra.mrb[34].mxu0 %v6200_v18  ;;  %v1932_v33 = vmul.f32 %v5922_v29, %v6200_v18  ;;  %v6697_v29 = vld [vmem:[#allocation14_spill] sm:$0xff] }
 0x47a   :  { %4722 = vmatpush1.bf16.msra.mxu0 %v5476_v39  ;;  %4753 = vmatpush3.bf16.msra.mxu1 %v5474_v38 }
 0x47b   :  { %1933 = vadd.xlane.f32.xlu1 %v1932_v33  ;;  %4724 = vmatprep.subr.bf16.mxu0 %v5478_v44 }
 0x47c   :  { %4754 = vmatprep.subr.bf16.mxu1 %v6641_v22  ;;  %2333 = vmatprep.mubr.f32.mxu0 %v6642_v45 }
 0x47d   :  { %3969 = vmatprep.mubr.msk.f32.mxu1 %vm5307_vm1, %v6642_v45 }
 0x47e   :  { %4726 = vmatpush1.bf16.msra.mxu0 %v5488_v48  ;;  %4756 = vmatpush3.bf16.msra.mxu1 %v5486_v47 }
 0x47f   :  { %4728 = vmatprep.subr.bf16.mxu0 %v5494_v53  ;;  %4757 = vmatprep.subr.bf16.mxu1 %v6641_v22 }
 0x482   :  { %4730 = vmatpush1.bf16.msra.mxu0 %v5502_v57  ;;  %4759 = vmatpush3.bf16.msra.mxu1 %v5500_v56 }
 0x483   :  { %4732 = vmatprep.subr.bf16.mxu0 %v5508_v62  ;;  %4760 = vmatprep.subr.bf16.mxu1 %v6641_v22 }
 0x486   :  { %4734 = vmatpush1.bf16.msra.mxu0 %v5516_v3  ;;  %4762 = vmatpush3.bf16.msra.mxu1 %v5514_v2 }
 0x487   :  { %4736 = vmatprep.subr.bf16.mxu0 %v5522_v8  ;;  %4763 = vmatprep.subr.bf16.mxu1 %v6641_v22 }
 0x48a   :  { %4738 = vmatpush1.bf16.msra.mxu0 %v6697_v29  ;;  %4765 = vmatpush3.bf16.msra.mxu1 %v6698_v30 }
 0x48b   :  { %4740 = vmatprep.subr.bf16.mxu0 %v6699_v12  ;;  %4766 = vmatprep.subr.bf16.mxu1 %v6641_v22 }
 0x48e   :  { %4742 = vmatpush1.bf16.msra.mxu0 %v6700_v34  ;;  %4768 = vmatpush3.bf16.msra.mxu1 %v6701_v4 }
 0x48f   :  { %4744 = vmatprep.subr.bf16.mxu0 %v6702_v25  ;;  %4769 = vmatprep.subr.bf16.mxu1 %v6641_v22  ;;  %v6715_v25 = vld [vmem:[#allocation45_spill] sm:$0xff] }
 0x492   :  { %4746 = vmatpush1.bf16.msra.mxu0 %v6703_v7  ;;  %4771 = vmatpush3.bf16.msra.mxu1 %v6704_v27 }
 0x493   :  { %4748 = vmatprep.subr.bf16.mxu0 %v6705_v15  ;;  %4772 = vmatprep.subr.bf16.mxu1 %v6641_v22 }
 0x496   :  { %4750 = vmatpush1.bf16.msra.mxu0 %v6706_v36  ;;  %4774 = vmatpush3.bf16.msra.mxu1 %v6707_v52 }
 0x497   :  { %4776 = vmatprep.subr.bf16.mxu1 %v6708_v1  ;;  %4807 = vmatprep.subr.bf16.mxu0 %v6641_v22 }
 0x52c   :  { %v2007_v11 = vpop.f32.mrb[32].mxu0  ;;  %v2078_v46 = vpop.f32.mrb[40].mxu1 }
 0x52d   :  { %v2082_v21 = vadd.f32 %v2007_v11, %v247_v5  ;;  %v2009_v54 = vpop.f32.mrb[33].mxu0  ;;  %v3901_v23 = vpop.f32.mrb[41].mxu1  ;;  %v2092_v41 = vadd.f32 %v6250_v16, %v2078_v46  ;;  %v6713_v5 = vld [vmem:[#allocation48_spill] sm:$0xff] }
 0x52e   :  { %v2087_v33 = vadd.f32 %v2009_v54, %v249_v51  ;;  %v6714_v23 = vld [vmem:[#allocation46_spill] sm:$0xff] }
 0x52f   :  { %v2083_v15 = vmul.f32 0.5, %v2082_v21 }
 0x530   :  { %v2088_v36 = vmul.f32 0.5, %v2087_v33 }
 0x531   :  { %5150 = vtanh.f32 %v2083_v15 }
 0x532   :  { %5152 = vtanh.f32 %v2088_v36 }
 0x53b   :  { %v5151_v52 = vpop.eup %5150 }
 0x53c   :  { %v2085_v1 = vmul.f32 0.5, %v5151_v52  ;;  %v5153_v32 = vpop.eup %5152 }
 0x53d   :  { %v2090_v51 = vmul.f32 0.5, %v5153_v32  ;;  %v6264_v32 = vld [vmem:[%s6548_s7] ss:$0 sm:$0xff] }
 0x53e   :  { %v2086_v27 = vadd.f32 0.5, %v2085_v1 }
 0x53f   :  { %v2091_v21 = vadd.f32 0.5, %v2090_v51 }
 0x540   :  { %v2093_v13 = vmul.f32 %v2092_v41, %v2086_v27 }
 0x541   :  { %v2096_v36 = vsub.f32 1.0, %v2091_v21  ;;  %v2098_v46 = vmul.f32 %v2091_v21, %v6158_v35  ;;  %v6716_v21 = vld [vmem:[#allocation47_spill] sm:$0xff] }
 0x542   :  { %v2094_v11 = vadd.f32 %v2093_v13, %v6713_v5 }
 0x544   :  { %5154 = vtanh.f32 %v2094_v11 }
 0x54c   :  { %v2166_v15 = vpop.f32.mrb[42].mxu1  ;;  %v2237_v54 = vpop.f32.mrb[34].mxu0 }
 0x54d   :  { %v2241_v52 = vadd.f32 %v2166_v15, %v6714_v23  ;;  %v2168_v1 = vpop.f32.mrb[43].mxu1  ;;  %v3936_v33 = vpop.f32.mrb[35].mxu0 }
 0x54e   :  { %v5155_v7 = vpop.eup %5154  ;;  %v2246_v4 = vadd.f32 %v2168_v1, %v6715_v25 }
 0x54f   :  { %v2097_v34 = vmul.f32 %v5155_v7, %v2096_v36  ;;  %v2242_v27 = vmul.f32 0.5, %v2241_v52  ;;  %v6286_v7 = vld [vmem:[%s6547_s6] ss:$0 sm:$0xff] }
 0x550   :  { %v2247_v25 = vmul.f32 0.5, %v2246_v4  ;;  %v2251_v5 = vadd.f32 %v6286_v7, %v2237_v54 }
 0x551   :  { %5156 = vtanh.f32 %v2242_v27  ;;  %v6257_v41 = vadd.f32 %v2098_v46, %v2097_v34  ;;  %v6318_v27 = vld [vmem:[%s6549_s8] ss:$0 sm:$0xff]  ;;  %s5309_s8 = smov [#allocation9]  }
 0x552   :  { %5158 = vtanh.f32 %v2247_v25  ;;  %v6718_v25 = vld [vmem:[#allocation16_spill] sm:$0xff]  ;;  %s3276_s15 = sshll.u32 %s5309_s8, 4  ;;  %s3277_s15 = int_to_ptr.vmem [resolvable:$true] %s3276_s15 }
 0x553   :  { %2334 = vmatmul.mubr.f32.vlgmr.msra.gmra.mrb[36].mxu0 %v6257_v41  ;;  %3970 = vmatmul.mubr.f32.vlgmr.msra.gmra.mrb[44].mxu1 %v6257_v41  ;;  %v2259_v13 = vmul.f32 %v6264_v32, %v6257_v41  ;;  %s5270_s17 = scalar_lea.vmem %s3277_s15, 128  ;;  %p5275_p11 = scmp.lt.s32.totalorder %s3277_s15, %s3277_s15 }
 0x554   :  { %4778 = vmatpush1.bf16.msra.mxu1 %v5594_v58  ;;  %4809 = vmatpush3.bf16.msra.mxu0 %v5596_v60  ;;  %p5271_p10 = scmp.ne.s32.totalorder %s3277_s15, %s5270_s17  ;;  %p5276_p12 = scmp.lt.s32.totalorder %s5270_s17, %s5270_s17 }
 0x555   :  { %2260 = vadd.xlane.f32.xlu0 %v2259_v13  ;;  %4780 = vmatprep.subr.bf16.mxu1 %v5601_v61  ;;  %v6717_v13 = vld [vmem:[#allocation17_spill] sm:$0xff] }
 0x556   :  { %4810 = vmatprep.subr.bf16.mxu0 %v6641_v22  ;;  %2492 = vmatprep.mubr.f32.mxu1 %v6642_v45  ;;  %p5277_p13 = por %p5276_p12, %p5275_p11 }
 0x557   :  { %4004 = vmatprep.mubr.msk.f32.mxu0 %vm5307_vm1, %v6642_v45 }
 0x558   :  { %4782 = vmatpush1.bf16.msra.mxu1 %v5608_v6  ;;  %4812 = vmatpush3.bf16.msra.mxu0 %v5611_v9  ;;  %p5278_p0 = pnand %p5277_p13, %p5271_p10 }
 0x559   :  { %4784 = vmatprep.subr.bf16.mxu1 %v5614_v10  ;;  %4813 = vmatprep.subr.bf16.mxu0 %v6641_v22 }
 0x55b   :  { %v5157_v35 = vpop.eup %5156 }
 0x55c   :  { %v2244_v34 = vmul.f32 0.5, %v5157_v35  ;;  %4786 = vmatpush1.bf16.msra.mxu1 %v5621_v20  ;;  %4815 = vmatpush3.bf16.msra.mxu0 %v5624_v24  ;;  %v5159_v51 = vpop.eup %5158  ;;  %v6719_v35 = vld [vmem:[#allocation18_spill] sm:$0xff] }
 0x55d   :  { %4788 = vmatprep.subr.bf16.mxu1 %v5627_v28  ;;  %4816 = vmatprep.subr.bf16.mxu0 %v6641_v22  ;;  %v2249_v36 = vmul.f32 0.5, %v5159_v51  ;;  %v6724_v51 = vld [vmem:[#allocation22_spill] sm:$0xff] }
 0x55e   :  { %v2245_v4 = vadd.f32 0.5, %v2244_v34  ;;  %v6720_v34 = vld [vmem:[#allocation20_spill] sm:$0xff] }
 0x55f   :  { %v2250_v54 = vadd.f32 0.5, %v2249_v36  ;;  %v6727_v36 = vld [vmem:[#allocation27_spill] sm:$0xff] }
 0x560   :  { %v2252_v11 = vmul.f32 %v2251_v5, %v2245_v4  ;;  %4790 = vmatpush1.bf16.msra.mxu1 %v5631_v40  ;;  %4818 = vmatpush3.bf16.msra.mxu0 %v5634_v42  ;;  %v6721_v4 = vld [vmem:[#allocation19_spill] sm:$0xff]  ;;  %v6722_v5 = vld [vmem:[#allocation21_spill] sm:$0xff] }
 0x561   :  { %4792 = vmatprep.subr.bf16.mxu1 %v5637_v43  ;;  %4819 = vmatprep.subr.bf16.mxu0 %v6641_v22  ;;  %v2255_v23 = vsub.f32 1.0, %v2250_v54  ;;  %v2257_v33 = vmul.f32 %v2250_v54, %v6200_v18 }
 0x562   :  { %v2253_v15 = vadd.f32 %v2252_v11, %v6716_v21  ;;  %v6723_v11 = vld [vmem:[#allocation23_spill] sm:$0xff]  ;;  %v6725_v21 = vld [vmem:[#allocation24_spill] sm:$0xff] }
 0x564   :  { %5160 = vtanh.f32 %v2253_v15  ;;  %4794 = vmatpush1.bf16.msra.mxu1 %v5641_v55  ;;  %4821 = vmatpush3.bf16.msra.mxu0 %v5644_v63  ;;  %v6726_v15 = vld [vmem:[#allocation61_spill] sm:$0xff] }
 0x565   :  { %4796 = vmatprep.subr.bf16.mxu1 %v5647_v0  ;;  %4822 = vmatprep.subr.bf16.mxu0 %v6641_v22  ;;  %v253_v54 = vadd.f32 %v6727_v36, %v6726_v15  ;;  %v6730_v15 = vld [vmem:[#allocation52_spill] sm:$0xff] }
 0x568   :  { %4798 = vmatpush1.bf16.msra.mxu1 %v5651_v14  ;;  %4824 = vmatpush3.bf16.msra.mxu0 %v5654_v17 }
 0x569   :  { %4800 = vmatprep.subr.bf16.mxu1 %v5657_v19  ;;  %4825 = vmatprep.subr.bf16.mxu0 %v6641_v22 }
 0x56c   :  { %4802 = vmatpush1.bf16.msra.mxu1 %v5661_v37  ;;  %4827 = vmatpush3.bf16.msra.mxu0 %v5664_v49 }
 0x56d   :  { %4804 = vmatprep.subr.bf16.mxu1 %v5667_v50  ;;  %4828 = vmatprep.subr.bf16.mxu0 %v6641_v22 }
 0x56e   :  { %v5161_v52 = vpop.eup %5160 }
 0x56f   :  { %v2256_v1 = vmul.f32 %v5161_v52, %v2255_v23  ;;  %v6728_v23 = vld [vmem:[#allocation62_spill] sm:$0xff]  ;;  %v6729_v52 = vld [vmem:[#allocation28_spill] sm:$0xff] }
 0x570   :  { %4806 = vmatpush1.bf16.msra.mxu1 %v5671_v59  ;;  %4830 = vmatpush3.bf16.msra.mxu0 %v5674_v31 }
 0x571   :  { %v6309_v46 = vadd.f32 %v2257_v33, %v2256_v1  ;;  %4832 = vmatprep.subr.bf16.mxu0 %v5434_v26  ;;  %4863 = vmatprep.subr.bf16.mxu1 %v6641_v22  ;;  %v255_v1 = vadd.f32 %v6729_v52, %v6728_v23 }
 0x573   :  { %2493 = vmatmul.mubr.f32.vlgmr.msra.gmra.mrb[46].mxu1 %v6309_v46  ;;  %4005 = vmatmul.mubr.f32.vlgmr.msra.gmra.mrb[38].mxu0 %v6309_v46  ;;  %v2262_v18 = vmul.f32 %v6318_v27, %v6309_v46 }
 0x574   :  { %4834 = vmatpush1.bf16.msra.mxu0 %v5476_v39  ;;  %4865 = vmatpush3.bf16.msra.mxu1 %v5474_v38 }
 0x575   :  { %2263 = vadd.xlane.f32.xlu1 %v2262_v18  ;;  %4836 = vmatprep.subr.bf16.mxu0 %v5478_v44 }
 0x576   :  { %4866 = vmatprep.subr.bf16.mxu1 %v6641_v22  ;;  %2661 = vmatprep.mubr.f32.mxu0 %v6642_v45 }
 0x577   :  { %4039 = vmatprep.mubr.msk.f32.mxu1 %vm5307_vm1, %v6642_v45 }
 0x578   :  { %4838 = vmatpush1.bf16.msra.mxu0 %v5488_v48  ;;  %4868 = vmatpush3.bf16.msra.mxu1 %v5486_v47 }
 0x579   :  { %4840 = vmatprep.subr.bf16.mxu0 %v5494_v53  ;;  %4869 = vmatprep.subr.bf16.mxu1 %v6641_v22 }
 0x57c   :  { %4842 = vmatpush1.bf16.msra.mxu0 %v5502_v57  ;;  %4871 = vmatpush3.bf16.msra.mxu1 %v5500_v56 }
 0x57d   :  { %4844 = vmatprep.subr.bf16.mxu0 %v5508_v62  ;;  %4872 = vmatprep.subr.bf16.mxu1 %v6641_v22 }
 0x580   :  { %4846 = vmatpush1.bf16.msra.mxu0 %v5516_v3  ;;  %4874 = vmatpush3.bf16.msra.mxu1 %v5514_v2 }
 0x581   :  { %4848 = vmatprep.subr.bf16.mxu0 %v5522_v8  ;;  %4875 = vmatprep.subr.bf16.mxu1 %v6641_v22 }
 0x584   :  { %4850 = vmatpush1.bf16.msra.mxu0 %v6697_v29  ;;  %4877 = vmatpush3.bf16.msra.mxu1 %v6698_v30 }
 0x585   :  { %4852 = vmatprep.subr.bf16.mxu0 %v6699_v12  ;;  %4878 = vmatprep.subr.bf16.mxu1 %v6641_v22 }
 0x588   :  { %4854 = vmatpush1.bf16.msra.mxu0 %v6717_v13  ;;  %4880 = vmatpush3.bf16.msra.mxu1 %v6718_v25 }
 0x589   :  { %4856 = vmatprep.subr.bf16.mxu0 %v6719_v35  ;;  %4881 = vmatprep.subr.bf16.mxu1 %v6641_v22 }
 0x58c   :  { %4858 = vmatpush1.bf16.msra.mxu0 %v6720_v34  ;;  %4883 = vmatpush3.bf16.msra.mxu1 %v6721_v4 }
 0x58d   :  { %4860 = vmatprep.subr.bf16.mxu0 %v6722_v5  ;;  %4884 = vmatprep.subr.bf16.mxu1 %v6641_v22 }
 0x590   :  { %4862 = vmatpush1.bf16.msra.mxu0 %v6723_v11  ;;  %4886 = vmatpush3.bf16.msra.mxu1 %v6724_v51 }
 0x591   :  { %4888 = vmatprep.subr.bf16.mxu1 %v6725_v21  ;;  %4919 = vmatprep.subr.bf16.mxu0 %v6641_v22 }
 0x626   :  { %v2335_v33 = vpop.f32.mrb[36].mxu0  ;;  %v2406_v18 = vpop.f32.mrb[44].mxu1 }
 0x627   :  { %v2410_v4 = vadd.f32 %v2335_v33, %v253_v54  ;;  %v2337_v5 = vpop.f32.mrb[37].mxu0  ;;  %v3971_v34 = vpop.f32.mrb[45].mxu1  ;;  %v2420_v12 = vadd.f32 %v6250_v16, %v2406_v18 }
 0x628   :  { %v2415_v35 = vadd.f32 %v2337_v5, %v255_v1  ;;  %v6731_v5 = vld [vmem:[#allocation42_spill] sm:$0xff]  ;;  %v6732_v1 = vld [vmem:[#allocation41_spill] sm:$0xff] }
 0x629   :  { %v2411_v25 = vmul.f32 0.5, %v2410_v4 }
 0x62a   :  { %v2416_v11 = vmul.f32 0.5, %v2415_v35 }
 0x62b   :  { %5162 = vtanh.f32 %v2411_v25 }
 0x62c   :  { %5164 = vtanh.f32 %v2416_v11 }
 0x635   :  { %v5163_v51 = vpop.eup %5162 }
 0x636   :  { %v2413_v21 = vmul.f32 0.5, %v5163_v51  ;;  %v5165_v36 = vpop.eup %5164 }
 0x637   :  { %v2418_v52 = vmul.f32 0.5, %v5165_v36 }
 0x638   :  { %v2414_v13 = vadd.f32 0.5, %v2413_v21 }
 0x639   :  { %v2419_v23 = vadd.f32 0.5, %v2418_v52 }
 0x63a   :  { %v2421_v30 = vmul.f32 %v2420_v12, %v2414_v13 }
 0x63b   :  { %v2424_v34 = vsub.f32 1.0, %v2419_v23  ;;  %v2426_v18 = vmul.f32 %v2419_v23, %v6257_v41 }
 0x63c   :  { %v2422_v29 = vadd.f32 %v2421_v30, %v6730_v15 }
 0x63e   :  { %5166 = vtanh.f32 %v2422_v29 }
 0x646   :  { %v2494_v54 = vpop.f32.mrb[46].mxu1  ;;  %v2565_v33 = vpop.f32.mrb[38].mxu0 }
 0x647   :  { %v2569_v4 = vadd.f32 %v2494_v54, %v6731_v5  ;;  %v2496_v25 = vpop.f32.mrb[47].mxu1  ;;  %v4006_v35 = vpop.f32.mrb[39].mxu0  ;;  %v2579_v36 = vadd.f32 %v6286_v7, %v2565_v33 }
 0x648   :  { %v5167_v11 = vpop.eup %5166  ;;  %v2574_v51 = vadd.f32 %v2496_v25, %v6732_v1 }
 0x649   :  { %v2425_v21 = vmul.f32 %v5167_v11, %v2424_v34  ;;  %v2570_v12 = vmul.f32 0.5, %v2569_v4  ;;  %v6733_v34 = vld [vmem:[#allocation43_spill] sm:$0xff] }
 0x64a   :  { %v2575_v30 = vmul.f32 0.5, %v2574_v51 }
 0x64b   :  { %5168 = vtanh.f32 %v2570_v12  ;;  %v6366_v13 = vadd.f32 %v2426_v18, %v2425_v21  ;;  %v6748_v12 = vld [vmem:[#allocation62_spill] sm:$0xff] }
 0x64c   :  { %5170 = vtanh.f32 %v2575_v30 }
 0x64d   :  { %2662 = vmatmul.mubr.f32.vlgmr.msra.gmra.mrb[40].mxu0 %v6366_v13  ;;  %4040 = vmatmul.mubr.f32.vlgmr.msra.gmra.mrb[48].mxu1 %v6366_v13  ;;  %v2587_v29 = vmul.f32 %v6264_v32, %v6366_v13 }
 0x64e   :  { %4890 = vmatpush1.bf16.msra.mxu1 %v5594_v58  ;;  %4921 = vmatpush3.bf16.msra.mxu0 %v5596_v60 }
 0x64f   :  { %2588 = vadd.xlane.f32.xlu0 %v2587_v29  ;;  %4892 = vmatprep.subr.bf16.mxu1 %v5601_v61  ;;  %v6749_v29 = vld [vmem:[#allocation30_spill] sm:$0xff] }
 0x650   :  { %4922 = vmatprep.subr.bf16.mxu0 %v6641_v22  ;;  %2820 = vmatprep.mubr.f32.mxu1 %v6642_v45  ;;  %v261_v30 = vadd.f32 %v6749_v29, %v6748_v12 }
 0x651   :  { %4074 = vmatprep.mubr.msk.f32.mxu0 %vm5307_vm1, %v6642_v45 }
 0x652   :  { %4894 = vmatpush1.bf16.msra.mxu1 %v5608_v6  ;;  %4924 = vmatpush3.bf16.msra.mxu0 %v5611_v9 }
 0x653   :  { %4896 = vmatprep.subr.bf16.mxu1 %v5614_v10  ;;  %4925 = vmatprep.subr.bf16.mxu0 %v6641_v22 }
 0x655   :  { %v5169_v41 = vpop.eup %5168 }
 0x656   :  { %v2572_v15 = vmul.f32 0.5, %v5169_v41  ;;  %4898 = vmatpush1.bf16.msra.mxu1 %v5621_v20  ;;  %4927 = vmatpush3.bf16.msra.mxu0 %v5624_v24  ;;  %v5171_v54 = vpop.eup %5170 }
 0x657   :  { %4900 = vmatprep.subr.bf16.mxu1 %v5627_v28  ;;  %4928 = vmatprep.subr.bf16.mxu0 %v6641_v22  ;;  %v2577_v4 = vmul.f32 0.5, %v5171_v54 }
 0x658   :  { %v2573_v23 = vadd.f32 0.5, %v2572_v15 }
 0x659   :  { %v2578_v33 = vadd.f32 0.5, %v2577_v4 }
 0x65a   :  { %v2580_v52 = vmul.f32 %v2579_v36, %v2573_v23  ;;  %4902 = vmatpush1.bf16.msra.mxu1 %v5631_v40  ;;  %4930 = vmatpush3.bf16.msra.mxu0 %v5634_v42 }
 0x65b   :  { %4904 = vmatprep.subr.bf16.mxu1 %v5637_v43  ;;  %4931 = vmatprep.subr.bf16.mxu0 %v6641_v22  ;;  %v2583_v25 = vsub.f32 1.0, %v2578_v33  ;;  %v2585_v1 = vmul.f32 %v2578_v33, %v6309_v46  ;;  %v6747_v46 = vld [vmem:[#allocation29_spill] sm:$0xff] }
 0x65c   :  { %v2581_v5 = vadd.f32 %v2580_v52, %v6733_v34 }
 0x65e   :  { %5172 = vtanh.f32 %v2581_v5  ;;  %4906 = vmatpush1.bf16.msra.mxu1 %v5641_v55  ;;  %4933 = vmatpush3.bf16.msra.mxu0 %v5644_v63 }
 0x65f   :  { %4908 = vmatprep.subr.bf16.mxu1 %v5647_v0  ;;  %4934 = vmatprep.subr.bf16.mxu0 %v6641_v22 }
 0x662   :  { %4910 = vmatpush1.bf16.msra.mxu1 %v5651_v14  ;;  %4936 = vmatpush3.bf16.msra.mxu0 %v5654_v17 }
 0x663   :  { %4912 = vmatprep.subr.bf16.mxu1 %v5657_v19  ;;  %4937 = vmatprep.subr.bf16.mxu0 %v6641_v22 }
 0x666   :  { %4914 = vmatpush1.bf16.msra.mxu1 %v5661_v37  ;;  %4939 = vmatpush3.bf16.msra.mxu0 %v5664_v49 }
 0x667   :  { %4916 = vmatprep.subr.bf16.mxu1 %v5667_v50  ;;  %4940 = vmatprep.subr.bf16.mxu0 %v6641_v22 }
 0x668   :  { %v5173_v35 = vpop.eup %5172 }
 0x669   :  { %v2584_v11 = vmul.f32 %v5173_v35, %v2583_v25 }
 0x66a   :  { %4918 = vmatpush1.bf16.msra.mxu1 %v5671_v59  ;;  %4942 = vmatpush3.bf16.msra.mxu0 %v5674_v31 }
 0x66b   :  { %v6408_v51 = vadd.f32 %v2585_v1, %v2584_v11  ;;  %4944 = vmatprep.subr.bf16.mxu0 %v5434_v26  ;;  %4975 = vmatprep.subr.bf16.mxu1 %v6641_v22  ;;  %v6734_v26 = vld [vmem:[#allocation14_spill] sm:$0xff] }
 0x66d   :  { %2821 = vmatmul.mubr.f32.vlgmr.msra.gmra.mrb[50].mxu1 %v6408_v51  ;;  %4075 = vmatmul.mubr.f32.vlgmr.msra.gmra.mrb[42].mxu0 %v6408_v51  ;;  %v2590_v21 = vmul.f32 %v6318_v27, %v6408_v51 }
 0x66e   :  { %4946 = vmatpush1.bf16.msra.mxu0 %v5476_v39  ;;  %4977 = vmatpush3.bf16.msra.mxu1 %v5474_v38  ;;  %v6735_v38 = vld [vmem:[#allocation13_spill] sm:$0xff]  ;;  %v6736_v39 = vld [vmem:[#allocation15_spill] sm:$0xff] }
 0x66f   :  { %2591 = vadd.xlane.f32.xlu1 %v2590_v21  ;;  %4948 = vmatprep.subr.bf16.mxu0 %v5478_v44  ;;  %v6737_v44 = vld [vmem:[#allocation17_spill] sm:$0xff]  ;;  %v6750_v21 = vld [vmem:[#allocation56_spill] sm:$0xff] }
 0x670   :  { %4978 = vmatprep.subr.bf16.mxu1 %v6641_v22  ;;  %2989 = vmatprep.mubr.f32.mxu0 %v6642_v45 }
 0x671   :  { %4109 = vmatprep.mubr.msk.f32.mxu1 %vm5307_vm1, %v6642_v45 }
 0x672   :  { %4950 = vmatpush1.bf16.msra.mxu0 %v5488_v48  ;;  %4980 = vmatpush3.bf16.msra.mxu1 %v5486_v47  ;;  %v6738_v47 = vld [vmem:[#allocation16_spill] sm:$0xff]  ;;  %v6739_v48 = vld [vmem:[#allocation18_spill] sm:$0xff] }
 0x673   :  { %4952 = vmatprep.subr.bf16.mxu0 %v5494_v53  ;;  %4981 = vmatprep.subr.bf16.mxu1 %v6641_v22  ;;  %v6740_v53 = vld [vmem:[#allocation20_spill] sm:$0xff] }
 0x676   :  { %4954 = vmatpush1.bf16.msra.mxu0 %v5502_v57  ;;  %4983 = vmatpush3.bf16.msra.mxu1 %v5500_v56  ;;  %v6741_v56 = vld [vmem:[#allocation19_spill] sm:$0xff]  ;;  %v6742_v57 = vld [vmem:[#allocation21_spill] sm:$0xff] }
 0x677   :  { %4956 = vmatprep.subr.bf16.mxu0 %v5508_v62  ;;  %4984 = vmatprep.subr.bf16.mxu1 %v6641_v22  ;;  %v6743_v62 = vld [vmem:[#allocation23_spill] sm:$0xff] }
 0x67a   :  { %4958 = vmatpush1.bf16.msra.mxu0 %v5516_v3  ;;  %4986 = vmatpush3.bf16.msra.mxu1 %v5514_v2  ;;  %v6744_v2 = vld [vmem:[#allocation22_spill] sm:$0xff]  ;;  %v6745_v3 = vld [vmem:[#allocation24_spill] sm:$0xff] }
 0x67b   :  { %4960 = vmatprep.subr.bf16.mxu0 %v5522_v8  ;;  %4987 = vmatprep.subr.bf16.mxu1 %v6641_v22  ;;  %v6746_v8 = vld [vmem:[#allocation61_spill] sm:$0xff] }
 0x67c   :  { %v259_v18 = vadd.f32 %v6747_v46, %v6746_v8 }
 0x67e   :  { %4962 = vmatpush1.bf16.msra.mxu0 %v6734_v26  ;;  %4989 = vmatpush3.bf16.msra.mxu1 %v6735_v38 }
 0x67f   :  { %4964 = vmatprep.subr.bf16.mxu0 %v6736_v39  ;;  %4990 = vmatprep.subr.bf16.mxu1 %v6641_v22 }
 0x682   :  { %4966 = vmatpush1.bf16.msra.mxu0 %v6737_v44  ;;  %4992 = vmatpush3.bf16.msra.mxu1 %v6738_v47 }
 0x683   :  { %4968 = vmatprep.subr.bf16.mxu0 %v6739_v48  ;;  %4993 = vmatprep.subr.bf16.mxu1 %v6641_v22 }
 0x686   :  { %4970 = vmatpush1.bf16.msra.mxu0 %v6740_v53  ;;  %4995 = vmatpush3.bf16.msra.mxu1 %v6741_v56  ;;  %v6751_v53 = vld [vmem:[#allocation38_spill] sm:$0xff] }
 0x687   :  { %4972 = vmatprep.subr.bf16.mxu0 %v6742_v57  ;;  %4996 = vmatprep.subr.bf16.mxu1 %v6641_v22 }
 0x68a   :  { %4974 = vmatpush1.bf16.msra.mxu0 %v6743_v62  ;;  %4998 = vmatpush3.bf16.msra.mxu1 %v6744_v2 }
 0x68b   :  { %5000 = vmatprep.subr.bf16.mxu1 %v6745_v3  ;;  %5031 = vmatprep.subr.bf16.mxu0 %v6641_v22  ;;  %v6752_v3 = vld [vmem:[#allocation37_spill] sm:$0xff] }
 0x720   :  { %v2663_v41 = vpop.f32.mrb[40].mxu0  ;;  %v2734_v15 = vpop.f32.mrb[48].mxu1 }
 0x721   :  { %v2738_v23 = vadd.f32 %v2663_v41, %v259_v18  ;;  %v2665_v36 = vpop.f32.mrb[41].mxu0  ;;  %v4041_v52 = vpop.f32.mrb[49].mxu1  ;;  %v2748_v35 = vadd.f32 %v6250_v16, %v2734_v15 }
 0x722   :  { %v2743_v54 = vadd.f32 %v2665_v36, %v261_v30 }
 0x723   :  { %v2739_v34 = vmul.f32 0.5, %v2738_v23 }
 0x724   :  { %v2744_v5 = vmul.f32 0.5, %v2743_v54 }
 0x725   :  { %5174 = vtanh.f32 %v2739_v34 }
 0x726   :  { %5176 = vtanh.f32 %v2744_v5 }
 0x72f   :  { %v5175_v4 = vpop.eup %5174 }
 0x730   :  { %v2741_v33 = vmul.f32 0.5, %v5175_v4  ;;  %v5177_v1 = vpop.eup %5176 }
 0x731   :  { %v2746_v38 = vmul.f32 0.5, %v5177_v1 }
 0x732   :  { %v2742_v25 = vadd.f32 0.5, %v2741_v33 }
 0x733   :  { %v2747_v39 = vadd.f32 0.5, %v2746_v38  ;;  %v6757_v38 = vld [vmem:[#allocation34_spill] sm:$0xff] }
 0x734   :  { %v2749_v11 = vmul.f32 %v2748_v35, %v2742_v25  ;;  %v6756_v25 = vld [vmem:[#allocation60_spill] sm:$0xff] }
 0x735   :  { %v2752_v48 = vsub.f32 1.0, %v2747_v39  ;;  %v2754_v29 = vmul.f32 %v2747_v39, %v6366_v13 }
 0x736   :  { %v2750_v26 = vadd.f32 %v2749_v11, %v6750_v21 }
 0x738   :  { %5178 = vtanh.f32 %v2750_v26 }
 0x740   :  { %v2822_v44 = vpop.f32.mrb[50].mxu1  ;;  %v2893_v47 = vpop.f32.mrb[42].mxu0 }
 0x741   :  { %v2897_v56 = vadd.f32 %v2822_v44, %v6751_v53  ;;  %v2824_v57 = vpop.f32.mrb[51].mxu1  ;;  %v4076_v62 = vpop.f32.mrb[43].mxu0  ;;  %v6758_v53 = vld [vmem:[#allocation33_spill] sm:$0xff] }
 0x742   :  { %v5179_v2 = vpop.eup %5178  ;;  %v2902_v46 = vadd.f32 %v2824_v57, %v6752_v3 }
 0x743   :  { %v2753_v18 = vmul.f32 %v5179_v2, %v2752_v48  ;;  %v2898_v30 = vmul.f32 0.5, %v2897_v56 }
 0x744   :  { %v2903_v23 = vmul.f32 0.5, %v2902_v46 }
 0x745   :  { %5180 = vtanh.f32 %v2898_v30  ;;  %v6460_v41 = vadd.f32 %v2754_v29, %v2753_v18 }
 0x746   :  { %5182 = vtanh.f32 %v2903_v23 }
 0x747   :  { %2990 = vmatmul.mubr.f32.vlgmr.msra.gmra.mrb[44].mxu0 %v6460_v41  ;;  %4110 = vmatmul.mubr.f32.vlgmr.msra.gmra.mrb[52].mxu1 %v6460_v41  ;;  %v2915_v15 = vmul.f32 %v6264_v32, %v6460_v41 }
 0x748   :  { %5002 = vmatpush1.bf16.msra.mxu1 %v5594_v58  ;;  %5033 = vmatpush3.bf16.msra.mxu0 %v5596_v60 }
 0x749   :  { %2916 = vadd.xlane.f32.xlu0 %v2915_v15  ;;  %5004 = vmatprep.subr.bf16.mxu1 %v5601_v61 }
 0x74a   :  { %5034 = vmatprep.subr.bf16.mxu0 %v6641_v22  ;;  %3148 = vmatprep.mubr.f32.mxu1 %v6642_v45 }
 0x74b   :  { %4144 = vmatprep.mubr.msk.f32.mxu0 %vm5307_vm1, %v6642_v45  ;;  %v2907_v45 = vadd.f32 %v6286_v7, %v2893_v47 }
 0x74c   :  { %5006 = vmatpush1.bf16.msra.mxu1 %v5608_v6  ;;  %5036 = vmatpush3.bf16.msra.mxu0 %v5611_v9 }
 0x74d   :  { %5008 = vmatprep.subr.bf16.mxu1 %v5614_v10  ;;  %5037 = vmatprep.subr.bf16.mxu0 %v6641_v22  ;;  %v6753_v10 = vld [vmem:[#allocation39_spill] sm:$0xff] }
 0x74f   :  { %v5181_v58 = vpop.eup %5180 }
 0x750   :  { %v2900_v60 = vmul.f32 0.5, %v5181_v58  ;;  %5010 = vmatpush1.bf16.msra.mxu1 %v5621_v20  ;;  %5039 = vmatpush3.bf16.msra.mxu0 %v5624_v24  ;;  %v5183_v9 = vpop.eup %5182 }
 0x751   :  { %5012 = vmatprep.subr.bf16.mxu1 %v5627_v28  ;;  %5040 = vmatprep.subr.bf16.mxu0 %v6641_v22  ;;  %v2905_v24 = vmul.f32 0.5, %v5183_v9 }
 0x752   :  { %v2901_v61 = vadd.f32 0.5, %v2900_v60  ;;  %v6759_v60 = vld [vmem:[#allocation35_spill] sm:$0xff] }
 0x753   :  { %v2906_v28 = vadd.f32 0.5, %v2905_v24 }
 0x754   :  { %v2908_v6 = vmul.f32 %v2907_v45, %v2901_v61  ;;  %5014 = vmatpush1.bf16.msra.mxu1 %v5631_v40  ;;  %5042 = vmatpush3.bf16.msra.mxu0 %v5634_v42 }
 0x755   :  { %5016 = vmatprep.subr.bf16.mxu1 %v5637_v43  ;;  %5043 = vmatprep.subr.bf16.mxu0 %v6641_v22  ;;  %v2911_v40 = vsub.f32 1.0, %v2906_v28 }
 0x756   :  { %v2909_v20 = vadd.f32 %v2908_v6, %v6753_v10  ;;  %v3314_v6 = vld [vmem:[#allocation2] ss:$0 sm:$0xff] }
 0x758   :  { %5184 = vtanh.f32 %v2909_v20  ;;  %5018 = vmatpush1.bf16.msra.mxu1 %v5641_v55  ;;  %5045 = vmatpush3.bf16.msra.mxu0 %v5644_v63  ;;  %v2913_v55 = vmul.f32 %v2906_v28, %v6408_v51 }
 0x759   :  { %5020 = vmatprep.subr.bf16.mxu1 %v5647_v0  ;;  %5046 = vmatprep.subr.bf16.mxu0 %v6641_v22 }
 0x75c   :  { %5022 = vmatpush1.bf16.msra.mxu1 %v5651_v14  ;;  %5048 = vmatpush3.bf16.msra.mxu0 %v5654_v17  ;;  %v5308_v14 = vmov 0   ;;  %v6754_v17 = vld [vmem:[#allocation31_spill] sm:$0xff] }
 0x75d   :  { %5024 = vmatprep.subr.bf16.mxu1 %v5657_v19  ;;  %5049 = vmatprep.subr.bf16.mxu0 %v6641_v22  ;;  %v265_v19 = vadd.f32 %v6754_v17, %v6746_v8 }
 0x75e   :  { %5101 = vset.pattern.permute.xlu0 %v5308_v14 }
 0x760   :  { %5026 = vmatpush1.bf16.msra.mxu1 %v5661_v37  ;;  %5051 = vmatpush3.bf16.msra.mxu0 %v5664_v49  ;;  %v6755_v37 = vld [vmem:[#allocation32_spill] sm:$0xff] }
 0x761   :  { %5028 = vmatprep.subr.bf16.mxu1 %v5667_v50  ;;  %5052 = vmatprep.subr.bf16.mxu0 %v6641_v22  ;;  %v267_v49 = vadd.f32 %v6755_v37, %v6748_v12 }
 0x762   :  { %v5185_v42 = vpop.eup %5184 }
 0x763   :  { %v2912_v43 = vmul.f32 %v5185_v42, %v2911_v40  ;;  %v941_v40 = vpop.xlane.xlu0 %940  ;;  %v6760_v42 = vlaneseq }
 0x764   :  { %5030 = vmatpush1.bf16.msra.mxu1 %v5671_v59  ;;  %5054 = vmatpush3.bf16.msra.mxu0 %v5674_v31 }
 0x765   :  { %v2914_v63 = vadd.f32 %v2913_v55, %v2912_v43  ;;  %v1271_v55 = vpop.xlane.xlu1 %1270 }
 0x767   :  { %3149 = vmatmul.mubr.f32.vlgmr.msra.gmra.mrb[54].mxu1 %v2914_v63  ;;  %4145 = vmatmul.mubr.f32.vlgmr.msra.gmra.mrb[46].mxu0 %v2914_v63  ;;  %v2918_v0 = vmul.f32 %v6318_v27, %v2914_v63  ;;  %v944_v43 = vpop.xlane.xlu0 %943 }
 0x769   :  { %2919 = vadd.xlane.f32.xlu1 %v2918_v0  ;;  %v1274_v14 = vpop.xlane.xlu1 %1273 }
 0x81a   :  { %v2991_v50 = vpop.f32.mrb[44].mxu0  ;;  %v3062_v22 = vpop.f32.mrb[52].mxu1 }
 0x81b   :  { %v3066_v13 = vadd.f32 %v2991_v50, %v265_v19  ;;  %v2993_v59 = vpop.f32.mrb[45].mxu0  ;;  %v4111_v51 = vpop.f32.mrb[53].mxu1  ;;  %v3076_v4 = vadd.f32 %v6250_v16, %v3062_v22 }
 0x81c   :  { %v3071_v31 = vadd.f32 %v2993_v59, %v267_v49  ;;  %v1604_v50 = vpop.xlane.xlu1 %1603 }
 0x81d   :  { %v3067_v36 = vmul.f32 0.5, %v3066_v13 }
 0x81e   :  { %v3072_v52 = vmul.f32 0.5, %v3071_v31 }
 0x81f   :  { %5186 = vtanh.f32 %v3067_v36 }
 0x820   :  { %5188 = vtanh.f32 %v3072_v52  ;;  %v1934_v36 = vpop.xlane.xlu1 %1933 }
 0x829   :  { %v5187_v54 = vpop.eup %5186 }
 0x82a   :  { %v3069_v34 = vmul.f32 0.5, %v5187_v54  ;;  %v5189_v8 = vpop.eup %5188 }
 0x82b   :  { %v3074_v12 = vmul.f32 0.5, %v5189_v8 }
 0x82c   :  { %v3070_v5 = vadd.f32 0.5, %v3069_v34 }
 0x82d   :  { %v3075_v11 = vadd.f32 0.5, %v3074_v12 }
 0x82e   :  { %v3077_v33 = vmul.f32 %v3076_v4, %v3070_v5 }
 0x82f   :  { %v3080_v26 = vsub.f32 1.0, %v3075_v11  ;;  %v3082_v16 = vmul.f32 %v3075_v11, %v6460_v41 }
 0x830   :  { %v3078_v35 = vadd.f32 %v3077_v33, %v6756_v25  ;;  %v2264_v33 = vpop.xlane.xlu1 %2263 }
 0x832   :  { %5190 = vtanh.f32 %v3078_v35 }
 0x83a   :  { %v3150_v1 = vpop.f32.mrb[54].mxu1  ;;  %v3221_v21 = vpop.f32.mrb[46].mxu0 }
 0x83b   :  { %v3225_v39 = vadd.f32 %v3150_v1, %v6757_v38  ;;  %v3152_v44 = vpop.f32.mrb[55].mxu1  ;;  %v4146_v47 = vpop.f32.mrb[47].mxu0  ;;  %v3235_v15 = vadd.f32 %v6286_v7, %v3221_v21  ;;  %v620_v7 = vand.u32 127, %v6760_v42 }
 0x83c   :  { %v5191_v48 = vpop.eup %5190  ;;  %v3230_v56 = vadd.f32 %v3152_v44, %v6758_v53  ;;  %v2592_v1 = vpop.xlane.xlu1 %2591 }
 0x83d   :  { %v3226_v57 = vmul.f32 0.5, %v3225_v39  ;;  %v3081_v62 = vmul.f32 %v5191_v48, %v3080_v26  ;;  %vm948_vm2 = vcmp.eq.s32.totalorder %v620_v7, 7  ;;  %vm945_vm3 = vcmp.eq.s32.totalorder %v620_v7, 0 }
 0x83e   :  { %v3231_v46 = vmul.f32 0.5, %v3230_v56  ;;  %vm1275_vm4 = vcmp.eq.s32.totalorder %v620_v7, 1  ;;  %v949_v0 = vsel %vm948_vm2, %v944_v43, 0.0  ;;  %vm1278_vm5 = vcmp.eq.s32.totalorder %v620_v7, 6 }
 0x83f   :  { %5192 = vtanh.f32 %v3226_v57  ;;  %v3083_v2 = vadd.f32 %v3082_v16, %v3081_v62  ;;  %v946_v17 = vsel %vm945_vm3, %v941_v40, 0.0  ;;  %vm1605_vm6 = vcmp.eq.s32.totalorder %v620_v7, 2 }
 0x840   :  { %5194 = vtanh.f32 %v3231_v46  ;;  %v950_v19 = vadd.f32 %v949_v0, %v946_v17  ;;  %v1279_v37 = vsel %vm1278_vm5, %v1274_v14, 0.0  ;;  %vm1608_vm7 = vcmp.eq.s32.totalorder %v620_v7, 5  ;;  %v2920_v47 = vpop.xlane.xlu1 %2919 }
 0x841   :  { %v3243_v3 = vmul.f32 %v6264_v32, %v3083_v2  ;;  %vm1935_vm8 = vcmp.eq.s32.totalorder %v620_v7, 3  ;;  %v1609_v51 = vsel %vm1608_vm7, %v1604_v50, 0.0  ;;  %vm1938_vm9 = vcmp.eq.s32.totalorder %v620_v7, 4 }
 0x842   :  { %v1939_v5 = vsel %vm1938_vm9, %v1934_v36, 0.0  ;;  %v2267_v12 = vsel %vm1935_vm8, %v2264_v33, 0.0  ;;  %v2595_v39 = vsel %vm1605_vm6, %v2592_v1, 0.0  ;;  %v2923_v57 = vsel %vm1275_vm4, %v2920_v47, 0.0 }
 0x843   :  { %3244 = vadd.xlane.f32.xlu0 %v3243_v3 }
 0x849   :  { %v5193_v18 = vpop.eup %5192 }
 0x84a   :  { %v3228_v29 = vmul.f32 0.5, %v5193_v18  ;;  %v5195_v58 = vpop.eup %5194 }
 0x84b   :  { %v3233_v45 = vmul.f32 0.5, %v5195_v58 }
 0x84c   :  { %v3229_v30 = vadd.f32 0.5, %v3228_v29 }
 0x84d   :  { %v3234_v41 = vadd.f32 0.5, %v3233_v45 }
 0x84e   :  { %v3236_v23 = vmul.f32 %v3235_v15, %v3229_v30 }
 0x84f   :  { %v3239_v9 = vsub.f32 1.0, %v3234_v41  ;;  %v3241_v20 = vmul.f32 %v3234_v41, %v2914_v63  ;;  %v1276_v63 = vsel %vm1275_vm4, %v1271_v55, 0.0 }
 0x850   :  { %v3237_v61 = vadd.f32 %v3236_v23, %v6759_v60  ;;  %v1277_v49 = vadd.f32 %v1276_v63, %v950_v19 }
 0x852   :  { %5196 = vtanh.f32 %v3237_v61  ;;  %v1280_v13 = vadd.f32 %v1279_v37, %v1277_v49 }
 0x859   :  { %3260 = vperm.xlu0 %5101, %v3314_v6  }
 0x85c   :  { %v5197_v10 = vpop.eup %5196 }
 0x85d   :  { %v3240_v32 = vmul.f32 %v5197_v10, %v3239_v9 }
 0x85f   :  { %v3242_v24 = vadd.f32 %v3241_v20, %v3240_v32 }
 0x861   :  { %v3246_v28 = vmul.f32 %v6318_v27, %v3242_v24  ;;  %v1601_v27 = vpop.xlane.xlu0 %1600 }
 0x862   :  { %v1606_v22 = vsel %vm1605_vm6, %v1601_v27, 0.0 }
 0x863   :  { %3247 = vadd.xlane.f32.xlu1 %v3246_v28  ;;  %v1607_v31 = vadd.f32 %v1606_v22, %v1280_v13 }
 0x865   :  { %v1931_v59 = vpop.xlane.xlu0 %1930  ;;  %v1610_v54 = vadd.f32 %v1609_v51, %v1607_v31 }
 0x866   :  { %v1936_v52 = vsel %vm1935_vm8, %v1931_v59, 0.0 }
 0x867   :  { %v1937_v4 = vadd.f32 %v1936_v52, %v1610_v54 }
 0x869   :  { %v2261_v34 = vpop.xlane.xlu0 %2260  ;;  %v1940_v25 = vadd.f32 %v1939_v5, %v1937_v4 }
 0x86a   :  { %v2265_v8 = vsel %vm1938_vm9, %v2261_v34, 0.0 }
 0x86b   :  { %v2266_v11 = vadd.f32 %v2265_v8, %v1940_v25 }
 0x86d   :  { %v2589_v35 = vpop.xlane.xlu0 %2588  ;;  %v2268_v26 = vadd.f32 %v2267_v12, %v2266_v11 }
 0x86e   :  { %v2593_v21 = vsel %vm1608_vm7, %v2589_v35, 0.0 }
 0x86f   :  { %v2594_v44 = vadd.f32 %v2593_v21, %v2268_v26 }
 0x871   :  { %v2917_v38 = vpop.xlane.xlu0 %2916  ;;  %v2596_v53 = vadd.f32 %v2595_v39, %v2594_v44 }
 0x872   :  { %v2921_v48 = vsel %vm1278_vm5, %v2917_v38, 0.0 }
 0x873   :  { %v2922_v62 = vadd.f32 %v2921_v48, %v2596_v53 }
 0x875   :  { %v2924_v2 = vadd.f32 %v2923_v57, %v2922_v62 }
 0x8d0   :  { %v3245_v56 = vpop.xlane.xlu0 %3244 }
 0x8d1   :  { %v3249_v16 = vsel %vm948_vm2, %v3245_v56, 0.0 }
 0x8d2   :  { %v3250_v3 = vadd.f32 %v3249_v16, %v2924_v2 }
 0x8d8   :  { %v3261_v29 = vpop.permute.xlu0 %3260 }
 0x8f0   :  { %v3248_v46 = vpop.xlane.xlu1 %3247 }
 0x8f1   :  { %v3251_v18 = vsel %vm945_vm3, %v3248_v46, 0.0 }
 0x8f2   :  { %v3252_v30 = vadd.f32 %v3251_v18, %v3250_v3 }
 0x8f4   :  { %v3263_v15 = vadd.f32 %v3261_v29, %v3252_v30 }
 0x8f6   :  { %v3264_v23 = vmul.f32 0.5, %v3263_v15 }
 0x8f8   :  { %5198 = vtanh.f32 %v3264_v23 }
 0x902   :  { %v5199_v58 = vpop.eup %5198 }
 0x903   :  { %v3266_v60 = vmul.f32 0.5, %v5199_v58 }
 0x905   :  { %v3267_v61 = vadd.f32 0.5, %v3266_v60 }
 0x907   :  { %3269 = vst.msk [vmem:[#allocation9] sm:$0xff] %vm3268_vm10, %v3267_v61 }
 0x908   :  { %5281 = shalt.err (!%p5278_p0)
}
 0x909   :  { %s5282_s16 = scalar_lea.hbm %s6551_s10, 128 }
 0x90a   :  { %p5283_p1 = scmp.ne.s32.totalorder %s6551_s10, %s5282_s16  ;;  %p5286_p2 = scmp.lt.u32.totalorder %s5282_s16, %s6551_s10 }
 0x90c   :  { %p5288_p3 = pnand %p5286_p2, %p5283_p1 }
 0x90e   :  { %5291 = shalt.err (!%p5288_p3)
}
 0x90f   :  { %3279 = dma.vmem_to_hbm [thread:$0]  %s3277_s15, 128, %s6551_s10, [#allocation5]  }
 0x910   :  { %5296 = dma.done.wait [#allocation5], 128  }
 0x911   :  { %5297 = vsyncadd [#allocation5], 4294967168 }
 0x912   :  { %3283 = vsyncpa [#allocation4], 1 }
 0x913   :  { %3284 = vsyncpa [#allocation7], 1 }
 0x914   :  { %3285 = vsyncpa [#allocation5], 1 }

</bundles_post_ra>
